<compile_context>
chip_gen: v7x
topology: tpu7x:2x2x1
jax: 0.10.0
libtpu: 0.0.40
codegen_flags: <defaults>
</compile_context>

<pallas_src>
import functools

import jax
import jax.numpy as jnp
from jax import lax
from jax.experimental import pallas as pl
from jax.experimental.pallas import tpu as pltpu


# -----------------------------------------------------------------------------
# helpers
# -----------------------------------------------------------------------------
def _lane_rot(v, shift):
    """out[:, n] = v[:, (n + shift) % N] for a static shift (two lane slices + concat)."""
    n = v.shape[-1]
    s = shift % n
    if s == 0:
        return v
    return jnp.concatenate([v[:, s:], v[:, :s]], axis=-1)


def _halo_masks(H, W):
    """(9, H*W) f32 validity masks for the 9 taps of a padding=1 3x3 conv."""
    n = jnp.arange(H * W, dtype=jnp.int32)
    h, w = n // W, n % W
    rows = []
    for dy in (-1, 0, 1):
        for dx in (-1, 0, 1):
            ok = (h + dy >= 0) & (h + dy < H) & (w + dx >= 0) & (w + dx < W)
            rows.append(ok.astype(jnp.float32))
    return jnp.stack(rows, axis=0)


# -----------------------------------------------------------------------------
# fused DANet head kernel (per-batch grid)
# -----------------------------------------------------------------------------
def _danet_head_kernel(
    pam_g_ref, cam_g_ref,            # SMEM (1, 1) scalars
    x_ref,                           # (Cin_pad, N) flattened NCHW image
    mask_ref,                        # (9, N) halo masks
    w_stem_ref, b_stem_ref,          # (Cf, 9*Cin_pad), (Cf, 1)
    w_in_ref, b_in_ref,              # (2*Ch, 9*Cf),    (2*Ch, 1)
    wqk_ref, wv_ref, bv_ref,         # (Ch, Ch), (Ch, Ch), (Ch, 1)
    w_out_ref, b_out_ref,            # (2*Ch, 9*2*Ch),  (2*Ch, 1)
    w_seg_ref, b_seg_ref,            # (nc, Ch), (nc, 1)
    o_ref,                           # (nc, N)  -> NCHW seg logits
    *, W, Ch):
    f32 = jnp.float32
    bf16 = jnp.bfloat16

    masks = mask_ref[...]                                            # (9, N), loaded once
    shifts = tuple(dy * W + dx for dy in (-1, 0, 1) for dx in (-1, 0, 1))

    def conv3x3(v, w_ref_, b_ref_, relu=True):
        # v: (Cin, N) f32 -> (Cout, N) f32; one deep dot on a masked-rotation im2col.
        cols = [_lane_rot(v, shifts[t]) * masks[t:t + 1, :] for t in range(9)]
        patch = jnp.concatenate(cols, axis=0).astype(bf16)           # (9*Cin, N)
        y = jnp.dot(w_ref_[...].astype(bf16), patch,
                    preferred_element_type=f32) + b_ref_[...]
        return jnp.maximum(y, 0.0) if relu else y

    # ---- backbone stem (stand-in) + fused PAM-in | CAM-in 3x3 convs ----------
    feat = conv3x3(x_ref[...], w_stem_ref, b_stem_ref)               # (Cf, N)
    att_in = conv3x3(feat, w_in_ref, b_in_ref)                       # (2*Ch, N)
    pam_in = att_in[:Ch, :]
    cam_in = att_in[Ch:, :]

    # ---- Position Attention Module (q/k folded: Wqk = Wk^T @ Wq) -------------
    pam_b = pam_in.astype(bf16)
    y = jnp.dot(wqk_ref[...].astype(bf16), pam_b, preferred_element_type=f32)   # (Ch, N)
    energy = lax.dot_general(y.astype(bf16), pam_b, (((0,), (0,)), ((), ())),
                             preferred_element_type=f32)             # (N, N): q_i . k_j
    energy = energy - jnp.max(energy, axis=-1, keepdims=True)
    p = jnp.exp(energy)
    attn = p * pl.reciprocal(jnp.sum(p, axis=-1, keepdims=True), approx=True)
    v = jnp.dot(wv_ref[...].astype(bf16), pam_b,
                preferred_element_type=f32) + bv_ref[...]            # (Ch, N)
    pam_out = lax.dot_general(v.astype(bf16), attn.astype(bf16),
                              (((1,), (1,)), ((), ())),
                              preferred_element_type=f32)            # (Ch, N)
    pam_att = pam_g_ref[0, 0] * pam_out + pam_in

    # ---- Channel Attention Module --------------------------------------------
    cam_b = cam_in.astype(bf16)
    ce = lax.dot_general(cam_b, cam_b, (((1,), (1,)), ((), ())),
                         preferred_element_type=f32)                 # (Ch, Ch)
    # softmax(rowmax(ce) - ce) == exp(rowmin(ce) - ce) / sum  (shift invariance, stable)
    cp = jnp.exp(jnp.min(ce, axis=-1, keepdims=True) - ce)
    cattn = cp * pl.reciprocal(jnp.sum(cp, axis=-1, keepdims=True), approx=True)
    cam_out = jnp.dot(cattn.astype(bf16), cam_b, preferred_element_type=f32)     # (Ch, N)
    cam_att = cam_g_ref[0, 0] * cam_out + cam_in

    # ---- block-diag out convs + ReLU, branch sum, fused 1x1 seg conv ---------
    both = jnp.concatenate([pam_att, cam_att], axis=0)               # (2*Ch, N)
    feats = conv3x3(both, w_out_ref, b_out_ref)                      # (2*Ch, N)
    fsum = feats[:Ch, :] + feats[Ch:, :]
    seg = jnp.dot(w_seg_ref[...].astype(bf16), fsum.astype(bf16),
                  preferred_element_type=f32) + b_seg_ref[...]       # (nc, N)
    o_ref[...] = seg                                                 # lane-dense store


# -----------------------------------------------------------------------------
# forward pass (forward_dummy: stem -> DAHead (PAM + CAM) -> fused 1x1 seg conv)
# -----------------------------------------------------------------------------
def danet_forward(x_nchw, params, *, head_ch=16, num_classes=8):
    B, cin, H, W = x_nchw.shape
    N = H * W
    feat_ch = params["stem_b"].shape[0]
    cin_pad = params["stem_w"].shape[1] // 9
    c2 = 2 * head_ch

    x = x_nchw.reshape(B, cin, N).astype(jnp.float32)
    if cin_pad > cin:                            # tiny zero-pad so sublane tiles align
        x = jnp.pad(x, ((0, 0), (0, cin_pad - cin), (0, 0)))
    masks = _halo_masks(H, W)

    flops = int(2 * B * N * (feat_ch * 9 * cin_pad + c2 * 9 * feat_ch + c2 * 9 * c2
                             + 3 * head_ch * head_ch + 2 * head_ch * N
                             + num_classes * head_ch))
    cost = pl.CostEstimate(
        flops=flops,
        transcendentals=int(B * (N * N + head_ch * head_ch)),
        bytes_accessed=int(4 * (B * (cin_pad + num_classes) * N + 9 * N
                                + sum(int(v.size) for v in params.values()))))

    kern = functools.partial(_danet_head_kernel, W=W, Ch=head_ch)
    seg = pl.pallas_call(
        kern,
        out_shape=jax.ShapeDtypeStruct((B, num_classes, N), jnp.float32),
        grid=(B,),
        in_specs=[
            pl.BlockSpec(memory_space=pltpu.MemorySpace.SMEM),          # pam gamma (1,1)
            pl.BlockSpec(memory_space=pltpu.MemorySpace.SMEM),          # cam gamma (1,1)
            pl.BlockSpec((None, cin_pad, N), lambda b: (b, 0, 0)),      # image (C, N)
            pl.BlockSpec((9, N), lambda b: (0, 0)),                     # halo masks
            pl.BlockSpec((feat_ch, 9 * cin_pad), lambda b: (0, 0)),     # stem w
            pl.BlockSpec((feat_ch, 1), lambda b: (0, 0)),               # stem b
            pl.BlockSpec((c2, 9 * feat_ch), lambda b: (0, 0)),          # in w (stacked)
            pl.BlockSpec((c2, 1), lambda b: (0, 0)),                    # in b
            pl.BlockSpec((head_ch, head_ch), lambda b: (0, 0)),         # Wqk
            pl.BlockSpec((head_ch, head_ch), lambda b: (0, 0)),         # Wv
            pl.BlockSpec((head_ch, 1), lambda b: (0, 0)),               # bv
            pl.BlockSpec((c2, 9 * c2), lambda b: (0, 0)),               # out w (blkdiag)
            pl.BlockSpec((c2, 1), lambda b: (0, 0)),                    # out b
            pl.BlockSpec((num_classes, head_ch), lambda b: (0, 0)),     # seg w
            pl.BlockSpec((num_classes, 1), lambda b: (0, 0)),           # seg b
        ],
        out_specs=pl.BlockSpec((None, num_classes, N), lambda b: (b, 0, 0)),
        compiler_params=pltpu.CompilerParams(dimension_semantics=("parallel",)),
        cost_estimate=cost,
    )(params["pam_gamma"], params["cam_gamma"], x, masks,
      params["stem_w"], params["stem_b"], params["in_w"], params["in_b"],
      params["pam_wqk"], params["pam_v_w"], params["pam_v_b"],
      params["out_w"], params["out_b"], params["seg_w"], params["seg_b"])

    return seg.reshape(B, num_classes, H, W)                          # already NCHW


# -----------------------------------------------------------------------------
# parameter setup (synthetic weights standing in for the checkpoint)
# -----------------------------------------------------------------------------
def _conv3x3_mat(key, cin, cout, *, cin_pad=None, scale=0.05):
    """Random 3x3 conv (PyTorch (cout,cin,kh,kw)) -> (cout, 9*cin_pad) tap matrix."""
    w = jax.random.normal(key, (cout, cin, 3, 3), jnp.float32) * scale
    w = jnp.transpose(w, (0, 2, 3, 1))                                # (cout, kh, kw, cin)
    cp = cin if cin_pad is None else cin_pad
    if cp > cin:
        w = jnp.pad(w, ((0, 0), (0, 0), (0, 0), (0, cp - cin)))
    return w.reshape(cout, 9 * cp)


def _fold_bn(w_mat, bias, var=1.0, eps=1e-5):
    # synthetic BN: gamma=1, beta=0, running_mean=0, running_var=1
    s = 1.0 / jnp.sqrt(var + eps)
    return w_mat * s, bias * s


def init_danet_params(key, *, in_ch=3, feat_ch=32, head_ch=16, num_classes=8):
    ks = jax.random.split(key, 12)
    inter = max(1, head_ch // 8)
    cin_pad = ((in_ch + 7) // 8) * 8
    p = {}

    # stem (stand-in for the ResNet-101-d8 backbone)
    p["stem_w"], p["stem_b"] = _fold_bn(
        _conv3x3_mat(ks[0], in_ch, feat_ch, cin_pad=cin_pad),
        jnp.zeros((feat_ch, 1), jnp.float32))

    # fused PAM-in | CAM-in 3x3 convs (same input, stacked along Cout)
    piw, pib = _fold_bn(_conv3x3_mat(ks[1], feat_ch, head_ch),
                        jnp.zeros((head_ch, 1), jnp.float32))
    ciw, cib = _fold_bn(_conv3x3_mat(ks[2], feat_ch, head_ch),
                        jnp.zeros((head_ch, 1), jnp.float32))
    p["in_w"] = jnp.concatenate([piw, ciw], axis=0)                   # (2*Ch, 9*Cf)
    p["in_b"] = jnp.concatenate([pib, cib], axis=0)

    # PAM projections (layout y = W @ x with x (C, N)).
    # TODO(synk): q/k conv biases are zero here, so folding Wqk = Wk^T @ Wq is exact;
    #             a real checkpoint with nonzero q/k biases would need the unfolded form.
    wq = jax.random.normal(ks[3], (inter, head_ch), jnp.float32) * 0.05
    wk = jax.random.normal(ks[4], (inter, head_ch), jnp.float32) * 0.05
    p["pam_wqk"] = wk.T @ wq                                          # (Ch, Ch), rank<=inter
    p["pam_v_w"] = jax.random.normal(ks[5], (head_ch, head_ch), jnp.float32) * 0.05
    p["pam_v_b"] = jnp.zeros((head_ch, 1), jnp.float32)

    # fused PAM-out | CAM-out 3x3 convs: block-diagonal over the stacked (2*Ch) input
    pow_, pob = _fold_bn(_conv3x3_mat(ks[6], head_ch, head_ch),
                         jnp.zeros((head_ch, 1), jnp.float32))
    cow, cob = _fold_bn(_conv3x3_mat(ks[7], head_ch, head_ch),
                        jnp.zeros((head_ch, 1), jnp.float32))
    po3 = pow_.reshape(head_ch, 9, head_ch)
    co3 = cow.reshape(head_ch, 9, head_ch)
    z = jnp.zeros_like(po3)
    p["out_w"] = jnp.concatenate(
        [jnp.concatenate([po3, z], axis=-1),
         jnp.concatenate([z, co3], axis=-1)],
        axis=0).reshape(2 * head_ch, 9 * 2 * head_ch)
    p["out_b"] = jnp.concatenate([pob, cob], axis=0)

    # segmentation head (1x1 conv) applied to pam_feat + cam_feat
    p["seg_w"] = jax.random.normal(ks[8], (num_classes, head_ch), jnp.float32) * 0.05
    p["seg_b"] = jax.random.normal(ks[9], (num_classes, 1), jnp.float32) * 0.01

    # attention scales (PyTorch inits gamma=0; nonzero so the attention paths contribute)
    p["pam_gamma"] = jnp.full((1, 1), 0.5, jnp.float32)
    p["cam_gamma"] = jnp.full((1, 1), 0.5, jnp.float32)
    return p


# -----------------------------------------------------------------------------
if __name__ == "__main__":
    key = jax.random.PRNGKey(0)
    k_param, k_x = jax.random.split(key)

    B, C_IN, H, W = 2, 3, 16, 16
    NUM_CLASSES = 8

    params = init_danet_params(k_param, in_ch=C_IN, num_classes=NUM_CLASSES)
    x = jax.random.normal(k_x, (B, C_IN, H, W), jnp.float32)

    fwd = jax.jit(functools.partial(danet_forward, num_classes=NUM_CLASSES))
    out = jax.block_until_ready(fwd(x, params))

    assert out.shape == (B, NUM_CLASSES, H, W), out.shape
    assert bool(jnp.all(jnp.isfinite(out)))
    print("KERNEL_OK")
</pallas_src>

<mosaic_0001>
module attributes {stable_mosaic.version = 11 : i64} {
  func.func @_danet_head_kernel(%arg0: i32, %arg1: memref<1x1xf32, #tpu.memory_space<smem>>, %arg2: memref<1x1xf32, #tpu.memory_space<smem>>, %arg3: memref<1x8x256xf32, #tpu.memory_space<vmem>>, %arg4: memref<9x256xf32, #tpu.memory_space<vmem>>, %arg5: memref<32x72xf32, #tpu.memory_space<vmem>>, %arg6: memref<32x1xf32, #tpu.memory_space<vmem>>, %arg7: memref<32x288xf32, #tpu.memory_space<vmem>>, %arg8: memref<32x1xf32, #tpu.memory_space<vmem>>, %arg9: memref<16x16xf32, #tpu.memory_space<vmem>>, %arg10: memref<16x16xf32, #tpu.memory_space<vmem>>, %arg11: memref<16x1xf32, #tpu.memory_space<vmem>>, %arg12: memref<32x288xf32, #tpu.memory_space<vmem>>, %arg13: memref<32x1xf32, #tpu.memory_space<vmem>>, %arg14: memref<8x16xf32, #tpu.memory_space<vmem>>, %arg15: memref<8x1xf32, #tpu.memory_space<vmem>>, %arg16: memref<1x8x256xf32, #tpu.memory_space<vmem>>) attributes {dimension_semantics = [#tpu.dimension_semantics<parallel>], iteration_bounds = array<i64: 2>, scalar_prefetch = 0 : i64, scratch_operands = 0 : i64, tpu.core_type = #tpu.core_type<tc>, window_params = [{transform_indices = @transform_0, window_bounds = array<i64: 1, 1>}, {transform_indices = @transform_1, window_bounds = array<i64: 1, 1>}, {transform_indices = @transform_2, window_bounds = array<i64: 1, 8, 256>}, {pipeline_mode = #tpu.pipeline_mode<synchronous>, transform_indices = @transform_3, window_bounds = array<i64: 9, 256>}, {pipeline_mode = #tpu.pipeline_mode<synchronous>, transform_indices = @transform_4, window_bounds = array<i64: 32, 72>}, {pipeline_mode = #tpu.pipeline_mode<synchronous>, transform_indices = @transform_5, window_bounds = array<i64: 32, 1>}, {pipeline_mode = #tpu.pipeline_mode<synchronous>, transform_indices = @transform_6, window_bounds = array<i64: 32, 288>}, {pipeline_mode = #tpu.pipeline_mode<synchronous>, transform_indices = @transform_7, window_bounds = array<i64: 32, 1>}, {pipeline_mode = #tpu.pipeline_mode<synchronous>, transform_indices = @transform_8, window_bounds = array<i64: 16, 16>}, {pipeline_mode = #tpu.pipeline_mode<synchronous>, transform_indices = @transform_9, window_bounds = array<i64: 16, 16>}, {pipeline_mode = #tpu.pipeline_mode<synchronous>, transform_indices = @transform_10, window_bounds = array<i64: 16, 1>}, {pipeline_mode = #tpu.pipeline_mode<synchronous>, transform_indices = @transform_11, window_bounds = array<i64: 32, 288>}, {pipeline_mode = #tpu.pipeline_mode<synchronous>, transform_indices = @transform_12, window_bounds = array<i64: 32, 1>}, {pipeline_mode = #tpu.pipeline_mode<synchronous>, transform_indices = @transform_13, window_bounds = array<i64: 8, 16>}, {pipeline_mode = #tpu.pipeline_mode<synchronous>, transform_indices = @transform_14, window_bounds = array<i64: 8, 1>}, {transform_indices = @transform_15, window_bounds = array<i64: 1, 8, 256>}]} {
    %c0 = arith.constant 0 : index
    %c0_0 = arith.constant 0 : index
    %0 = vector.load %arg4[%c0, %c0_0] : memref<9x256xf32, #tpu.memory_space<vmem>>, vector<9x256xf32>
    %c0_1 = arith.constant 0 : index
    %c0_2 = arith.constant 0 : index
    %c0_3 = arith.constant 0 : index
    %1 = vector.load %arg3[%c0_1, %c0_2, %c0_3] : memref<1x8x256xf32, #tpu.memory_space<vmem>>, vector<1x8x256xf32>
    %2 = vector.shape_cast %1 : vector<1x8x256xf32> to vector<8x256xf32>
    %3 = vector.extract_strided_slice %2 {offsets = [0, 239], sizes = [8, 17], strides = [1, 1]} : vector<8x256xf32> to vector<8x17xf32>
    %4 = vector.extract_strided_slice %2 {offsets = [0, 0], sizes = [8, 239], strides = [1, 1]} : vector<8x256xf32> to vector<8x239xf32>
    %5 = tpu.concatenate %3, %4 in 1 : vector<8x17xf32>, vector<8x239xf32> -> vector<8x256xf32>
    %6 = vector.extract_strided_slice %0 {offsets = [0, 0], sizes = [1, 256], strides = [1, 1]} : vector<9x256xf32> to vector<1x256xf32>
    %7 = vector.broadcast %6 : vector<1x256xf32> to vector<8x256xf32>
    %8 = arith.mulf %5, %7 : vector<8x256xf32>
    %9 = vector.extract_strided_slice %2 {offsets = [0, 240], sizes = [8, 16], strides = [1, 1]} : vector<8x256xf32> to vector<8x16xf32>
    %10 = vector.extract_strided_slice %2 {offsets = [0, 0], sizes = [8, 240], strides = [1, 1]} : vector<8x256xf32> to vector<8x240xf32>
    %11 = tpu.concatenate %9, %10 in 1 : vector<8x16xf32>, vector<8x240xf32> -> vector<8x256xf32>
    %12 = vector.extract_strided_slice %0 {offsets = [1, 0], sizes = [1, 256], strides = [1, 1]} : vector<9x256xf32> to vector<1x256xf32>
    %13 = vector.broadcast %12 : vector<1x256xf32> to vector<8x256xf32>
    %14 = arith.mulf %11, %13 : vector<8x256xf32>
    %15 = vector.extract_strided_slice %2 {offsets = [0, 241], sizes = [8, 15], strides = [1, 1]} : vector<8x256xf32> to vector<8x15xf32>
    %16 = vector.extract_strided_slice %2 {offsets = [0, 0], sizes = [8, 241], strides = [1, 1]} : vector<8x256xf32> to vector<8x241xf32>
    %17 = tpu.concatenate %15, %16 in 1 : vector<8x15xf32>, vector<8x241xf32> -> vector<8x256xf32>
    %18 = vector.extract_strided_slice %0 {offsets = [2, 0], sizes = [1, 256], strides = [1, 1]} : vector<9x256xf32> to vector<1x256xf32>
    %19 = vector.broadcast %18 : vector<1x256xf32> to vector<8x256xf32>
    %20 = arith.mulf %17, %19 : vector<8x256xf32>
    %21 = vector.extract_strided_slice %2 {offsets = [0, 255], sizes = [8, 1], strides = [1, 1]} : vector<8x256xf32> to vector<8x1xf32>
    %22 = vector.extract_strided_slice %2 {offsets = [0, 0], sizes = [8, 255], strides = [1, 1]} : vector<8x256xf32> to vector<8x255xf32>
    %23 = tpu.concatenate %21, %22 in 1 : vector<8x1xf32>, vector<8x255xf32> -> vector<8x256xf32>
    %24 = vector.extract_strided_slice %0 {offsets = [3, 0], sizes = [1, 256], strides = [1, 1]} : vector<9x256xf32> to vector<1x256xf32>
    %25 = vector.broadcast %24 : vector<1x256xf32> to vector<8x256xf32>
    %26 = arith.mulf %23, %25 : vector<8x256xf32>
    %27 = vector.extract_strided_slice %0 {offsets = [4, 0], sizes = [1, 256], strides = [1, 1]} : vector<9x256xf32> to vector<1x256xf32>
    %28 = vector.broadcast %27 : vector<1x256xf32> to vector<8x256xf32>
    %29 = arith.mulf %2, %28 : vector<8x256xf32>
    %30 = vector.extract_strided_slice %2 {offsets = [0, 1], sizes = [8, 255], strides = [1, 1]} : vector<8x256xf32> to vector<8x255xf32>
    %31 = vector.extract_strided_slice %2 {offsets = [0, 0], sizes = [8, 1], strides = [1, 1]} : vector<8x256xf32> to vector<8x1xf32>
    %32 = tpu.concatenate %30, %31 in 1 : vector<8x255xf32>, vector<8x1xf32> -> vector<8x256xf32>
    %33 = vector.extract_strided_slice %0 {offsets = [5, 0], sizes = [1, 256], strides = [1, 1]} : vector<9x256xf32> to vector<1x256xf32>
    %34 = vector.broadcast %33 : vector<1x256xf32> to vector<8x256xf32>
    %35 = arith.mulf %32, %34 : vector<8x256xf32>
    %36 = vector.extract_strided_slice %2 {offsets = [0, 15], sizes = [8, 241], strides = [1, 1]} : vector<8x256xf32> to vector<8x241xf32>
    %37 = vector.extract_strided_slice %2 {offsets = [0, 0], sizes = [8, 15], strides = [1, 1]} : vector<8x256xf32> to vector<8x15xf32>
    %38 = tpu.concatenate %36, %37 in 1 : vector<8x241xf32>, vector<8x15xf32> -> vector<8x256xf32>
    %39 = vector.extract_strided_slice %0 {offsets = [6, 0], sizes = [1, 256], strides = [1, 1]} : vector<9x256xf32> to vector<1x256xf32>
    %40 = vector.broadcast %39 : vector<1x256xf32> to vector<8x256xf32>
    %41 = arith.mulf %38, %40 : vector<8x256xf32>
    %42 = vector.extract_strided_slice %2 {offsets = [0, 16], sizes = [8, 240], strides = [1, 1]} : vector<8x256xf32> to vector<8x240xf32>
    %43 = vector.extract_strided_slice %2 {offsets = [0, 0], sizes = [8, 16], strides = [1, 1]} : vector<8x256xf32> to vector<8x16xf32>
    %44 = tpu.concatenate %42, %43 in 1 : vector<8x240xf32>, vector<8x16xf32> -> vector<8x256xf32>
    %45 = vector.extract_strided_slice %0 {offsets = [7, 0], sizes = [1, 256], strides = [1, 1]} : vector<9x256xf32> to vector<1x256xf32>
    %46 = vector.broadcast %45 : vector<1x256xf32> to vector<8x256xf32>
    %47 = arith.mulf %44, %46 : vector<8x256xf32>
    %48 = vector.extract_strided_slice %2 {offsets = [0, 17], sizes = [8, 239], strides = [1, 1]} : vector<8x256xf32> to vector<8x239xf32>
    %49 = vector.extract_strided_slice %2 {offsets = [0, 0], sizes = [8, 17], strides = [1, 1]} : vector<8x256xf32> to vector<8x17xf32>
    %50 = tpu.concatenate %48, %49 in 1 : vector<8x239xf32>, vector<8x17xf32> -> vector<8x256xf32>
    %51 = vector.extract_strided_slice %0 {offsets = [8, 0], sizes = [1, 256], strides = [1, 1]} : vector<9x256xf32> to vector<1x256xf32>
    %52 = vector.broadcast %51 : vector<1x256xf32> to vector<8x256xf32>
    %53 = arith.mulf %50, %52 : vector<8x256xf32>
    %54 = tpu.concatenate %8, %14, %20, %26, %29, %35, %41, %47, %53 in 0 : vector<8x256xf32>, vector<8x256xf32>, vector<8x256xf32>, vector<8x256xf32>, vector<8x256xf32>, vector<8x256xf32>, vector<8x256xf32>, vector<8x256xf32>, vector<8x256xf32> -> vector<72x256xf32>
    %55 = arith.truncf %54 : vector<72x256xf32> to vector<72x256xbf16>
    %c0_4 = arith.constant 0 : index
    %c0_5 = arith.constant 0 : index
    %56 = vector.load %arg5[%c0_4, %c0_5] : memref<32x72xf32, #tpu.memory_space<vmem>>, vector<32x72xf32>
    %57 = arith.truncf %56 : vector<32x72xf32> to vector<32x72xbf16>
    %cst = arith.constant dense<0.000000e+00> : vector<32x256xf32>
    %58 = tpu.matmul %57, %55, %cst {dimension_numbers = #tpu.dot_dimension_numbers<[1], [0], [0], [1], [0, 0, 1, 1], [], []>} : vector<32x72xbf16>, vector<72x256xbf16>, vector<32x256xf32> -> vector<32x256xf32>
    %c0_6 = arith.constant 0 : index
    %c0_7 = arith.constant 0 : index
    %59 = vector.load %arg6[%c0_6, %c0_7] : memref<32x1xf32, #tpu.memory_space<vmem>>, vector<32x1xf32>
    %60 = vector.broadcast %59 : vector<32x1xf32> to vector<32x256xf32>
    %61 = arith.addf %58, %60 : vector<32x256xf32>
    %cst_8 = arith.constant 0.000000e+00 : f32
    %62 = vector.broadcast %cst_8 : f32 to vector<32x256xf32>
    %63 = arith.maximumf %61, %62 : vector<32x256xf32>
    %64 = vector.extract_strided_slice %63 {offsets = [0, 239], sizes = [32, 17], strides = [1, 1]} : vector<32x256xf32> to vector<32x17xf32>
    %65 = vector.extract_strided_slice %63 {offsets = [0, 0], sizes = [32, 239], strides = [1, 1]} : vector<32x256xf32> to vector<32x239xf32>
    %66 = tpu.concatenate %64, %65 in 1 : vector<32x17xf32>, vector<32x239xf32> -> vector<32x256xf32>
    %67 = vector.extract_strided_slice %0 {offsets = [0, 0], sizes = [1, 256], strides = [1, 1]} : vector<9x256xf32> to vector<1x256xf32>
    %68 = vector.broadcast %67 : vector<1x256xf32> to vector<32x256xf32>
    %69 = arith.mulf %66, %68 : vector<32x256xf32>
    %70 = vector.extract_strided_slice %63 {offsets = [0, 240], sizes = [32, 16], strides = [1, 1]} : vector<32x256xf32> to vector<32x16xf32>
    %71 = vector.extract_strided_slice %63 {offsets = [0, 0], sizes = [32, 240], strides = [1, 1]} : vector<32x256xf32> to vector<32x240xf32>
    %72 = tpu.concatenate %70, %71 in 1 : vector<32x16xf32>, vector<32x240xf32> -> vector<32x256xf32>
    %73 = vector.extract_strided_slice %0 {offsets = [1, 0], sizes = [1, 256], strides = [1, 1]} : vector<9x256xf32> to vector<1x256xf32>
    %74 = vector.broadcast %73 : vector<1x256xf32> to vector<32x256xf32>
    %75 = arith.mulf %72, %74 : vector<32x256xf32>
    %76 = vector.extract_strided_slice %63 {offsets = [0, 241], sizes = [32, 15], strides = [1, 1]} : vector<32x256xf32> to vector<32x15xf32>
    %77 = vector.extract_strided_slice %63 {offsets = [0, 0], sizes = [32, 241], strides = [1, 1]} : vector<32x256xf32> to vector<32x241xf32>
    %78 = tpu.concatenate %76, %77 in 1 : vector<32x15xf32>, vector<32x241xf32> -> vector<32x256xf32>
    %79 = vector.extract_strided_slice %0 {offsets = [2, 0], sizes = [1, 256], strides = [1, 1]} : vector<9x256xf32> to vector<1x256xf32>
    %80 = vector.broadcast %79 : vector<1x256xf32> to vector<32x256xf32>
    %81 = arith.mulf %78, %80 : vector<32x256xf32>
    %82 = vector.extract_strided_slice %63 {offsets = [0, 255], sizes = [32, 1], strides = [1, 1]} : vector<32x256xf32> to vector<32x1xf32>
    %83 = vector.extract_strided_slice %63 {offsets = [0, 0], sizes = [32, 255], strides = [1, 1]} : vector<32x256xf32> to vector<32x255xf32>
    %84 = tpu.concatenate %82, %83 in 1 : vector<32x1xf32>, vector<32x255xf32> -> vector<32x256xf32>
    %85 = vector.extract_strided_slice %0 {offsets = [3, 0], sizes = [1, 256], strides = [1, 1]} : vector<9x256xf32> to vector<1x256xf32>
    %86 = vector.broadcast %85 : vector<1x256xf32> to vector<32x256xf32>
    %87 = arith.mulf %84, %86 : vector<32x256xf32>
    %88 = vector.extract_strided_slice %0 {offsets = [4, 0], sizes = [1, 256], strides = [1, 1]} : vector<9x256xf32> to vector<1x256xf32>
    %89 = vector.broadcast %88 : vector<1x256xf32> to vector<32x256xf32>
    %90 = arith.mulf %63, %89 : vector<32x256xf32>
    %91 = vector.extract_strided_slice %63 {offsets = [0, 1], sizes = [32, 255], strides = [1, 1]} : vector<32x256xf32> to vector<32x255xf32>
    %92 = vector.extract_strided_slice %63 {offsets = [0, 0], sizes = [32, 1], strides = [1, 1]} : vector<32x256xf32> to vector<32x1xf32>
    %93 = tpu.concatenate %91, %92 in 1 : vector<32x255xf32>, vector<32x1xf32> -> vector<32x256xf32>
    %94 = vector.extract_strided_slice %0 {offsets = [5, 0], sizes = [1, 256], strides = [1, 1]} : vector<9x256xf32> to vector<1x256xf32>
    %95 = vector.broadcast %94 : vector<1x256xf32> to vector<32x256xf32>
    %96 = arith.mulf %93, %95 : vector<32x256xf32>
    %97 = vector.extract_strided_slice %63 {offsets = [0, 15], sizes = [32, 241], strides = [1, 1]} : vector<32x256xf32> to vector<32x241xf32>
    %98 = vector.extract_strided_slice %63 {offsets = [0, 0], sizes = [32, 15], strides = [1, 1]} : vector<32x256xf32> to vector<32x15xf32>
    %99 = tpu.concatenate %97, %98 in 1 : vector<32x241xf32>, vector<32x15xf32> -> vector<32x256xf32>
    %100 = vector.extract_strided_slice %0 {offsets = [6, 0], sizes = [1, 256], strides = [1, 1]} : vector<9x256xf32> to vector<1x256xf32>
    %101 = vector.broadcast %100 : vector<1x256xf32> to vector<32x256xf32>
    %102 = arith.mulf %99, %101 : vector<32x256xf32>
    %103 = vector.extract_strided_slice %63 {offsets = [0, 16], sizes = [32, 240], strides = [1, 1]} : vector<32x256xf32> to vector<32x240xf32>
    %104 = vector.extract_strided_slice %63 {offsets = [0, 0], sizes = [32, 16], strides = [1, 1]} : vector<32x256xf32> to vector<32x16xf32>
    %105 = tpu.concatenate %103, %104 in 1 : vector<32x240xf32>, vector<32x16xf32> -> vector<32x256xf32>
    %106 = vector.extract_strided_slice %0 {offsets = [7, 0], sizes = [1, 256], strides = [1, 1]} : vector<9x256xf32> to vector<1x256xf32>
    %107 = vector.broadcast %106 : vector<1x256xf32> to vector<32x256xf32>
    %108 = arith.mulf %105, %107 : vector<32x256xf32>
    %109 = vector.extract_strided_slice %63 {offsets = [0, 17], sizes = [32, 239], strides = [1, 1]} : vector<32x256xf32> to vector<32x239xf32>
    %110 = vector.extract_strided_slice %63 {offsets = [0, 0], sizes = [32, 17], strides = [1, 1]} : vector<32x256xf32> to vector<32x17xf32>
    %111 = tpu.concatenate %109, %110 in 1 : vector<32x239xf32>, vector<32x17xf32> -> vector<32x256xf32>
    %112 = vector.extract_strided_slice %0 {offsets = [8, 0], sizes = [1, 256], strides = [1, 1]} : vector<9x256xf32> to vector<1x256xf32>
    %113 = vector.broadcast %112 : vector<1x256xf32> to vector<32x256xf32>
    %114 = arith.mulf %111, %113 : vector<32x256xf32>
    %115 = tpu.concatenate %69, %75, %81, %87, %90, %96, %102, %108, %114 in 0 : vector<32x256xf32>, vector<32x256xf32>, vector<32x256xf32>, vector<32x256xf32>, vector<32x256xf32>, vector<32x256xf32>, vector<32x256xf32>, vector<32x256xf32>, vector<32x256xf32> -> vector<288x256xf32>
    %116 = arith.truncf %115 : vector<288x256xf32> to vector<288x256xbf16>
    %c0_9 = arith.constant 0 : index
    %c0_10 = arith.constant 0 : index
    %117 = vector.load %arg7[%c0_9, %c0_10] : memref<32x288xf32, #tpu.memory_space<vmem>>, vector<32x288xf32>
    %118 = arith.truncf %117 : vector<32x288xf32> to vector<32x288xbf16>
    %cst_11 = arith.constant dense<0.000000e+00> : vector<32x256xf32>
    %119 = tpu.matmul %118, %116, %cst_11 {dimension_numbers = #tpu.dot_dimension_numbers<[1], [0], [0], [1], [0, 0, 1, 1], [], []>} : vector<32x288xbf16>, vector<288x256xbf16>, vector<32x256xf32> -> vector<32x256xf32>
    %c0_12 = arith.constant 0 : index
    %c0_13 = arith.constant 0 : index
    %120 = vector.load %arg8[%c0_12, %c0_13] : memref<32x1xf32, #tpu.memory_space<vmem>>, vector<32x1xf32>
    %121 = vector.broadcast %120 : vector<32x1xf32> to vector<32x256xf32>
    %122 = arith.addf %119, %121 : vector<32x256xf32>
    %cst_14 = arith.constant 0.000000e+00 : f32
    %123 = vector.broadcast %cst_14 : f32 to vector<32x256xf32>
    %124 = arith.maximumf %122, %123 : vector<32x256xf32>
    %125 = vector.extract_strided_slice %124 {offsets = [0, 0], sizes = [16, 256], strides = [1, 1]} : vector<32x256xf32> to vector<16x256xf32>
    %126 = vector.extract_strided_slice %124 {offsets = [16, 0], sizes = [16, 256], strides = [1, 1]} : vector<32x256xf32> to vector<16x256xf32>
    %127 = arith.truncf %125 : vector<16x256xf32> to vector<16x256xbf16>
    %c0_15 = arith.constant 0 : index
    %c0_16 = arith.constant 0 : index
    %128 = vector.load %arg9[%c0_15, %c0_16] : memref<16x16xf32, #tpu.memory_space<vmem>>, vector<16x16xf32>
    %129 = arith.truncf %128 : vector<16x16xf32> to vector<16x16xbf16>
    %cst_17 = arith.constant dense<0.000000e+00> : vector<16x256xf32>
    %130 = tpu.matmul %129, %127, %cst_17 {dimension_numbers = #tpu.dot_dimension_numbers<[1], [0], [0], [1], [0, 0, 1, 1], [], []>} : vector<16x16xbf16>, vector<16x256xbf16>, vector<16x256xf32> -> vector<16x256xf32>
    %131 = arith.truncf %130 : vector<16x256xf32> to vector<16x256xbf16>
    %cst_18 = arith.constant dense<0.000000e+00> : vector<256x256xf32>
    %132 = tpu.matmul %131, %127, %cst_18 {dimension_numbers = #tpu.dot_dimension_numbers<[0], [0], [1], [1], [0, 1, 1, 1], [], []>} : vector<16x256xbf16>, vector<16x256xbf16>, vector<256x256xf32> -> vector<256x256xf32>
    %cst_19 = arith.constant dense<0xFF800000> : vector<256xf32>
    %133 = vector.multi_reduction <maximumf>, %132, %cst_19 [1] : vector<256x256xf32> to vector<256xf32>
    %134 = vector.shape_cast %133 : vector<256xf32> to vector<256x1xf32>
    %135 = vector.broadcast %134 : vector<256x1xf32> to vector<256x256xf32>
    %136 = arith.subf %132, %135 : vector<256x256xf32>
    %137 = math.exp %136 : vector<256x256xf32>
    %cst_20 = arith.constant dense<0.000000e+00> : vector<256xf32>
    %138 = vector.multi_reduction <add>, %137, %cst_20 [1] : vector<256x256xf32> to vector<256xf32>
    %139 = vector.shape_cast %138 : vector<256xf32> to vector<256x1xf32>
    %140 = tpu.reciprocal %139 {approx = true} : vector<256x1xf32> -> vector<256x1xf32>
    %141 = vector.broadcast %140 : vector<256x1xf32> to vector<256x256xf32>
    %142 = arith.mulf %137, %141 : vector<256x256xf32>
    %c0_21 = arith.constant 0 : index
    %c0_22 = arith.constant 0 : index
    %143 = vector.load %arg10[%c0_21, %c0_22] : memref<16x16xf32, #tpu.memory_space<vmem>>, vector<16x16xf32>
    %144 = arith.truncf %143 : vector<16x16xf32> to vector<16x16xbf16>
    %cst_23 = arith.constant dense<0.000000e+00> : vector<16x256xf32>
    %145 = tpu.matmul %144, %127, %cst_23 {dimension_numbers = #tpu.dot_dimension_numbers<[1], [0], [0], [1], [0, 0, 1, 1], [], []>} : vector<16x16xbf16>, vector<16x256xbf16>, vector<16x256xf32> -> vector<16x256xf32>
    %c0_24 = arith.constant 0 : index
    %c0_25 = arith.constant 0 : index
    %146 = vector.load %arg11[%c0_24, %c0_25] : memref<16x1xf32, #tpu.memory_space<vmem>>, vector<16x1xf32>
    %147 = vector.broadcast %146 : vector<16x1xf32> to vector<16x256xf32>
    %148 = arith.addf %145, %147 : vector<16x256xf32>
    %149 = arith.truncf %148 : vector<16x256xf32> to vector<16x256xbf16>
    %150 = arith.truncf %142 : vector<256x256xf32> to vector<256x256xbf16>
    %cst_26 = arith.constant dense<0.000000e+00> : vector<16x256xf32>
    %151 = tpu.matmul %149, %150, %cst_26 {dimension_numbers = #tpu.dot_dimension_numbers<[1], [1], [0], [0], [0, 0, 1, 0], [], []>} : vector<16x256xbf16>, vector<256x256xbf16>, vector<16x256xf32> -> vector<16x256xf32>
    %c0_27 = arith.constant 0 : index
    %c0_28 = arith.constant 0 : index
    %152 = memref.load %arg1[%c0_27, %c0_28] : memref<1x1xf32, #tpu.memory_space<smem>>
    %153 = vector.broadcast %152 : f32 to vector<16x256xf32>
    %154 = arith.mulf %153, %151 : vector<16x256xf32>
    %155 = arith.addf %154, %125 : vector<16x256xf32>
    %156 = arith.truncf %126 : vector<16x256xf32> to vector<16x256xbf16>
    %cst_29 = arith.constant dense<0.000000e+00> : vector<16x16xf32>
    %157 = tpu.matmul %156, %156, %cst_29 {dimension_numbers = #tpu.dot_dimension_numbers<[1], [1], [0], [0], [0, 0, 1, 0], [], []>} : vector<16x256xbf16>, vector<16x256xbf16>, vector<16x16xf32> -> vector<16x16xf32>
    %cst_30 = arith.constant dense<0x7F800000> : vector<16xf32>
    %158 = vector.multi_reduction <minimumf>, %157, %cst_30 [1] : vector<16x16xf32> to vector<16xf32>
    %159 = vector.shape_cast %158 : vector<16xf32> to vector<16x1xf32>
    %160 = vector.broadcast %159 : vector<16x1xf32> to vector<16x16xf32>
    %161 = arith.subf %160, %157 : vector<16x16xf32>
    %162 = math.exp %161 : vector<16x16xf32>
    %cst_31 = arith.constant dense<0.000000e+00> : vector<16xf32>
    %163 = vector.multi_reduction <add>, %162, %cst_31 [1] : vector<16x16xf32> to vector<16xf32>
    %164 = vector.shape_cast %163 : vector<16xf32> to vector<16x1xf32>
    %165 = tpu.reciprocal %164 {approx = true} : vector<16x1xf32> -> vector<16x1xf32>
    %166 = vector.broadcast %165 : vector<16x1xf32> to vector<16x16xf32>
    %167 = arith.mulf %162, %166 : vector<16x16xf32>
    %168 = arith.truncf %167 : vector<16x16xf32> to vector<16x16xbf16>
    %cst_32 = arith.constant dense<0.000000e+00> : vector<16x256xf32>
    %169 = tpu.matmul %168, %156, %cst_32 {dimension_numbers = #tpu.dot_dimension_numbers<[1], [0], [0], [1], [0, 0, 1, 1], [], []>} : vector<16x16xbf16>, vector<16x256xbf16>, vector<16x256xf32> -> vector<16x256xf32>
    %c0_33 = arith.constant 0 : index
    %c0_34 = arith.constant 0 : index
    %170 = memref.load %arg2[%c0_33, %c0_34] : memref<1x1xf32, #tpu.memory_space<smem>>
    %171 = vector.broadcast %170 : f32 to vector<16x256xf32>
    %172 = arith.mulf %171, %169 : vector<16x256xf32>
    %173 = arith.addf %172, %126 : vector<16x256xf32>
    %174 = tpu.concatenate %155, %173 in 0 : vector<16x256xf32>, vector<16x256xf32> -> vector<32x256xf32>
    %175 = vector.extract_strided_slice %174 {offsets = [0, 239], sizes = [32, 17], strides = [1, 1]} : vector<32x256xf32> to vector<32x17xf32>
    %176 = vector.extract_strided_slice %174 {offsets = [0, 0], sizes = [32, 239], strides = [1, 1]} : vector<32x256xf32> to vector<32x239xf32>
    %177 = tpu.concatenate %175, %176 in 1 : vector<32x17xf32>, vector<32x239xf32> -> vector<32x256xf32>
    %178 = vector.extract_strided_slice %0 {offsets = [0, 0], sizes = [1, 256], strides = [1, 1]} : vector<9x256xf32> to vector<1x256xf32>
    %179 = vector.broadcast %178 : vector<1x256xf32> to vector<32x256xf32>
    %180 = arith.mulf %177, %179 : vector<32x256xf32>
    %181 = vector.extract_strided_slice %174 {offsets = [0, 240], sizes = [32, 16], strides = [1, 1]} : vector<32x256xf32> to vector<32x16xf32>
    %182 = vector.extract_strided_slice %174 {offsets = [0, 0], sizes = [32, 240], strides = [1, 1]} : vector<32x256xf32> to vector<32x240xf32>
    %183 = tpu.concatenate %181, %182 in 1 : vector<32x16xf32>, vector<32x240xf32> -> vector<32x256xf32>
    %184 = vector.extract_strided_slice %0 {offsets = [1, 0], sizes = [1, 256], strides = [1, 1]} : vector<9x256xf32> to vector<1x256xf32>
    %185 = vector.broadcast %184 : vector<1x256xf32> to vector<32x256xf32>
    %186 = arith.mulf %183, %185 : vector<32x256xf32>
    %187 = vector.extract_strided_slice %174 {offsets = [0, 241], sizes = [32, 15], strides = [1, 1]} : vector<32x256xf32> to vector<32x15xf32>
    %188 = vector.extract_strided_slice %174 {offsets = [0, 0], sizes = [32, 241], strides = [1, 1]} : vector<32x256xf32> to vector<32x241xf32>
    %189 = tpu.concatenate %187, %188 in 1 : vector<32x15xf32>, vector<32x241xf32> -> vector<32x256xf32>
    %190 = vector.extract_strided_slice %0 {offsets = [2, 0], sizes = [1, 256], strides = [1, 1]} : vector<9x256xf32> to vector<1x256xf32>
    %191 = vector.broadcast %190 : vector<1x256xf32> to vector<32x256xf32>
    %192 = arith.mulf %189, %191 : vector<32x256xf32>
    %193 = vector.extract_strided_slice %174 {offsets = [0, 255], sizes = [32, 1], strides = [1, 1]} : vector<32x256xf32> to vector<32x1xf32>
    %194 = vector.extract_strided_slice %174 {offsets = [0, 0], sizes = [32, 255], strides = [1, 1]} : vector<32x256xf32> to vector<32x255xf32>
    %195 = tpu.concatenate %193, %194 in 1 : vector<32x1xf32>, vector<32x255xf32> -> vector<32x256xf32>
    %196 = vector.extract_strided_slice %0 {offsets = [3, 0], sizes = [1, 256], strides = [1, 1]} : vector<9x256xf32> to vector<1x256xf32>
    %197 = vector.broadcast %196 : vector<1x256xf32> to vector<32x256xf32>
    %198 = arith.mulf %195, %197 : vector<32x256xf32>
    %199 = vector.extract_strided_slice %0 {offsets = [4, 0], sizes = [1, 256], strides = [1, 1]} : vector<9x256xf32> to vector<1x256xf32>
    %200 = vector.broadcast %199 : vector<1x256xf32> to vector<32x256xf32>
    %201 = arith.mulf %174, %200 : vector<32x256xf32>
    %202 = vector.extract_strided_slice %174 {offsets = [0, 1], sizes = [32, 255], strides = [1, 1]} : vector<32x256xf32> to vector<32x255xf32>
    %203 = vector.extract_strided_slice %174 {offsets = [0, 0], sizes = [32, 1], strides = [1, 1]} : vector<32x256xf32> to vector<32x1xf32>
    %204 = tpu.concatenate %202, %203 in 1 : vector<32x255xf32>, vector<32x1xf32> -> vector<32x256xf32>
    %205 = vector.extract_strided_slice %0 {offsets = [5, 0], sizes = [1, 256], strides = [1, 1]} : vector<9x256xf32> to vector<1x256xf32>
    %206 = vector.broadcast %205 : vector<1x256xf32> to vector<32x256xf32>
    %207 = arith.mulf %204, %206 : vector<32x256xf32>
    %208 = vector.extract_strided_slice %174 {offsets = [0, 15], sizes = [32, 241], strides = [1, 1]} : vector<32x256xf32> to vector<32x241xf32>
    %209 = vector.extract_strided_slice %174 {offsets = [0, 0], sizes = [32, 15], strides = [1, 1]} : vector<32x256xf32> to vector<32x15xf32>
    %210 = tpu.concatenate %208, %209 in 1 : vector<32x241xf32>, vector<32x15xf32> -> vector<32x256xf32>
    %211 = vector.extract_strided_slice %0 {offsets = [6, 0], sizes = [1, 256], strides = [1, 1]} : vector<9x256xf32> to vector<1x256xf32>
    %212 = vector.broadcast %211 : vector<1x256xf32> to vector<32x256xf32>
    %213 = arith.mulf %210, %212 : vector<32x256xf32>
    %214 = vector.extract_strided_slice %174 {offsets = [0, 16], sizes = [32, 240], strides = [1, 1]} : vector<32x256xf32> to vector<32x240xf32>
    %215 = vector.extract_strided_slice %174 {offsets = [0, 0], sizes = [32, 16], strides = [1, 1]} : vector<32x256xf32> to vector<32x16xf32>
    %216 = tpu.concatenate %214, %215 in 1 : vector<32x240xf32>, vector<32x16xf32> -> vector<32x256xf32>
    %217 = vector.extract_strided_slice %0 {offsets = [7, 0], sizes = [1, 256], strides = [1, 1]} : vector<9x256xf32> to vector<1x256xf32>
    %218 = vector.broadcast %217 : vector<1x256xf32> to vector<32x256xf32>
    %219 = arith.mulf %216, %218 : vector<32x256xf32>
    %220 = vector.extract_strided_slice %174 {offsets = [0, 17], sizes = [32, 239], strides = [1, 1]} : vector<32x256xf32> to vector<32x239xf32>
    %221 = vector.extract_strided_slice %174 {offsets = [0, 0], sizes = [32, 17], strides = [1, 1]} : vector<32x256xf32> to vector<32x17xf32>
    %222 = tpu.concatenate %220, %221 in 1 : vector<32x239xf32>, vector<32x17xf32> -> vector<32x256xf32>
    %223 = vector.extract_strided_slice %0 {offsets = [8, 0], sizes = [1, 256], strides = [1, 1]} : vector<9x256xf32> to vector<1x256xf32>
    %224 = vector.broadcast %223 : vector<1x256xf32> to vector<32x256xf32>
    %225 = arith.mulf %222, %224 : vector<32x256xf32>
    %226 = tpu.concatenate %180, %186, %192, %198, %201, %207, %213, %219, %225 in 0 : vector<32x256xf32>, vector<32x256xf32>, vector<32x256xf32>, vector<32x256xf32>, vector<32x256xf32>, vector<32x256xf32>, vector<32x256xf32>, vector<32x256xf32>, vector<32x256xf32> -> vector<288x256xf32>
    %227 = arith.truncf %226 : vector<288x256xf32> to vector<288x256xbf16>
    %c0_35 = arith.constant 0 : index
    %c0_36 = arith.constant 0 : index
    %228 = vector.load %arg12[%c0_35, %c0_36] : memref<32x288xf32, #tpu.memory_space<vmem>>, vector<32x288xf32>
    %229 = arith.truncf %228 : vector<32x288xf32> to vector<32x288xbf16>
    %cst_37 = arith.constant dense<0.000000e+00> : vector<32x256xf32>
    %230 = tpu.matmul %229, %227, %cst_37 {dimension_numbers = #tpu.dot_dimension_numbers<[1], [0], [0], [1], [0, 0, 1, 1], [], []>} : vector<32x288xbf16>, vector<288x256xbf16>, vector<32x256xf32> -> vector<32x256xf32>
    %c0_38 = arith.constant 0 : index
    %c0_39 = arith.constant 0 : index
    %231 = vector.load %arg13[%c0_38, %c0_39] : memref<32x1xf32, #tpu.memory_space<vmem>>, vector<32x1xf32>
    %232 = vector.broadcast %231 : vector<32x1xf32> to vector<32x256xf32>
    %233 = arith.addf %230, %232 : vector<32x256xf32>
    %cst_40 = arith.constant 0.000000e+00 : f32
    %234 = vector.broadcast %cst_40 : f32 to vector<32x256xf32>
    %235 = arith.maximumf %233, %234 : vector<32x256xf32>
    %236 = vector.extract_strided_slice %235 {offsets = [0, 0], sizes = [16, 256], strides = [1, 1]} : vector<32x256xf32> to vector<16x256xf32>
    %237 = vector.extract_strided_slice %235 {offsets = [16, 0], sizes = [16, 256], strides = [1, 1]} : vector<32x256xf32> to vector<16x256xf32>
    %238 = arith.addf %236, %237 : vector<16x256xf32>
    %c0_41 = arith.constant 0 : index
    %c0_42 = arith.constant 0 : index
    %239 = vector.load %arg14[%c0_41, %c0_42] : memref<8x16xf32, #tpu.memory_space<vmem>>, vector<8x16xf32>
    %240 = arith.truncf %239 : vector<8x16xf32> to vector<8x16xbf16>
    %241 = arith.truncf %238 : vector<16x256xf32> to vector<16x256xbf16>
    %cst_43 = arith.constant dense<0.000000e+00> : vector<8x256xf32>
    %242 = tpu.matmul %240, %241, %cst_43 {dimension_numbers = #tpu.dot_dimension_numbers<[1], [0], [0], [1], [0, 0, 1, 1], [], []>} : vector<8x16xbf16>, vector<16x256xbf16>, vector<8x256xf32> -> vector<8x256xf32>
    %c0_44 = arith.constant 0 : index
    %c0_45 = arith.constant 0 : index
    %243 = vector.load %arg15[%c0_44, %c0_45] : memref<8x1xf32, #tpu.memory_space<vmem>>, vector<8x1xf32>
    %244 = vector.broadcast %243 : vector<8x1xf32> to vector<8x256xf32>
    %245 = arith.addf %242, %244 : vector<8x256xf32>
    %c0_46 = arith.constant 0 : index
    %c0_47 = arith.constant 0 : index
    %c0_48 = arith.constant 0 : index
    %246 = vector.load %arg16[%c0_46, %c0_47, %c0_48] : memref<1x8x256xf32, #tpu.memory_space<vmem>>, vector<1x8x256xf32>
    %247 = vector.shape_cast %246 : vector<1x8x256xf32> to vector<8x256xf32>
    %248 = vector.shape_cast %245 : vector<8x256xf32> to vector<1x8x256xf32>
    tpu.vector_store %arg16[%c0_46, %c0_47, %c0_48], %248 {strides = array<i32>} : memref<1x8x256xf32, #tpu.memory_space<vmem>>, vector<1x8x256xf32>,
    return
  }
  func.func @transform_0(%arg0: i32) -> (i32, i32) {
    %c0_i32 = arith.constant 0 : i32
    %c0_i32_0 = arith.constant 0 : i32
    %c0_i32_1 = arith.constant 0 : i32
    return %c0_i32, %c0_i32_0 : i32, i32
  }
  func.func @transform_1(%arg0: i32) -> (i32, i32) {
    %c0_i32 = arith.constant 0 : i32
    %c0_i32_0 = arith.constant 0 : i32
    %c0_i32_1 = arith.constant 0 : i32
    return %c0_i32, %c0_i32_0 : i32, i32
  }
  func.func @transform_2(%arg0: i32) -> (i32, i32, i32) {
    %c0_i32 = arith.constant 0 : i32
    %c0_i32_0 = arith.constant 0 : i32
    %c0_i32_1 = arith.constant 0 : i32
    return %arg0, %c0_i32, %c0_i32_0 : i32, i32, i32
  }
  func.func @transform_3(%arg0: i32) -> (i32, i32) {
    %c0_i32 = arith.constant 0 : i32
    %c0_i32_0 = arith.constant 0 : i32
    %c0_i32_1 = arith.constant 0 : i32
    return %c0_i32, %c0_i32_0 : i32, i32
  }
  func.func @transform_4(%arg0: i32) -> (i32, i32) {
    %c0_i32 = arith.constant 0 : i32
    %c0_i32_0 = arith.constant 0 : i32
    %c0_i32_1 = arith.constant 0 : i32
    return %c0_i32, %c0_i32_0 : i32, i32
  }
  func.func @transform_5(%arg0: i32) -> (i32, i32) {
    %c0_i32 = arith.constant 0 : i32
    %c0_i32_0 = arith.constant 0 : i32
    %c0_i32_1 = arith.constant 0 : i32
    return %c0_i32, %c0_i32_0 : i32, i32
  }
  func.func @transform_6(%arg0: i32) -> (i32, i32) {
    %c0_i32 = arith.constant 0 : i32
    %c0_i32_0 = arith.constant 0 : i32
    %c0_i32_1 = arith.constant 0 : i32
    return %c0_i32, %c0_i32_0 : i32, i32
  }
  func.func @transform_7(%arg0: i32) -> (i32, i32) {
    %c0_i32 = arith.constant 0 : i32
    %c0_i32_0 = arith.constant 0 : i32
    %c0_i32_1 = arith.constant 0 : i32
    return %c0_i32, %c0_i32_0 : i32, i32
  }
  func.func @transform_8(%arg0: i32) -> (i32, i32) {
    %c0_i32 = arith.constant 0 : i32
    %c0_i32_0 = arith.constant 0 : i32
    %c0_i32_1 = arith.constant 0 : i32
    return %c0_i32, %c0_i32_0 : i32, i32
  }
  func.func @transform_9(%arg0: i32) -> (i32, i32) {
    %c0_i32 = arith.constant 0 : i32
    %c0_i32_0 = arith.constant 0 : i32
    %c0_i32_1 = arith.constant 0 : i32
    return %c0_i32, %c0_i32_0 : i32, i32
  }
  func.func @transform_10(%arg0: i32) -> (i32, i32) {
    %c0_i32 = arith.constant 0 : i32
    %c0_i32_0 = arith.constant 0 : i32
    %c0_i32_1 = arith.constant 0 : i32
    return %c0_i32, %c0_i32_0 : i32, i32
  }
  func.func @transform_11(%arg0: i32) -> (i32, i32) {
    %c0_i32 = arith.constant 0 : i32
    %c0_i32_0 = arith.constant 0 : i32
    %c0_i32_1 = arith.constant 0 : i32
    return %c0_i32, %c0_i32_0 : i32, i32
  }
  func.func @transform_12(%arg0: i32) -> (i32, i32) {
    %c0_i32 = arith.constant 0 : i32
    %c0_i32_0 = arith.constant 0 : i32
    %c0_i32_1 = arith.constant 0 : i32
    return %c0_i32, %c0_i32_0 : i32, i32
  }
  func.func @transform_13(%arg0: i32) -> (i32, i32) {
    %c0_i32 = arith.constant 0 : i32
    %c0_i32_0 = arith.constant 0 : i32
    %c0_i32_1 = arith.constant 0 : i32
    return %c0_i32, %c0_i32_0 : i32, i32
  }
  func.func @transform_14(%arg0: i32) -> (i32, i32) {
    %c0_i32 = arith.constant 0 : i32
    %c0_i32_0 = arith.constant 0 : i32
    %c0_i32_1 = arith.constant 0 : i32
    return %c0_i32, %c0_i32_0 : i32, i32
  }
  func.func @transform_15(%arg0: i32) -> (i32, i32, i32) {
    %c0_i32 = arith.constant 0 : i32
    %c0_i32_0 = arith.constant 0 : i32
    %c0_i32_1 = arith.constant 0 : i32
    return %arg0, %c0_i32, %c0_i32_0 : i32, i32, i32
  }
}

</mosaic_0001>

<bundles_post_ra>
// kernel: danet_forward.1
= control target key start
LH: loop header
LB: loop body
LE: loop exit
PB: predicated region body
PF: predicated region fallthrough
CT: control target
= control target key end

     0   :  { %s3517_s22 = smov 0   ;;  %s5293_s0 = inlined_call_operand.<no memory space> [shape: f32[1,1], index: 0, kind: input, shape index: {}]   ;;  %s5294_s1 = inlined_call_operand.<no memory space> [shape: f32[1,1], index: 1, kind: input, shape index: {}]   ;;  %s5295_s2 = inlined_call_operand.vmem [shape: f32[2,8,256], index: 2, kind: input, shape index: {}]   ;;  %s5296_s3 = inlined_call_operand.vmem [shape: f32[9,256], index: 3, kind: input, shape index: {}]   ;;  %s5297_s4 = inlined_call_operand.vmem [shape: f32[32,72], index: 4, kind: input, shape index: {}]   ;;  %s5298_s5 = inlined_call_operand.vmem [shape: f32[32,1], index: 5, kind: input, shape index: {}]   ;;  %s5299_s6 = inlined_call_operand.vmem [shape: f32[32,288], index: 6, kind: input, shape index: {}]   ;;  %s5300_s7 = inlined_call_operand.vmem [shape: f32[32,1], index: 7, kind: input, shape index: {}]   ;;  %s5301_s8 = inlined_call_operand.vmem [shape: f32[16,16], index: 8, kind: input, shape index: {}]   ;;  %s5302_s9 = inlined_call_operand.vmem [shape: f32[16,16], index: 9, kind: input, shape index: {}]   ;;  %s5303_s10 = inlined_call_operand.vmem [shape: f32[16,1], index: 10, kind: input, shape index: {}]   ;;  %s5304_s11 = inlined_call_operand.vmem [shape: f32[32,288], index: 11, kind: input, shape index: {}]   ;;  %s5305_s12 = inlined_call_operand.vmem [shape: f32[32,1], index: 12, kind: input, shape index: {}]   ;;  %s5306_s13 = inlined_call_operand.vmem [shape: f32[8,16], index: 13, kind: input, shape index: {}]   ;;  %s5307_s14 = inlined_call_operand.vmem [shape: f32[8,1], index: 14, kind: input, shape index: {}]   ;;  %s5308_s15 = inlined_call_operand.vmem [shape: f32[2,8,256], index: 15, kind: output, shape index: {}]  }
   0x1   :  { %20 = sst [smem:[#allocation2]] %s5293_s0 }
   0x2   :  { %21 = sst [smem:[#allocation3]] %s5294_s1 }
   0x3 LB: > { %s3115_s23 = sadd.s32 4294967295, %s3420_s22   ;;  %p3119_p0 = scmp.ge.s32.totalorder %s3420_s22, 1  ;;  %s3420_s22 = sphi %s3517_s22, %s27_s22  }
   0x4   : > { %p439_p1 = scmp.lt.s32.totalorder %s3420_s22, 3 }
   0x6   : > { %p440_p2 = pnand %p3119_p0, %p439_p1 }
   0x8   : > { %443 = sbr.rel (%p440_p2) target bundleno = 2837 (0xb15), region = 80 }
   0xf   : > { %p487_p3 = scmp.lt.s32.totalorder %s3115_s23, 1  ;;  %s3422_s26 = smov 16   ;;  %v5312_v2 = vmov 0   ;;  %v692_v3 = vld [vmem:[%s5298_s5] sm:$0xff]  ;;  %v693_v4 = vld [vmem:[%s5298_s5 + $0x8] sm:$0xff]  ;;  %v695_v5 = vld [vmem:[%s5298_s5 + $0x18] sm:$0xff]  ;;  %v516_v7 = vlaneseq }
  0x10   : > { %s3423_s27 = smov 17   ;;  %s3424_s28 = smov 15   ;;  %762 = vmatprep.mubr.bf16.mxu0 %v5312_v2  ;;  %3210 = vset.pattern.permute.xlu0 %v5312_v2  ;;  %v694_v6 = vld [vmem:[%s5298_s5 + $0x10] sm:$0xff]  ;;  %v3591_v11 = vld [vmem:[%s5296_s3] sm:$0xff]  ;;  %v3596_v12 = vld [vmem:[%s5296_s3 + $0x8] sm:$0xff]  ;;  %vm531_vm0 = vcmask 130048  }
  0x11   : > { %s5548_s23 = smov (!%p487_p3, %s3115_s23), 1  ;;  %s3425_s29 = smov 1   ;;  %3211 = vset.pattern.permute.xlu1 %v5312_v2  ;;  %v3584_v8 = vshrl.u32 %v516_v7, 7  ;;  %vm511_vm1 = vcmask 138240   ;;  %vm551_vm2 = vcmask 121856   ;;  %vm571_vm3 = vcmask 7168  }
  0x12   : > { %s5309_s0 = sshll.u32 %s5548_s23, 4  ;;  %s3426_s30 = smov 127   ;;  %vm600_vm4 = vcmask 1039360   ;;  %vm620_vm5 = vcmask 924672   ;;  %vm640_vm6 = vcmask 916480   ;;  %vm660_vm7 = vcmask 908288  }
  0x13   : > { %s491_s25 = scalar_lea.vmem %s5295_s2, %s5309_s0  ;;  %s3427_s16 = smov 113   ;;  %v518_v9 = vsub.s32 0, %v3584_v8  ;;  %v538_v10 = vsub.s32 1, %v3584_v8  ;;  %v558_v21 = vsub.s32 2, %v3584_v8  ;;  %v578_v22 = vsub.s32 3, %v3584_v8 }
  0x14   : > { %v3533_v0 = vld [vmem:[%s491_s25 + $0x8] sm:$0xff]  ;;  %v3539_v1 = vld [vmem:[%s491_s25] sm:$0xff]  ;;  %s5310_s17 = smov 112   ;;  %s5322_s18 = smov 111   ;;  %v588_v35 = vsub.s32 4, %v3584_v8  ;;  %v608_v36 = vsub.s32 5, %v3584_v8 }
  0x15   : > { %526 = vrot.lane.b32.xlu1 %v3533_v0, %s3422_s26  ;;  %505 = vrot.lane.b32.xlu0 %v3533_v0, %s3423_s27  ;;  %v3599_v15 = vrot.slane %v3596_v12, %v518_v9  ;;  %v3602_v16 = vrot.slane %v3596_v12, %v538_v10  ;;  %v3605_v17 = vrot.slane %v3591_v11, %v518_v9  ;;  %v628_v63 = vsub.s32 6, %v3584_v8  ;;  %s5420_s19 = smov 112   ;;  %s2302_s25 = sld [smem:[#allocation2]] }
  0x16   : > { %v3608_v18 = vrot.slane %v3591_v11, %v538_v10  ;;  %v3623_v37 = vrot.slane %v3591_v11, %v558_v21  ;;  %v3626_v38 = vrot.slane %v3596_v12, %v558_v21  ;;  %v3629_v39 = vrot.slane %v3591_v11, %v578_v22 }
  0x17   : > { %5402 = vst [vmem:[#allocation4_spill] sm:$0xff] %v3599_v15  ;;  %5403 = vst [vmem:[#allocation5_spill] sm:$0xff] %v3602_v16  ;;  %v3632_v40 = vrot.slane %v3596_v12, %v578_v22  ;;  %v3637_v45 = vrot.slane %v3596_v12, %v588_v35  ;;  %v3640_v46 = vrot.slane %v3591_v11, %v588_v35  ;;  %vm723_vm8 = vcmask 1043456  }
  0x18   : > { %5404 = vst [vmem:[#allocation6_spill] sm:$0xff] %v3605_v17  ;;  %5405 = vst [vmem:[#allocation7_spill] sm:$0xff] %v3608_v18  ;;  %v3645_v49 = vrot.slane %v3591_v11, %v608_v36  ;;  %v3648_v50 = vrot.slane %v3596_v12, %v608_v36  ;;  %v3668_v10 = vrot.slane %v3596_v12, %v628_v63  ;;  %v686_v36 = vld [vmem:[%s5297_s4] sm:$0xff]  ;;  %vm716_vm9 = vcmask 588800  }
  0x19   : > { %529 = vrot.lane.b32.xlu1 %v3539_v1, %s3422_s26  ;;  %509 = vrot.lane.b32.xlu0 %v3539_v1, %s3423_s27  ;;  %5406 = vst [vmem:[#allocation8_spill] sm:$0xff] %v3623_v37  ;;  %5407 = vst [vmem:[#allocation9_spill] sm:$0xff] %v3626_v38  ;;  %v595_v59 = vmul.f32 %v3637_v45, %v3533_v0  ;;  %v594_v60 = vmul.f32 %v3640_v46, %v3539_v1  ;;  %vm1237_vm10 = vcmask 261120  }
  0x1a   : > { %5408 = vst [vmem:[#allocation10_spill] sm:$0xff] %v3629_v39  ;;  %5409 = vst [vmem:[#allocation11_spill] sm:$0xff] %v3632_v40 }
  0x1b   : > { %5410 = vst [vmem:[#allocation12_spill] sm:$0xff] %v3637_v45  ;;  %5411 = vst [vmem:[#allocation13_spill] sm:$0xff] %v3640_v46 }
  0x1c   : > { %5412 = vst [vmem:[#allocation14_spill] sm:$0xff] %v3645_v49  ;;  %5413 = vst [vmem:[#allocation15_spill] sm:$0xff] %v3648_v50 }
  0x1d   : > { %549 = vrot.lane.b32.xlu1 %v3539_v1, %s3424_s28  ;;  %546 = vrot.lane.b32.xlu0 %v3533_v0, %s3424_s28  ;;  %5415 = vst [vmem:[#allocation17_spill] sm:$0xff] %v3668_v10 }
  0x21   : > { %569 = vrot.lane.b32.xlu1 %v3539_v1, %s3425_s29  ;;  %566 = vrot.lane.b32.xlu0 %v3533_v0, %s3425_s29 }
  0x25   : > { %598 = vrot.lane.b32.xlu1 %v3533_v0, %s3426_s30  ;;  %596 = vrot.lane.b32.xlu0 %v3539_v1, %s3426_s30 }
  0x29   : > { %618 = vrot.lane.b32.xlu1 %v3533_v0, %s3427_s16  ;;  %616 = vrot.lane.b32.xlu0 %v3539_v1, %s3427_s16 }
  0x2d   : > { %638 = vrot.lane.b32.xlu1 %v3533_v0, %s5310_s17  ;;  %636 = vrot.lane.b32.xlu0 %v3539_v1, %s5310_s17  ;;  %s5546_s17 = sshll.u32 %s5548_s23, 4 }
  0x31   : > { %658 = vrot.lane.b32.xlu1 %v3533_v0, %s5322_s18  ;;  %656 = vrot.lane.b32.xlu0 %v3539_v1, %s5322_s18  ;;  %v3665_v1 = vrot.slane %v3591_v11, %v628_v63 }
  0x33   : > { %5414 = vst [vmem:[#allocation16_spill] sm:$0xff] %v3665_v1 }
  0x35   : > { %698 = vperm.xlu0 %3210, %v692_v3   ;;  %703 = vperm.xlu1 %3211, %v693_v4  }
  0x39   : > { %713 = vperm.xlu0 %3210, %v695_v5   ;;  %708 = vperm.xlu1 %3211, %v694_v6   ;;  %v648_v5 = vsub.s32 7, %v3584_v8 }
  0x87   : > { %v527_v13 = vpop.permute.xlu1 %526  ;;  %v506_v14 = vpop.permute.xlu0 %505 }
  0x8b   : > { %v530_v19 = vpop.permute.xlu1 %529  ;;  %v510_v20 = vpop.permute.xlu0 %509 }
  0x8c   : > { %v535_v23 = vsel %vm531_vm0, %v527_v13, %v530_v19  ;;  %v515_v24 = vsel %vm511_vm1, %v506_v14, %v510_v20  ;;  %v512_v25 = vsel %vm511_vm1, %v510_v20, %v506_v14  ;;  %v532_v26 = vsel %vm531_vm0, %v530_v19, %v527_v13 }
  0x8d   : > { %v525_v27 = vmul.f32 %v3599_v15, %v512_v25  ;;  %v545_v28 = vmul.f32 %v3602_v16, %v532_v26  ;;  %v524_v29 = vmul.f32 %v3605_v17, %v515_v24  ;;  %v544_v30 = vmul.f32 %v3608_v18, %v535_v23  ;;  %v3687_v26 = vld [vmem:[%s5296_s3 + $0x18] ss:$0 sm:$0xff] }
  0x8e   : > { %v3671_v13 = vrot.slane %v3591_v11, %v648_v5  ;;  %v3674_v14 = vrot.slane %v3596_v12, %v648_v5  ;;  %5418 = vst [vmem:[#allocation20_spill] sm:$0xff] %v3687_v26 }
  0x8f   : > { %v550_v31 = vpop.permute.xlu1 %549  ;;  %v547_v32 = vpop.permute.xlu0 %546  ;;  %v677_v33 = vpack.c.bf16 %v545_v28, %v525_v27  ;;  %v676_v34 = vpack.c.bf16 %v544_v30, %v524_v29  ;;  %v3692_v27 = vld [vmem:[%s5296_s3 + $0x10] ss:$0 sm:$0xff] }
  0x90   : > { %v552_v41 = vsel %vm551_vm2, %v550_v31, %v547_v32  ;;  %v555_v42 = vsel %vm551_vm2, %v547_v32, %v550_v31  ;;  %5416 = vst [vmem:[#allocation18_spill] sm:$0xff] %v3671_v13  ;;  %5417 = vst [vmem:[#allocation19_spill] sm:$0xff] %v3674_v14 }
  0x91   : > { %730 = vmatprep.subr.bf16.mxu0 %v677_v33  ;;  %v564_v51 = vmul.f32 %v3623_v37, %v555_v42  ;;  %v565_v52 = vmul.f32 %v3626_v38, %v552_v41  ;;  %5419 = vst [vmem:[#allocation21_spill] sm:$0xff] %v3692_v27  ;;  %v687_v41 = vld [vmem:[%s5297_s4 + $0x8] sm:$0xff] }
  0x92   : > { %731 = vmatpush1.bf16.msra.mxu0 %v676_v34 }
  0x93   : > { %v570_v43 = vpop.permute.xlu1 %569  ;;  %v567_v44 = vpop.permute.xlu0 %566 }
  0x94   : > { %v572_v47 = vsel %vm571_vm3, %v570_v43, %v567_v44  ;;  %v575_v48 = vsel %vm571_vm3, %v567_v44, %v570_v43 }
  0x95   : > { %v584_v53 = vmul.f32 %v3629_v39, %v575_v48  ;;  %v585_v54 = vmul.f32 %v3632_v40, %v572_v47  ;;  %v690_v47 = vpack.c.bf16 %v687_v41, %v686_v36  ;;  %v688_v48 = vld [vmem:[%s5297_s4 + $0x10] sm:$0xff]  ;;  %v1213_v41 = vld [vmem:[%s5300_s7] sm:$0xff] }
  0x97   : > { %v599_v55 = vpop.permute.xlu1 %598  ;;  %v597_v56 = vpop.permute.xlu0 %596  ;;  %v679_v57 = vpack.c.bf16 %v585_v54, %v565_v52  ;;  %v678_v58 = vpack.c.bf16 %v584_v53, %v564_v51  ;;  %v689_v51 = vld [vmem:[%s5297_s4 + $0x18] sm:$0xff] }
  0x98   : > { %v601_v61 = vsel %vm600_vm4, %v597_v56, %v599_v55  ;;  %v605_v62 = vsel %vm600_vm4, %v599_v55, %v597_v56  ;;  %v691_v52 = vpack.c.bf16 %v689_v51, %v688_v48 }
  0x99   : > { %v614_v3 = vmul.f32 %v3645_v49, %v601_v61  ;;  %v615_v4 = vmul.f32 %v3648_v50, %v605_v62  ;;  %732 = vmatprep.subr.bf16.mxu0 %v679_v57 }
  0x9a   : > { %733 = vmatpush1.bf16.msra.mxu0 %v678_v58 }
  0x9b   : > { %v619_v6 = vpop.permute.xlu1 %618  ;;  %v617_v0 = vpop.permute.xlu0 %616  ;;  %v681_v7 = vpack.c.bf16 %v615_v4, %v595_v59  ;;  %v680_v9 = vpack.c.bf16 %v614_v3, %v594_v60 }
  0x9c   : > { %v621_v8 = vsel %vm620_vm5, %v617_v0, %v619_v6  ;;  %v625_v19 = vsel %vm620_vm5, %v619_v6, %v617_v0 }
  0x9d   : > { %734 = vmatprep.subr.bf16.mxu0 %v681_v7  ;;  %v634_v24 = vmul.f32 %v3665_v1, %v621_v8  ;;  %v635_v11 = vmul.f32 %v3668_v10, %v625_v19 }
  0x9e   : > { %735 = vmatpush1.bf16.msra.mxu0 %v680_v9 }
  0x9f   : > { %v639_v20 = vpop.permute.xlu1 %638  ;;  %v637_v21 = vpop.permute.xlu0 %636 }
  0xa0   : > { %v641_v22 = vsel %vm640_vm6, %v637_v21, %v639_v20  ;;  %v645_v23 = vsel %vm640_vm6, %v639_v20, %v637_v21 }
  0xa1   : > { %v654_v25 = vmul.f32 %v3671_v13, %v641_v22  ;;  %v655_v12 = vmul.f32 %v3674_v14, %v645_v23 }
  0xa3   : > { %v659_v28 = vpop.permute.xlu1 %658  ;;  %v657_v29 = vpop.permute.xlu0 %656  ;;  %v683_v30 = vpack.c.bf16 %v655_v12, %v635_v11  ;;  %v682_v31 = vpack.c.bf16 %v654_v25, %v634_v24 }
  0xa4   : > { %v661_v32 = vsel %vm660_vm7, %v657_v29, %v659_v28  ;;  %v665_v33 = vsel %vm660_vm7, %v659_v28, %v657_v29  ;;  %v1196_v28 = vld [vmem:[%s5299_s6 + $0x8] sm:$0xff]  ;;  %v1199_v29 = vld [vmem:[%s5299_s6 + $0x20] sm:$0xff] }
  0xa5   : > { %v675_v34 = vmul.f32 %v3687_v26, %v665_v33  ;;  %736 = vmatprep.subr.bf16.mxu0 %v683_v30  ;;  %v674_v35 = vmul.f32 %v3692_v27, %v661_v32 }
  0xa6   : > { %737 = vmatpush1.bf16.msra.mxu0 %v682_v31  ;;  %v1208_v31 = vpack.c.bf16 %v1199_v29, %v1196_v28 }
  0xa7   : > { %v685_v42 = vpack.c.bf16 %v675_v34, %v675_v34  ;;  %v684_v43 = vpack.c.bf16 %v674_v35, %v674_v35 }
  0xa8   : > { %1276 = vmatprep.mubr.bf16.mxu1 %v1208_v31 }
  0xa9   : > { %3126 = vmatprep.subr.msk.bf16.mxu0 %vm723_vm8, %v685_v42  ;;  %v725_v44 = vsel %vm723_vm8, %v684_v43, 0  ;;  %v1214_v43 = vld [vmem:[%s5300_s7 + $0x8] sm:$0xff] }
  0xaa   : > { %739 = vmatpush1.bf16.msra.mxu0 %v725_v44 }
  0xad   : > { %3127 = vmatmul.mubr.msk.bf16.vlgmr.msra.gmra.mrb[0].mxu0 %vm716_vm9, %v690_v47 }
  0xae   : > { %772 = vmatprep.mubr.bf16.mxu0 %v5312_v2 }
  0xb4   : > { %v699_v53 = vpop.permute.xlu0 %698  ;;  %v704_v62 = vpop.permute.xlu1 %703 }
  0xb5   : > { %3128 = vmatmul.mubr.msk.bf16.gmra.mrb[4].mxu0 %vm716_vm9, %v691_v52 }
  0xb6   : > { %1329 = vmatprep.mubr.bf16.mxu0 %v5312_v2 }
  0xb8   : > { %v709_v8 = vpop.permute.xlu1 %708  ;;  %v714_v21 = vpop.permute.xlu0 %713 }
 0x180   : > { %v764_v54 = vpop.f32.mrb[0].mxu0 }
 0x181   : > { %v765_v55 = vadd.f32 %v764_v54, %v699_v53  ;;  %v766_v56 = vpop.f32.mrb[1].mxu0 }
 0x182   : > { %v767_v57 = vadd.f32 %v766_v56, %v699_v53  ;;  %v768_v58 = vpop.f32.mrb[2].mxu0 }
 0x183   : > { %v3712_v59 = vmax.f32 %v765_v55, 0.0  ;;  %v770_v60 = vpop.f32.mrb[3].mxu0  ;;  %v769_v63 = vadd.f32 %v768_v58, %v704_v62 }
 0x184   : > { %v3714_v61 = vmax.f32 %v767_v57, 0.0  ;;  %v771_v7 = vadd.f32 %v770_v60, %v704_v62 }
 0x185   : > { %811 = vrot.lane.b32.xlu1 %v3712_v59, %s3423_s27  ;;  %v3724_v0 = vmax.f32 %v769_v63, 0.0 }
 0x186   : > { %985 = vrot.lane.b32.xlu0 %v3714_v61, %s3426_s30  ;;  %v3742_v9 = vmax.f32 %v771_v7, 0.0 }
 0x188   : > { %v774_v3 = vpop.f32.mrb[4].mxu0 }
 0x189   : > { %v776_v4 = vpop.f32.mrb[5].mxu0  ;;  %855 = vrot.lane.b32.xlu1 %v3712_v59, %s3422_s26  ;;  %v775_v19 = vadd.f32 %v774_v3, %v709_v8 }
 0x18a   : > { %v778_v5 = vpop.f32.mrb[6].mxu0  ;;  %1029 = vrot.lane.b32.xlu0 %v3714_v61, %s3427_s16  ;;  %v777_v20 = vadd.f32 %v776_v4, %v709_v8 }
 0x18b   : > { %v780_v6 = vpop.f32.mrb[7].mxu0  ;;  %v3764_v22 = vmax.f32 %v775_v19, 0.0  ;;  %v779_v24 = vadd.f32 %v778_v5, %v714_v21 }
 0x18c   : > { %v3766_v23 = vmax.f32 %v777_v20, 0.0  ;;  %v781_v25 = vadd.f32 %v780_v6, %v714_v21 }
 0x18d   : > { %899 = vrot.lane.b32.xlu1 %v3712_v59, %s3424_s28  ;;  %v3772_v11 = vmax.f32 %v779_v24, 0.0 }
 0x18e   : > { %813 = vrot.lane.b32.xlu0 %v3724_v0, %s3423_s27  ;;  %v3790_v12 = vmax.f32 %v781_v25, 0.0 }
 0x191   : > { %943 = vrot.lane.b32.xlu1 %v3712_v59, %s3425_s29 }
 0x192   : > { %857 = vrot.lane.b32.xlu0 %v3724_v0, %s3422_s26 }
 0x195   : > { %983 = vrot.lane.b32.xlu1 %v3712_v59, %s3426_s30 }
 0x196   : > { %901 = vrot.lane.b32.xlu0 %v3724_v0, %s3424_s28 }
 0x199   : > { %1027 = vrot.lane.b32.xlu1 %v3712_v59, %s3427_s16 }
 0x19a   : > { %945 = vrot.lane.b32.xlu0 %v3724_v0, %s3425_s29 }
 0x19d   : > { %795 = vrot.lane.b32.xlu1 %v3714_v61, %s3423_s27 }
 0x19e   : > { %797 = vrot.lane.b32.xlu0 %v3742_v9, %s3423_s27 }
 0x1a1   : > { %843 = vrot.lane.b32.xlu1 %v3714_v61, %s3422_s26 }
 0x1a2   : > { %845 = vrot.lane.b32.xlu0 %v3742_v9, %s3422_s26 }
 0x1a5   : > { %887 = vrot.lane.b32.xlu1 %v3714_v61, %s3424_s28 }
 0x1a6   : > { %889 = vrot.lane.b32.xlu0 %v3742_v9, %s3424_s28 }
 0x1a9   : > { %931 = vrot.lane.b32.xlu1 %v3714_v61, %s3425_s29 }
 0x1aa   : > { %933 = vrot.lane.b32.xlu0 %v3742_v9, %s3425_s29 }
 0x1ad   : > { %987 = vrot.lane.b32.xlu1 %v3724_v0, %s3426_s30 }
 0x1ae   : > { %989 = vrot.lane.b32.xlu0 %v3742_v9, %s3426_s30 }
 0x1b1   : > { %815 = vrot.lane.b32.xlu1 %v3764_v22, %s3423_s27 }
 0x1b2   : > { %993 = vrot.lane.b32.xlu0 %v3766_v23, %s3426_s30 }
 0x1b5   : > { %859 = vrot.lane.b32.xlu1 %v3764_v22, %s3422_s26 }
 0x1b6   : > { %817 = vrot.lane.b32.xlu0 %v3772_v11, %s3423_s27 }
 0x1b9   : > { %903 = vrot.lane.b32.xlu1 %v3764_v22, %s3424_s28 }
 0x1ba   : > { %861 = vrot.lane.b32.xlu0 %v3772_v11, %s3422_s26 }
 0x1bd   : > { %947 = vrot.lane.b32.xlu1 %v3764_v22, %s3425_s29 }
 0x1be   : > { %905 = vrot.lane.b32.xlu0 %v3772_v11, %s3424_s28 }
 0x1c1   : > { %991 = vrot.lane.b32.xlu1 %v3764_v22, %s3426_s30 }
 0x1c2   : > { %949 = vrot.lane.b32.xlu0 %v3772_v11, %s3425_s29 }
 0x1c5   : > { %799 = vrot.lane.b32.xlu1 %v3766_v23, %s3423_s27 }
 0x1c6   : > { %801 = vrot.lane.b32.xlu0 %v3790_v12, %s3423_s27 }
 0x1c9   : > { %1031 = vrot.lane.b32.xlu1 %v3724_v0, %s3427_s16 }
 0x1ca   : > { %1033 = vrot.lane.b32.xlu0 %v3742_v9, %s3427_s16 }
 0x1cd   : > { %847 = vrot.lane.b32.xlu1 %v3766_v23, %s3422_s26 }
 0x1ce   : > { %849 = vrot.lane.b32.xlu0 %v3790_v12, %s3422_s26 }
 0x1d1   : > { %891 = vrot.lane.b32.xlu1 %v3766_v23, %s3424_s28 }
 0x1d2   : > { %1037 = vrot.lane.b32.xlu0 %v3766_v23, %s3427_s16 }
 0x1d5   : > { %935 = vrot.lane.b32.xlu1 %v3766_v23, %s3425_s29 }
 0x1d6   : > { %893 = vrot.lane.b32.xlu0 %v3790_v12, %s3424_s28 }
 0x1d9   : > { %995 = vrot.lane.b32.xlu1 %v3772_v11, %s3426_s30 }
 0x1da   : > { %1073 = vrot.lane.b32.xlu0 %v3714_v61, %s5420_s19 }
 0x1dd   : > { %1035 = vrot.lane.b32.xlu1 %v3764_v22, %s3427_s16 }
 0x1de   : > { %937 = vrot.lane.b32.xlu0 %v3790_v12, %s3425_s29 }
 0x1e1   : > { %1039 = vrot.lane.b32.xlu1 %v3772_v11, %s3427_s16 }
 0x1e2   : > { %1077 = vrot.lane.b32.xlu0 %v3742_v9, %s5420_s19 }
 0x1e5   : > { %1071 = vrot.lane.b32.xlu1 %v3712_v59, %s5420_s19 }
 0x1e6   : > { %1117 = vrot.lane.b32.xlu0 %v3714_v61, %s5322_s18 }
 0x1e9   : > { %1075 = vrot.lane.b32.xlu1 %v3724_v0, %s5420_s19 }
 0x1ea   : > { %1121 = vrot.lane.b32.xlu0 %v3742_v9, %s5322_s18 }
 0x1ed   : > { %1115 = vrot.lane.b32.xlu1 %v3712_v59, %s5322_s18 }
 0x1ee   : > { %997 = vrot.lane.b32.xlu0 %v3790_v12, %s3426_s30 }
 0x1f1   : > { %1119 = vrot.lane.b32.xlu1 %v3724_v0, %s5322_s18 }
 0x1f2   : > { %1081 = vrot.lane.b32.xlu0 %v3766_v23, %s5420_s19 }
 0x1f5   : > { %1079 = vrot.lane.b32.xlu1 %v3764_v22, %s5420_s19 }
 0x1f6   : > { %1041 = vrot.lane.b32.xlu0 %v3790_v12, %s3427_s16 }
 0x1f7   : > { %v812_v30 = vpop.permute.xlu1 %811 }
 0x1f8   : > { %v3850_v32 = vpop.permute.xlu0 %985 }
 0x1f9   : > { %1083 = vrot.lane.b32.xlu1 %v3772_v11, %s5420_s19 }
 0x1fa   : > { %1125 = vrot.lane.b32.xlu0 %v3766_v23, %s5322_s18 }
 0x1fb   : > { %v856_v33 = vpop.permute.xlu1 %855 }
 0x1fc   : > { %v3856_v34 = vpop.permute.xlu0 %1029 }
 0x1fd   : > { %1123 = vrot.lane.b32.xlu1 %v3764_v22, %s5322_s18 }
 0x1fe   : > { %1085 = vrot.lane.b32.xlu0 %v3790_v12, %s5420_s19 }
 0x1ff   : > { %v3862_v35 = vpop.permute.xlu1 %899 }
 0x200   : > { %v814_v36 = vpop.permute.xlu0 %813 }
 0x201   : > { %1127 = vrot.lane.b32.xlu1 %v3772_v11, %s5322_s18 }
 0x202   : > { %1129 = vrot.lane.b32.xlu0 %v3790_v12, %s5322_s18  ;;  %s2424_s18 = sld [smem:[#allocation3]] }
 0x203   : > { %v3871_v42 = vpop.permute.xlu1 %943 }
 0x204   : > { %v858_v44 = vpop.permute.xlu0 %857 }
 0x205   : > { %1219 = vperm.xlu1 %3211, %v1213_v41  }
 0x206   : > { %1224 = vperm.xlu0 %3210, %v1214_v43  }
 0x207   : > { %v3876_v47 = vpop.permute.xlu1 %983 }
 0x208   : > { %v3878_v48 = vpop.permute.xlu0 %901 }
 0x20b   : > { %v3880_v51 = vpop.permute.xlu1 %1027 }
 0x20c   : > { %v3882_v52 = vpop.permute.xlu0 %945 }
 0x20f   : > { %v796_v53 = vpop.permute.xlu1 %795 }
 0x210   : > { %v831_v54 = vsel %vm511_vm1, %v796_v53, %v812_v30  ;;  %v798_v55 = vpop.permute.xlu0 %797  ;;  %v819_v56 = vsel %vm511_vm1, %v812_v30, %v796_v53 }
 0x211   : > { %v832_v57 = vsel %vm511_vm1, %v798_v55, %v814_v36  ;;  %v820_v58 = vsel %vm511_vm1, %v814_v36, %v798_v55  ;;  %v836_v60 = vmul.f32 %v819_v56, %v3599_v15  ;;  %v835_v62 = vmul.f32 %v831_v54, %v3605_v17 }
 0x212   : > { %v838_v63 = vmul.f32 %v820_v58, %v3599_v15  ;;  %v837_v3 = vmul.f32 %v832_v57, %v3605_v17 }
 0x213   : > { %v844_v4 = vpop.permute.xlu1 %843 }
 0x214   : > { %v846_v5 = vpop.permute.xlu0 %845  ;;  %v1160_v6 = vpack.c.bf16 %v838_v63, %v836_v60  ;;  %v1159_v7 = vpack.c.bf16 %v837_v3, %v835_v62  ;;  %v863_v56 = vsel %vm531_vm0, %v856_v33, %v844_v4  ;;  %v875_v60 = vsel %vm531_vm0, %v844_v4, %v856_v33 }
 0x215   : > { %v864_v57 = vsel %vm531_vm0, %v858_v44, %v846_v5  ;;  %v876_v62 = vsel %vm531_vm0, %v846_v5, %v858_v44  ;;  %v880_v26 = vmul.f32 %v863_v56, %v3602_v16  ;;  %v879_v5 = vmul.f32 %v875_v60, %v3608_v18 }
 0x216   : > { %1244 = vmatprep.subr.bf16.mxu1 %v1160_v6  ;;  %v882_v27 = vmul.f32 %v864_v57, %v3602_v16 }
 0x217   : > { %1245 = vmatpush1.bf16.msra.mxu1 %v1159_v7  ;;  %v888_v8 = vpop.permute.xlu1 %887 }
 0x218   : > { %v890_v19 = vpop.permute.xlu0 %889  ;;  %v907_v56 = vsel %vm551_vm2, %v3862_v35, %v888_v8 }
 0x219   : > { %v920_v60 = vsel %vm551_vm2, %v890_v19, %v3878_v48 }
 0x21b   : > { %v3892_v20 = vpop.permute.xlu1 %931 }
 0x21c   : > { %v3894_v21 = vpop.permute.xlu0 %933 }
 0x21f   : > { %v3896_v24 = vpop.permute.xlu1 %987 }
 0x220   : > { %v3898_v25 = vpop.permute.xlu0 %989 }
 0x223   : > { %v816_v28 = vpop.permute.xlu1 %815 }
 0x224   : > { %v3900_v29 = vpop.permute.xlu0 %993 }
 0x227   : > { %v860_v30 = vpop.permute.xlu1 %859 }
 0x228   : > { %v818_v31 = vpop.permute.xlu0 %817 }
 0x22b   : > { %v904_v36 = vpop.permute.xlu1 %903 }
 0x22c   : > { %v862_v41 = vpop.permute.xlu0 %861 }
 0x22f   : > { %v3902_v43 = vpop.permute.xlu1 %947 }
 0x230   : > { %v3904_v53 = vpop.permute.xlu0 %905 }
 0x233   : > { %v3906_v54 = vpop.permute.xlu1 %991 }
 0x234   : > { %v3908_v55 = vpop.permute.xlu0 %949 }
 0x237   : > { %v800_v58 = vpop.permute.xlu1 %799 }
 0x238   : > { %v821_v63 = vsel %vm511_vm1, %v816_v28, %v800_v58  ;;  %v833_v3 = vsel %vm511_vm1, %v800_v58, %v816_v28  ;;  %v802_v6 = vpop.permute.xlu0 %801  ;;  %v881_v28 = vmul.f32 %v876_v62, %v3608_v18 }
 0x239   : > { %v839_v7 = vmul.f32 %v833_v3, %v3605_v17  ;;  %v840_v2 = vmul.f32 %v821_v63, %v3599_v15  ;;  %v822_v13 = vsel %vm511_vm1, %v818_v31, %v802_v6  ;;  %v834_v14 = vsel %vm511_vm1, %v802_v6, %v818_v31 }
 0x23a   : > { %v841_v33 = vmul.f32 %v834_v14, %v3605_v17  ;;  %v842_v44 = vmul.f32 %v822_v13, %v3599_v15  ;;  %v1164_v31 = vpack.c.bf16 %v882_v27, %v880_v26  ;;  %v919_v14 = vsel %vm551_vm2, %v888_v8, %v3862_v35 }
 0x23b   : > { %v3924_v4 = vpop.permute.xlu1 %1031  ;;  %v908_v13 = vsel %vm551_vm2, %v3878_v48, %v890_v19  ;;  %v1163_v26 = vpack.c.bf16 %v881_v28, %v879_v5  ;;  %v923_v5 = vmul.f32 %v919_v14, %v3623_v37  ;;  %v925_v28 = vmul.f32 %v920_v60, %v3623_v37 }
 0x23c   : > { %v3928_v58 = vpop.permute.xlu0 %1033  ;;  %v1162_v63 = vpack.c.bf16 %v842_v44, %v840_v2  ;;  %v1161_v3 = vpack.c.bf16 %v841_v33, %v839_v7  ;;  %v924_v33 = vmul.f32 %v907_v56, %v3626_v38  ;;  %v926_v44 = vmul.f32 %v908_v13, %v3626_v38 }
 0x23d   : > { %v952_v56 = vsel %vm571_vm3, %v3882_v52, %v3894_v21 }
 0x23e   : > { %1246 = vmatprep.subr.bf16.mxu1 %v1162_v63  ;;  %v1168_v13 = vpack.c.bf16 %v926_v44, %v924_v33 }
 0x23f   : > { %1247 = vmatpush1.bf16.msra.mxu1 %v1161_v3  ;;  %v848_v57 = vpop.permute.xlu1 %847 }
 0x240   : > { %v865_v62 = vsel %vm531_vm0, %v860_v30, %v848_v57  ;;  %v877_v2 = vsel %vm531_vm0, %v848_v57, %v860_v30  ;;  %v850_v6 = vpop.permute.xlu0 %849  ;;  %1248 = vmatprep.subr.bf16.mxu1 %v1164_v31 }
 0x241   : > { %v883_v27 = vmul.f32 %v877_v2, %v3608_v18  ;;  %v884_v7 = vmul.f32 %v865_v62, %v3602_v16  ;;  %v866_v35 = vsel %vm531_vm0, %v862_v41, %v850_v6  ;;  %v878_v8 = vsel %vm531_vm0, %v850_v6, %v862_v41 }
 0x242   : > { %v885_v48 = vmul.f32 %v878_v8, %v3608_v18  ;;  %v886_v19 = vmul.f32 %v866_v35, %v3602_v16  ;;  %v951_v41 = vsel %vm571_vm3, %v3871_v42, %v3892_v20  ;;  %v963_v62 = vsel %vm571_vm3, %v3892_v20, %v3871_v42 }
 0x243   : > { %1249 = vmatpush1.bf16.msra.mxu1 %v1163_v26  ;;  %v892_v30 = vpop.permute.xlu1 %891  ;;  %v968_v2 = vmul.f32 %v951_v41, %v3632_v40  ;;  %v1167_v26 = vpack.c.bf16 %v925_v28, %v923_v5 }
 0x244   : > { %v3950_v63 = vpop.permute.xlu0 %1037  ;;  %v1166_v3 = vpack.c.bf16 %v886_v19, %v884_v7  ;;  %v1165_v31 = vpack.c.bf16 %v885_v48, %v883_v27  ;;  %v909_v57 = vsel %vm551_vm2, %v904_v36, %v892_v30  ;;  %v921_v14 = vsel %vm551_vm2, %v892_v30, %v904_v36 }
 0x245   : > { %v964_v27 = vsel %vm571_vm3, %v3894_v21, %v3882_v52  ;;  %v970_v7 = vmul.f32 %v952_v56, %v3632_v40  ;;  %v927_v8 = vmul.f32 %v921_v14, %v3623_v37  ;;  %v928_v42 = vmul.f32 %v909_v57, %v3626_v38 }
 0x246   : > { %1250 = vmatprep.subr.bf16.mxu1 %v1166_v3  ;;  %v967_v19 = vmul.f32 %v963_v62, %v3629_v39  ;;  %v969_v30 = vmul.f32 %v964_v27, %v3629_v39  ;;  %v978_v57 = vmul.f32 %v3742_v9, %v3637_v45  ;;  %v977_v9 = vmul.f32 %v3724_v0, %v3640_v46 }
 0x247   : > { %1251 = vmatpush1.bf16.msra.mxu1 %v1165_v31  ;;  %v936_v60 = vpop.permute.xlu1 %935  ;;  %v980_v0 = vmul.f32 %v3766_v23, %v3637_v45  ;;  %v999_v23 = vsel %vm600_vm4, %v3876_v47, %v3850_v32 }
 0x248   : > { %v894_v6 = vpop.permute.xlu0 %893  ;;  %1252 = vmatprep.subr.bf16.mxu1 %v1168_v13  ;;  %v953_v5 = vsel %vm571_vm3, %v3902_v43, %v936_v60  ;;  %v965_v28 = vsel %vm571_vm3, %v936_v60, %v3902_v43  ;;  %v1171_v13 = vpack.c.bf16 %v969_v30, %v967_v19 }
 0x249   : > { %v910_v36 = vsel %vm551_vm2, %v3904_v53, %v894_v6  ;;  %v922_v35 = vsel %vm551_vm2, %v894_v6, %v3904_v53  ;;  %v1172_v53 = vpack.c.bf16 %v970_v7, %v968_v2  ;;  %v971_v14 = vmul.f32 %v965_v28, %v3629_v39 }
 0x24a   : > { %v929_v20 = vmul.f32 %v922_v35, %v3623_v37  ;;  %v930_v33 = vmul.f32 %v910_v36, %v3626_v38  ;;  %v972_v62 = vmul.f32 %v953_v5, %v3632_v40  ;;  %v975_v36 = vmul.f32 %v3712_v59, %v3640_v46 }
 0x24b   : > { %1253 = vmatpush1.bf16.msra.mxu1 %v1167_v26  ;;  %v3976_v44 = vpop.permute.xlu1 %995  ;;  %v982_v35 = vmul.f32 %v3790_v12, %v3637_v45  ;;  %v1015_v59 = vsel %vm600_vm4, %v3850_v32, %v3876_v47  ;;  %v1000_v12 = vsel %vm600_vm4, %v3896_v24, %v3898_v25  ;;  %v1017_v28 = vsel %vm600_vm4, %v3900_v29, %v3906_v54 }
 0x24c   : > { %v3978_v52 = vpop.permute.xlu0 %1073  ;;  %v1170_v21 = vpack.c.bf16 %v930_v33, %v928_v42  ;;  %v1169_v48 = vpack.c.bf16 %v929_v20, %v927_v8  ;;  %v1016_v8 = vsel %vm600_vm4, %v3898_v25, %v3896_v24  ;;  %v979_v33 = vmul.f32 %v3764_v22, %v3640_v46 }
 0x24d   : > { %v1178_v19 = vpack.c.bf16 %v982_v35, %v980_v0  ;;  %v1021_v5 = vmul.f32 %v1000_v12, %v3645_v49  ;;  %v1001_v22 = vsel %vm600_vm4, %v3906_v54, %v3900_v29  ;;  %v1019_v25 = vmul.f32 %v999_v23, %v3645_v49  ;;  %v5421_v0 = vld [vmem:[#allocation21_spill] sm:$0xff] }
 0x24e   : > { %1254 = vmatprep.subr.bf16.mxu1 %v1170_v21  ;;  %v981_v21 = vmul.f32 %v3772_v11, %v3640_v46  ;;  %v1060_v32 = vsel %vm620_vm5, %v3928_v58, %v3924_v4  ;;  %v1024_v54 = vmul.f32 %v1017_v28, %v3648_v50 }
 0x24f   : > { %1255 = vmatpush1.bf16.msra.mxu1 %v1169_v48  ;;  %v3986_v3 = vpop.permute.xlu1 %1035  ;;  %v1022_v48 = vmul.f32 %v1016_v8, %v3648_v50  ;;  %v1179_v29 = vpack.c.bf16 %v1021_v5, %v1019_v25 }
 0x250   : > { %v938_v31 = vpop.permute.xlu0 %937  ;;  %1256 = vmatprep.subr.bf16.mxu1 %v1172_v53  ;;  %v1020_v53 = vmul.f32 %v1015_v59, %v3648_v50  ;;  %v1177_v11 = vpack.c.bf16 %v981_v21, %v979_v33 }
 0x251   : > { %v954_v41 = vsel %vm571_vm3, %v3908_v55, %v938_v31  ;;  %v966_v56 = vsel %vm571_vm3, %v938_v31, %v3908_v55  ;;  %v976_v55 = vmul.f32 %v3714_v61, %v3637_v45  ;;  %v1175_v61 = vpack.c.bf16 %v977_v9, %v975_v36 }
 0x252   : > { %v973_v43 = vmul.f32 %v966_v56, %v3629_v39  ;;  %v974_v60 = vmul.f32 %v954_v41, %v3632_v40  ;;  %v1180_v47 = vpack.c.bf16 %v1022_v48, %v1020_v53  ;;  %v1059_v41 = vsel %vm620_vm5, %v3856_v34, %v3880_v51 }
 0x253   : > { %1257 = vmatpush1.bf16.msra.mxu1 %v1171_v13  ;;  %v3998_v2 = vpop.permute.xlu1 %1039  ;;  %v1176_v7 = vpack.c.bf16 %v978_v57, %v976_v55  ;;  %v1023_v56 = vmul.f32 %v1001_v22, %v3645_v49  ;;  %v1044_v13 = vsel %vm620_vm5, %v3924_v4, %v3928_v58  ;;  %v1043_v58 = vsel %vm620_vm5, %v3880_v51, %v3856_v34  ;;  %v5422_v34 = vld [vmem:[#allocation20_spill] sm:$0xff] }
 0x254   : > { %v4000_v6 = vpop.permute.xlu0 %1077  ;;  %v1174_v26 = vpack.c.bf16 %v974_v60, %v972_v62  ;;  %v1173_v27 = vpack.c.bf16 %v973_v43, %v971_v14  ;;  %v1066_v14 = vmul.f32 %v1060_v32, %v3668_v10  ;;  %v1064_v55 = vmul.f32 %v1059_v41, %v3668_v10 }
 0x255   : > { %v1065_v9 = vmul.f32 %v1044_v13, %v3665_v1  ;;  %v1063_v21 = vmul.f32 %v1043_v58, %v3665_v1  ;;  %v1061_v48 = vsel %vm620_vm5, %v3950_v63, %v3986_v3 }
 0x256   : > { %1258 = vmatprep.subr.bf16.mxu1 %v1174_v26  ;;  %v1068_v28 = vmul.f32 %v1061_v48, %v3668_v10 }
 0x257   : > { %1259 = vmatpush1.bf16.msra.mxu1 %v1173_v27  ;;  %v4013_v42 = vpop.permute.xlu1 %1071  ;;  %v1183_v25 = vpack.c.bf16 %v1065_v9, %v1063_v21 }
 0x258   : > { %v1118_v20 = vpop.permute.xlu0 %1117  ;;  %1260 = vmatprep.subr.bf16.mxu1 %v1176_v7 }
 0x25b   : > { %v1076_v30 = vpop.permute.xlu1 %1075  ;;  %1261 = vmatpush1.bf16.msra.mxu1 %v1175_v61 }
 0x25c   : > { %v1122_v24 = vpop.permute.xlu0 %1121  ;;  %1262 = vmatprep.subr.bf16.mxu1 %v1178_v19  ;;  %v1184_v19 = vpack.c.bf16 %v1066_v14, %v1064_v55  ;;  %v1104_v23 = vsel %vm640_vm6, %v4000_v6, %v1076_v30 }
 0x25f   : > { %v1116_v31 = vpop.permute.xlu1 %1115  ;;  %1263 = vmatpush1.bf16.msra.mxu1 %v1177_v11 }
 0x260   : > { %v998_v57 = vpop.permute.xlu0 %997  ;;  %1264 = vmatprep.subr.bf16.mxu1 %v1180_v47  ;;  %v1131_v60 = vsel %vm660_vm7, %v1116_v31, %v1118_v20  ;;  %v1147_v26 = vsel %vm660_vm7, %v1118_v20, %v1116_v31  ;;  %v1088_v47 = vsel %vm640_vm6, %v1076_v30, %v4000_v6  ;;  %v5423_v31 = vld [vmem:[#allocation19_spill] sm:$0xff]  ;;  %v5424_v6 = vld [vmem:[#allocation18_spill] sm:$0xff] }
 0x261   : > { %v1002_v62 = vsel %vm600_vm4, %v3976_v44, %v998_v57  ;;  %v1018_v43 = vsel %vm600_vm4, %v998_v57, %v3976_v44  ;;  %v1045_v44 = vsel %vm620_vm5, %v3986_v3, %v3950_v63  ;;  %v1151_v59 = vmul.f32 %v5421_v0, %v1131_v60 }
 0x262   : > { %v1025_v27 = vmul.f32 %v1002_v62, %v3645_v49  ;;  %v1026_v4 = vmul.f32 %v1018_v43, %v3648_v50  ;;  %v1152_v51 = vmul.f32 %v5422_v34, %v1147_v26  ;;  %v1067_v22 = vmul.f32 %v1045_v44, %v3665_v1 }
 0x263   : > { %v1120_v7 = vpop.permute.xlu1 %1119  ;;  %1265 = vmatpush1.bf16.msra.mxu1 %v1179_v29  ;;  %v1103_v63 = vsel %vm640_vm6, %v3978_v52, %v4013_v42  ;;  %v1110_v41 = vmul.f32 %v1104_v23, %v5423_v31  ;;  %v1087_v29 = vsel %vm640_vm6, %v4013_v42, %v3978_v52  ;;  %v1109_v30 = vmul.f32 %v1088_v47, %v5424_v6 }
 0x264   : > { %v1132_v36 = vsel %vm660_vm7, %v1120_v7, %v1122_v24  ;;  %v1148_v35 = vsel %vm660_vm7, %v1122_v24, %v1120_v7  ;;  %v1082_v8 = vpop.permute.xlu0 %1081  ;;  %v1182_v20 = vpack.c.bf16 %v1026_v4, %v1024_v54  ;;  %v1181_v61 = vpack.c.bf16 %v1025_v27, %v1023_v56 }
 0x265   : > { %v1153_v12 = vmul.f32 %v5421_v0, %v1132_v36  ;;  %v1154_v33 = vmul.f32 %v5422_v34, %v1148_v35  ;;  %v1107_v60 = vmul.f32 %v1087_v29, %v5424_v6  ;;  %v1195_v35 = vld [vmem:[%s5299_s6] sm:$0xff] }
 0x266   : > { %1266 = vmatprep.subr.bf16.mxu1 %v1182_v20 }
 0x267   : > { %v4080_v53 = vpack.c.bf16 %v1153_v12, %v1151_v59  ;;  %v1080_v5 = vpop.permute.xlu1 %1079  ;;  %1267 = vmatpush1.bf16.msra.mxu1 %v1181_v61  ;;  %v1192_v24 = vpack.c.bf16 %v1154_v33, %v1152_v51  ;;  %v1187_v55 = vpack.c.bf16 %v1109_v30, %v1107_v60 }
 0x268   : > { %v1042_v11 = vpop.permute.xlu0 %1041  ;;  %1268 = vmatprep.subr.bf16.mxu1 %v1184_v19  ;;  %v1089_v26 = vsel %vm640_vm6, %v1080_v5, %v1082_v8  ;;  %v1105_v27 = vsel %vm640_vm6, %v1082_v8, %v1080_v5  ;;  %v1198_v8 = vld [vmem:[%s5299_s6 + $0x18] sm:$0xff] }
 0x269   : > { %v1046_v3 = vsel %vm620_vm5, %v3998_v2, %v1042_v11  ;;  %v1062_v32 = vsel %vm620_vm5, %v1042_v11, %v3998_v2  ;;  %1297 = vmatprep.subr.bf16.mxu0 %v1192_v24  ;;  %v1108_v2 = vmul.f32 %v1103_v63, %v5423_v31  ;;  %v1111_v9 = vmul.f32 %v1089_v26, %v5424_v6 }
 0x26a   : > { %v1069_v56 = vmul.f32 %v1046_v3, %v3665_v1  ;;  %v1070_v13 = vmul.f32 %v1062_v32, %v3668_v10  ;;  %1298 = vmatpush1.bf16.msra.mxu0 %v4080_v53  ;;  %v1112_v44 = vmul.f32 %v1105_v27, %v5423_v31  ;;  %v1207_v19 = vpack.c.bf16 %v1198_v8, %v1195_v35 }
 0x26b   : > { %v1084_v57 = vpop.permute.xlu1 %1083  ;;  %1269 = vmatpush1.bf16.msra.mxu1 %v1183_v25  ;;  %v1188_v43 = vpack.c.bf16 %v1110_v41, %v1108_v2  ;;  %v1197_v25 = vld [vmem:[%s5299_s6 + $0x10] sm:$0xff]  ;;  %v1204_v41 = vld [vmem:[%s5299_s6 + $0x48] sm:$0xff] }
 0x26c   : > { %v1126_v54 = vpop.permute.xlu0 %1125  ;;  %v1186_v14 = vpack.c.bf16 %v1070_v13, %v1068_v28  ;;  %v1185_v62 = vpack.c.bf16 %v1069_v56, %v1067_v22  ;;  %v1200_v28 = vld [vmem:[%s5299_s6 + $0x28] sm:$0xff]  ;;  %v1203_v13 = vld [vmem:[%s5299_s6 + $0x40] sm:$0xff] }
 0x26d   : > { %v1209_v32 = vpack.c.bf16 %v1200_v28, %v1197_v25 }
 0x26e   : > { %1270 = vmatprep.subr.bf16.mxu1 %v1186_v14 }
 0x26f   : > { %v1124_v4 = vpop.permute.xlu1 %1123  ;;  %1271 = vmatpush1.bf16.msra.mxu1 %v1185_v62 }
 0x270   : > { %v1086_v58 = vpop.permute.xlu0 %1085  ;;  %1272 = vmatprep.subr.bf16.mxu1 %v1188_v43  ;;  %v1133_v20 = vsel %vm660_vm7, %v1124_v4, %v1126_v54  ;;  %v1149_v61 = vsel %vm660_vm7, %v1126_v54, %v1124_v4 }
 0x271   : > { %v1090_v52 = vsel %vm640_vm6, %v1084_v57, %v1086_v58  ;;  %v1106_v42 = vsel %vm640_vm6, %v1086_v58, %v1084_v57  ;;  %v1155_v23 = vmul.f32 %v5421_v0, %v1133_v20  ;;  %v1156_v5 = vmul.f32 %v5422_v34, %v1149_v61  ;;  %v1206_v57 = vld [vmem:[%s5299_s6 + $0x58] sm:$0xff] }
 0x272   : > { %v1113_v7 = vmul.f32 %v1090_v52, %v5424_v6  ;;  %v1114_v36 = vmul.f32 %v1106_v42, %v5423_v31  ;;  %v1212_v29 = vpack.c.bf16 %v1206_v57, %v1203_v13 }
 0x273   : > { %v1128_v59 = vpop.permute.xlu1 %1127  ;;  %1273 = vmatpush1.bf16.msra.mxu1 %v1187_v55 }
 0x274   : > { %v1130_v51 = vpop.permute.xlu0 %1129  ;;  %v1190_v12 = vpack.c.bf16 %v1114_v36, %v1112_v44  ;;  %v1189_v33 = vpack.c.bf16 %v1113_v7, %v1111_v9 }
 0x275   : > { %v1134_v21 = vsel %vm660_vm7, %v1128_v59, %v1130_v51  ;;  %v1150_v48 = vsel %vm660_vm7, %v1130_v51, %v1128_v59  ;;  %v1360_v59 = vld [vmem:[%s5301_s8] sm:$0xff]  ;;  %v1361_v51 = vld [vmem:[%s5301_s8 + $0x8] sm:$0xff] }
 0x276   : > { %v1157_v22 = vmul.f32 %v5421_v0, %v1134_v21  ;;  %v1158_v11 = vmul.f32 %v5422_v34, %v1150_v48  ;;  %1274 = vmatprep.subr.bf16.mxu1 %v1190_v12  ;;  %v5425_v0 = vmov 0   ;;  %v1202_v34 = vld [vmem:[%s5299_s6 + $0x38] sm:$0xff]  ;;  %v1362_v21 = vpack.c.bf16 %v1361_v51, %v1360_v59 }
 0x277   : > { %1275 = vmatpush1.bf16.msra.mxu1 %v1189_v33 }
 0x278   : > { %v1193_v63 = vpack.c.bf16 %v1157_v22, %v1155_v23  ;;  %3157 = vmatprep.subr.bf16.mxu1 %v1192_v24  ;;  %v1194_v3 = vpack.c.bf16 %v1158_v11, %v1156_v5  ;;  %v1205_v24 = vld [vmem:[%s5299_s6 + $0x50] sm:$0xff] }
 0x279   : > { %v1211_v47 = vpack.c.bf16 %v1205_v24, %v1202_v34  ;;  %v1215_v34 = vld [vmem:[%s5300_s7 + $0x10] sm:$0xff]  ;;  %v2164_v24 = vld [vmem:[%s5302_s9] sm:$0xff] }
 0x27a   : > { %1277 = vmatmul.mubr.bf16.vlgmr.msra.gmra.mrb[0].mxu1 %v1207_v19  ;;  %1299 = vmatprep.subr.bf16.mxu0 %v1194_v3 }
 0x27b   : > { %3159 = vmatpush1.bf16.msra.mxu1 %v4080_v53  ;;  %1300 = vmatpush1.bf16.msra.mxu0 %v1193_v63  ;;  %v1201_v53 = vld [vmem:[%s5299_s6 + $0x30] sm:$0xff] }
 0x27c   : > { %3158 = vmatprep.subr.bf16.mxu1 %v1194_v3  ;;  %v1210_v56 = vpack.c.bf16 %v1204_v41, %v1201_v53  ;;  %1286 = vmatprep.mubr.bf16.mxu1 %v1211_v47  ;;  %v2165_v47 = vld [vmem:[%s5302_s9 + $0x8] sm:$0xff] }
 0x27d   : > { %v2166_v53 = vpack.c.bf16 %v2165_v47, %v2164_v24 }
 0x27e   : > { %3129 = vmatmul.mubr.msk.bf16.vlgmr.msra.gmra.mrb[8].mxu0 %vm1237_vm10, %v1209_v32  ;;  %v1216_v32 = vld [vmem:[%s5300_s7 + $0x18] sm:$0xff] }
 0x27f   : > { %3160 = vmatpush1.bf16.msra.mxu1 %v1193_v63  ;;  %1398 = vmatprep.mubr.bf16.mxu0 %v5425_v0 }
 0x282   : > { %1287 = vmatmul.mubr.bf16.gmra.mrb[4].mxu1 %v1210_v56 }
 0x283   : > { %1339 = vmatprep.mubr.bf16.mxu1 %v5425_v0 }
 0x284   : > { %v1220_v14 = vpop.permute.xlu1 %1219 }
 0x285   : > { %v1225_v60 = vpop.permute.xlu0 %1224 }
 0x28e   : > { %3130 = vmatmul.mubr.msk.bf16.vlgmr.msra.gmra.mrb[4].mxu1 %vm1237_vm10, %v1212_v29 }
 0x28f   : > { %2214 = vmatprep.mubr.bf16.mxu1 %v5425_v0 }
 0x34d   : > { %v1278_v2 = vpop.f32.mrb[0].mxu1 }
 0x34e   : > { %v1280_v54 = vpop.f32.mrb[1].mxu1  ;;  %v1279_v30 = vadd.f32 %v1278_v2, %v1220_v14 }
 0x34f   : > { %v1282_v62 = vpop.f32.mrb[2].mxu1  ;;  %v1281_v26 = vadd.f32 %v1280_v54, %v1220_v14 }
 0x350   : > { %v1284_v43 = vpop.f32.mrb[3].mxu1  ;;  %v1283_v4 = vadd.f32 %v1282_v62, %v1225_v60 }
 0x351   : > { %v1331_v27 = vpop.f32.mrb[8].mxu0  ;;  %v1285_v42 = vadd.f32 %v1284_v43, %v1225_v60 }
 0x352   : > { %v4155_v58 = vadd.f32 %v1331_v27, %v1279_v30  ;;  %v1333_v52 = vpop.f32.mrb[9].mxu0 }
 0x353   : > { %v4157_v55 = vadd.f32 %v1333_v52, %v1281_v26  ;;  %v1335_v9 = vpop.f32.mrb[10].mxu0 }
 0x354   : > { %5426 = vst [vmem:[#allocation21_spill] sm:$0xff] %v4155_v58  ;;  %v4159_v44 = vadd.f32 %v1335_v9, %v1283_v4  ;;  %v1337_v7 = vpop.f32.mrb[11].mxu0  ;;  %v5327_v61 = vmax.f32 %v4155_v58, 0.0 }
 0x355   : > { %5427 = vst [vmem:[#allocation20_spill] sm:$0xff] %v4157_v55  ;;  %v4161_v36 = vadd.f32 %v1337_v7, %v1285_v42  ;;  %v5325_v8 = vmax.f32 %v4157_v55, 0.0 }
 0x356   : > { %5428 = vst [vmem:[#allocation22_spill] sm:$0xff] %v4159_v44  ;;  %v5326_v35 = vmax.f32 %v4159_v44, 0.0 }
 0x357   : > { %5429 = vst [vmem:[#allocation23_spill] sm:$0xff] %v4161_v36  ;;  %v5324_v20 = vmax.f32 %v4161_v36, 0.0 }
 0x358   : > { %v1358_v33 = vpack.c.bf16 %v5326_v35, %v5327_v61 }
 0x359   : > { %v1359_v12 = vpack.c.bf16 %v5324_v20, %v5325_v8 }
 0x35b   : > { %1366 = vmatprep.subr.bf16.mxu0 %v1359_v12  ;;  %2182 = vmatprep.subr.bf16.mxu1 %v1359_v12 }
 0x35c   : > { %1367 = vmatpush1.bf16.msra.mxu0 %v1358_v33  ;;  %2183 = vmatpush1.bf16.msra.mxu1 %v1358_v33 }
 0x35d   : > { %1491 = vmatprep.subr.bf16.mxu0 %v1359_v12 }
 0x35f   : > { %3131 = vmatmul.mubr.msk.bf16.vlgmr.msra.gmra.mrb[12].mxu0 %vm531_vm0, %v1362_v21  ;;  %3148 = vmatmul.mubr.msk.bf16.vlgmr.msra.gmra.mrb[8].mxu1 %vm531_vm0, %v2166_v53 }
 0x360   : > { %1492 = vmatpush1.bf16.msra.mxu0 %v1358_v33  ;;  %1523 = vmatprep.mubr.bf16.mxu0 %v5425_v0 }
 0x361   : > { %v1341_v25 = vpop.f32.mrb[4].mxu1 }
 0x362   : > { %v1343_v28 = vpop.f32.mrb[5].mxu1 }
 0x363   : > { %v1345_v63 = vpop.f32.mrb[6].mxu1 }
 0x364   : > { %v1347_v3 = vpop.f32.mrb[7].mxu1 }
 0x432   : > { %v1400_v48 = vpop.f32.mrb[12].mxu0 }
 0x433   : > { %v1402_v19 = vpop.f32.mrb[13].mxu0 }
 0x434   : > { %v1404_v23 = vpop.f32.mrb[14].mxu0 }
 0x435   : > { %v1409_v5 = vpack.c.bf16 %v1404_v23, %v1400_v48  ;;  %v1406_v22 = vpop.f32.mrb[15].mxu0 }
 0x436   : > { %v1410_v11 = vpack.c.bf16 %v1406_v22, %v1402_v19  ;;  %v4248_v22 = vpop.f32.mrb[8].mxu1 }
 0x437   : > { %1411 = vxpose.xlu1.c.b16.start.end [1/1] (short) %v1409_v5, 128  ;;  %5434 = vst [vmem:[#allocation28_spill] sm:$0xff] %v4248_v22 }
 0x438   : > { %1427 = vxpose.xlu0.c.b16.start.end [1/1] (short) %v1410_v11, 128  ;;  %v4250_v11 = vpop.f32.mrb[9].mxu1 }
 0x439   : > { %5435 = vst [vmem:[#allocation29_spill] sm:$0xff] %v4250_v11 }
 0x457   : > { %1234 = vperm.xlu1 %3211, %v1216_v32  }
 0x45d   : > { %1229 = vperm.xlu0 %3210, %v1215_v34  }
 0x49d   : > { %v1419_v41 = vpop.trf.xlu1 }
 0x49e   : > { %3132 = vmatmul.mubr.msk.bf16.vlgmr.msra.gmra.mrb[16].mxu0 %vm531_vm0, %v1419_v41  ;;  %v1435_v57 = vpop.trf.xlu0 }
 0x49f   : > { %1533 = vmatprep.mubr.bf16.mxu0 %v5425_v0 }
 0x4a1   : > { %v1420_v56 = vpop.trf.xlu1 }
 0x4a2   : > { %v1436_v29 = vpop.trf.xlu0 }
 0x4a5   : > { %v1421_v13 = vpop.trf.xlu1 }
 0x4a6   : > { %3133 = vmatmul.mubr.msk.bf16.gmra.mrb[20].mxu0 %vm531_vm0, %v1420_v56  ;;  %v1437_v54 = vpop.trf.xlu0 }
 0x4a7   : > { %1543 = vmatprep.mubr.bf16.mxu0 %v5425_v0 }
 0x4a9   : > { %v1422_v2 = vpop.trf.xlu1 }
 0x4aa   : > { %v1438_v62 = vpop.trf.xlu0 }
 0x4ad   : > { %v1423_v14 = vpop.trf.xlu1 }
 0x4ae   : > { %3134 = vmatmul.mubr.msk.bf16.gmra.mrb[24].mxu0 %vm531_vm0, %v1421_v13  ;;  %v1439_v43 = vpop.trf.xlu0 }
 0x4af   : > { %1553 = vmatprep.mubr.bf16.mxu0 %v5425_v0 }
 0x4b1   : > { %v1424_v30 = vpop.trf.xlu1 }
 0x4b2   : > { %v1440_v60 = vpop.trf.xlu0 }
 0x4b5   : > { %v1425_v26 = vpop.trf.xlu1 }
 0x4b6   : > { %3135 = vmatmul.mubr.msk.bf16.gmra.mrb[28].mxu0 %vm531_vm0, %v1422_v2  ;;  %v1441_v27 = vpop.trf.xlu0 }
 0x4b7   : > { %1563 = vmatprep.mubr.bf16.mxu0 %v5425_v0 }
 0x4b9   : > { %v1426_v4 = vpop.trf.xlu1 }
 0x4ba   : > { %v1442_v52 = vpop.trf.xlu0 }
 0x4be   : > { %3136 = vmatmul.mubr.msk.bf16.gmra.mrb[32].mxu0 %vm531_vm0, %v1423_v14 }
 0x4bf   : > { %1573 = vmatprep.mubr.bf16.mxu0 %v5425_v0 }
 0x4c6   : > { %3137 = vmatmul.mubr.msk.bf16.gmra.mrb[36].mxu0 %vm531_vm0, %v1424_v30 }
 0x4c7   : > { %1583 = vmatprep.mubr.bf16.mxu0 %v5425_v0 }
 0x4ce   : > { %3138 = vmatmul.mubr.msk.bf16.gmra.mrb[40].mxu0 %vm531_vm0, %v1425_v26 }
 0x4cf   : > { %1593 = vmatprep.mubr.bf16.mxu0 %v5425_v0 }
 0x4d6   : > { %3139 = vmatmul.mubr.msk.bf16.gmra.mrb[44].mxu0 %vm531_vm0, %v1426_v4  ;;  %v1235_v42 = vpop.permute.xlu1 %1234 }
 0x4d7   : > { %1603 = vmatprep.mubr.bf16.mxu0 %v5425_v0  ;;  %v4212_v9 = vadd.f32 %v1345_v63, %v1235_v42  ;;  %v4214_v7 = vadd.f32 %v1347_v3, %v1235_v42 }
 0x4d9   : > { %5430 = vst [vmem:[#allocation24_spill] sm:$0xff] %v4212_v9  ;;  %5431 = vst [vmem:[#allocation25_spill] sm:$0xff] %v4214_v7  ;;  %v5328_v33 = vmax.f32 %v4212_v9, 0.0  ;;  %v5330_v21 = vmax.f32 %v4214_v7, 0.0 }
 0x4dc   : > { %v1230_v59 = vpop.permute.xlu0 %1229 }
 0x4dd   : > { %v4216_v51 = vadd.f32 %v1341_v25, %v1230_v59  ;;  %v4218_v12 = vadd.f32 %v1343_v28, %v1230_v59  ;;  %v4252_v25 = vpop.f32.mrb[10].mxu1 }
 0x4de   : > { %3140 = vmatmul.mubr.msk.bf16.gmra.mrb[48].mxu0 %vm531_vm0, %v1435_v57  ;;  %5436 = vst [vmem:[#allocation30_spill] sm:$0xff] %v4252_v25  ;;  %v4254_v28 = vpop.f32.mrb[11].mxu1 }
 0x4df   : > { %5432 = vst [vmem:[#allocation26_spill] sm:$0xff] %v4216_v51  ;;  %5433 = vst [vmem:[#allocation27_spill] sm:$0xff] %v4218_v12  ;;  %v5329_v48 = vmax.f32 %v4216_v51, 0.0  ;;  %v5331_v19 = vmax.f32 %v4218_v12, 0.0  ;;  %1613 = vmatprep.mubr.bf16.mxu0 %v5425_v0 }
 0x4e0   : > { %5437 = vst [vmem:[#allocation31_spill] sm:$0xff] %v4254_v28 }
 0x4e1   : > { %v2312_v23 = vpack.c.bf16 %v5328_v33, %v5329_v48  ;;  %v2313_v5 = vpack.c.bf16 %v5330_v21, %v5331_v19 }
 0x4e3   : > { %2314 = vmatprep.subr.bf16.mxu1 %v2313_v5  ;;  %2346 = vmatprep.mubr.bf16.mxu1 %v2313_v5 }
 0x4e4   : > { %2315 = vmatpush1.bf16.xpose.msra.mxu1 %v2312_v23 }
 0x4e5   : > { %2381 = vmatprep.subr.bf16.mxu1 %v2313_v5 }
 0x4e6   : > { %3141 = vmatmul.mubr.msk.bf16.gmra.mrb[52].mxu0 %vm531_vm0, %v1436_v29 }
 0x4e7   : > { %1623 = vmatprep.mubr.bf16.mxu0 %v5425_v0 }
 0x4eb   : > { %2347 = vmatmul.mubr.bf16.vlgmr.msra.gmra.mrb[12].mxu1 %v2312_v23 }
 0x4ec   : > { %2382 = vmatpush1.bf16.msra.mxu1 %v2312_v23  ;;  %2413 = vmatprep.mubr.bf16.mxu1 %v5425_v0 }
 0x4ee   : > { %3142 = vmatmul.mubr.msk.bf16.gmra.mrb[56].mxu0 %vm531_vm0, %v1437_v54 }
 0x4ef   : > { %1633 = vmatprep.mubr.bf16.mxu0 %v5425_v0 }
 0x4f6   : > { %3143 = vmatmul.mubr.msk.bf16.gmra.mrb[60].mxu0 %vm531_vm0, %v1438_v62 }
 0x4f7   : > { %1643 = vmatprep.mubr.bf16.mxu0 %v5425_v0 }
 0x4fe   : > { %3144 = vmatmul.mubr.msk.bf16.gmra.mrb[64].mxu0 %vm531_vm0, %v1439_v43 }
 0x4ff   : > { %1653 = vmatprep.mubr.bf16.mxu0 %v5425_v0 }
 0x506   : > { %3145 = vmatmul.mubr.msk.bf16.gmra.mrb[68].mxu0 %vm531_vm0, %v1440_v60 }
 0x507   : > { %1663 = vmatprep.mubr.bf16.mxu0 %v5425_v0 }
 0x50e   : > { %3146 = vmatmul.mubr.msk.bf16.gmra.mrb[72].mxu0 %vm531_vm0, %v1441_v27 }
 0x50f   : > { %1673 = vmatprep.mubr.bf16.mxu0 %v5425_v0 }
 0x516   : > { %3147 = vmatmul.mubr.msk.bf16.gmra.mrb[76].mxu0 %vm531_vm0, %v1442_v52 }
 0x571   : > { %v4256_v63 = vpop.f32.mrb[16].mxu0 }
 0x572   : > { %v4258_v3 = vpop.f32.mrb[17].mxu0 }
 0x573   : > { %v1684_v32 = vmax.f32 %v4256_v63, %v4258_v3  ;;  %v4262_v34 = vpop.f32.mrb[18].mxu0 }
 0x574   : > { %v4264_v24 = vpop.f32.mrb[19].mxu0 }
 0x575   : > { %v1687_v47 = vmax.f32 %v4262_v34, %v4264_v24  ;;  %1685 = vmax.xlane.f32.xlu1 %v1684_v32 }
 0x577   : > { %1688 = vmax.xlane.f32.xlu0 %v1687_v47 }
 0x579   : > { %v4268_v53 = vpop.f32.mrb[20].mxu0 }
 0x57a   : > { %v4270_v41 = vpop.f32.mrb[21].mxu0 }
 0x57b   : > { %v1690_v56 = vmax.f32 %v4268_v53, %v4270_v41  ;;  %v4274_v13 = vpop.f32.mrb[22].mxu0 }
 0x57c   : > { %v4276_v57 = vpop.f32.mrb[23].mxu0 }
 0x57d   : > { %v1693_v29 = vmax.f32 %v4274_v13, %v4276_v57  ;;  %1691 = vmax.xlane.f32.xlu0 %v1690_v56 }
 0x57f   : > { %1694 = vmax.xlane.f32.xlu1 %v1693_v29 }
 0x581   : > { %v4280_v2 = vpop.f32.mrb[24].mxu0 }
 0x582   : > { %v4282_v54 = vpop.f32.mrb[25].mxu0 }
 0x583   : > { %v1696_v14 = vmax.f32 %v4280_v2, %v4282_v54  ;;  %v4286_v62 = vpop.f32.mrb[26].mxu0 }
 0x584   : > { %v4288_v30 = vpop.f32.mrb[27].mxu0 }
 0x585   : > { %v1699_v43 = vmax.f32 %v4286_v62, %v4288_v30  ;;  %1697 = vmax.xlane.f32.xlu0 %v1696_v14 }
 0x587   : > { %1700 = vmax.xlane.f32.xlu1 %v1699_v43 }
 0x589   : > { %v4292_v60 = vpop.f32.mrb[28].mxu0 }
 0x58a   : > { %v4294_v26 = vpop.f32.mrb[29].mxu0 }
 0x58b   : > { %v1702_v27 = vmax.f32 %v4292_v60, %v4294_v26  ;;  %v4298_v4 = vpop.f32.mrb[30].mxu0 }
 0x58c   : > { %v4300_v52 = vpop.f32.mrb[31].mxu0 }
 0x58d   : > { %v1705_v42 = vmax.f32 %v4298_v4, %v4300_v52  ;;  %1703 = vmax.xlane.f32.xlu0 %v1702_v27 }
 0x58f   : > { %1706 = vmax.xlane.f32.xlu1 %v1705_v42 }
 0x591   : > { %v4304_v59 = vpop.f32.mrb[32].mxu0 }
 0x592   : > { %v4306_v23 = vpop.f32.mrb[33].mxu0 }
 0x593   : > { %v1708_v5 = vmax.f32 %v4304_v59, %v4306_v23  ;;  %v4310_v32 = vpop.f32.mrb[34].mxu0 }
 0x594   : > { %v4312_v47 = vpop.f32.mrb[35].mxu0 }
 0x595   : > { %v1711_v56 = vmax.f32 %v4310_v32, %v4312_v47  ;;  %1709 = vmax.xlane.f32.xlu0 %v1708_v5 }
 0x597   : > { %1712 = vmax.xlane.f32.xlu1 %v1711_v56 }
 0x599   : > { %v4316_v29 = vpop.f32.mrb[36].mxu0 }
 0x59a   : > { %v4318_v14 = vpop.f32.mrb[37].mxu0 }
 0x59b   : > { %v1714_v43 = vmax.f32 %v4316_v29, %v4318_v14  ;;  %v4322_v27 = vpop.f32.mrb[38].mxu0 }
 0x59c   : > { %v4324_v42 = vpop.f32.mrb[39].mxu0 }
 0x59d   : > { %v1717_v20 = vmax.f32 %v4322_v27, %v4324_v42  ;;  %1715 = vmax.xlane.f32.xlu0 %v1714_v43 }
 0x59f   : > { %1718 = vmax.xlane.f32.xlu1 %v1717_v20 }
 0x5a1   : > { %v4328_v8 = vpop.f32.mrb[40].mxu0 }
 0x5a2   : > { %v4330_v5 = vpop.f32.mrb[41].mxu0 }
 0x5a3   : > { %v1720_v56 = vmax.f32 %v4328_v8, %v4330_v5  ;;  %v4334_v35 = vpop.f32.mrb[42].mxu0 }
 0x5a4   : > { %v4336_v61 = vpop.f32.mrb[43].mxu0 }
 0x5a5   : > { %v1723_v33 = vmax.f32 %v4334_v35, %v4336_v61  ;;  %1721 = vmax.xlane.f32.xlu0 %v1720_v56 }
 0x5a7   : > { %1724 = vmax.xlane.f32.xlu1 %v1723_v33 }
 0x5a9   : > { %v4340_v48 = vpop.f32.mrb[44].mxu0 }
 0x5aa   : > { %v4342_v43 = vpop.f32.mrb[45].mxu0 }
 0x5ab   : > { %v1726_v20 = vmax.f32 %v4340_v48, %v4342_v43  ;;  %v4346_v21 = vpop.f32.mrb[46].mxu0 }
 0x5ac   : > { %v4348_v19 = vpop.f32.mrb[47].mxu0 }
 0x5ad   : > { %v1729_v31 = vmax.f32 %v4346_v21, %v4348_v19  ;;  %1727 = vmax.xlane.f32.xlu0 %v1726_v20 }
 0x5af   : > { %1730 = vmax.xlane.f32.xlu1 %v1729_v31 }
 0x5b1   : > { %v4352_v6 = vpop.f32.mrb[48].mxu0 }
 0x5b2   : > { %v4354_v56 = vpop.f32.mrb[49].mxu0 }
 0x5b3   : > { %5438 = vst [vmem:[#allocation32_spill] sm:$0xff] %v4354_v56  ;;  %v1732_v33 = vmax.f32 %v4352_v6, %v4354_v56  ;;  %v4358_v10 = vpop.f32.mrb[50].mxu0 }
 0x5b4   : > { %5439 = vst [vmem:[#allocation33_spill] sm:$0xff] %v4358_v10  ;;  %v4360_v1 = vpop.f32.mrb[51].mxu0 }
 0x5b5   : > { %5440 = vst [vmem:[#allocation34_spill] sm:$0xff] %v4360_v1  ;;  %v1735_v50 = vmax.f32 %v4358_v10, %v4360_v1  ;;  %1733 = vmax.xlane.f32.xlu0 %v1732_v33 }
 0x5b7   : > { %1736 = vmax.xlane.f32.xlu1 %v1735_v50 }
 0x5b9   : > { %v4364_v49 = vpop.f32.mrb[52].mxu0 }
 0x5ba   : > { %5441 = vst [vmem:[#allocation35_spill] sm:$0xff] %v4364_v49  ;;  %v4366_v20 = vpop.f32.mrb[53].mxu0 }
 0x5bb   : > { %5442 = vst [vmem:[#allocation36_spill] sm:$0xff] %v4366_v20  ;;  %v1738_v31 = vmax.f32 %v4364_v49, %v4366_v20  ;;  %v4370_v46 = vpop.f32.mrb[54].mxu0 }
 0x5bc   : > { %5443 = vst [vmem:[#allocation37_spill] sm:$0xff] %v4370_v46  ;;  %v4372_v45 = vpop.f32.mrb[55].mxu0 }
 0x5bd   : > { %5444 = vst [vmem:[#allocation38_spill] sm:$0xff] %v4372_v45  ;;  %v1741_v39 = vmax.f32 %v4370_v46, %v4372_v45  ;;  %1739 = vmax.xlane.f32.xlu0 %v1738_v31 }
 0x5be   : > { %v4376_v40 = vpop.f32.mrb[12].mxu1 }
 0x5bf   : > { %1742 = vmax.xlane.f32.xlu1 %v1741_v39  ;;  %v2350_v33 = vpop.f32.mrb[13].mxu1 }
 0x5c0   : > { %v4378_v50 = vpop.f32.mrb[14].mxu1 }
 0x5c1   : > { %v4380_v37 = vpop.f32.mrb[56].mxu0  ;;  %v2353_v38 = vpop.f32.mrb[15].mxu1 }
 0x5c2   : > { %5445 = vst [vmem:[#allocation39_spill] sm:$0xff] %v4380_v37  ;;  %v4382_v18 = vpop.f32.mrb[57].mxu0 }
 0x5c3   : > { %5446 = vst [vmem:[#allocation40_spill] sm:$0xff] %v4382_v18  ;;  %v1744_v16 = vmax.f32 %v4380_v37, %v4382_v18  ;;  %v4386_v17 = vpop.f32.mrb[58].mxu0 }
 0x5c4   : > { %5447 = vst [vmem:[#allocation41_spill] sm:$0xff] %v4386_v17  ;;  %v4388_v15 = vpop.f32.mrb[59].mxu0 }
 0x5c5   : > { %5448 = vst [vmem:[#allocation42_spill] sm:$0xff] %v4388_v15  ;;  %v1747_v31 = vmax.f32 %v4386_v17, %v4388_v15  ;;  %1745 = vmax.xlane.f32.xlu0 %v1744_v16 }
 0x5c7   : > { %1748 = vmax.xlane.f32.xlu1 %v1747_v31 }
 0x5c9   : > { %v4392_v39 = vpop.f32.mrb[60].mxu0 }
 0x5ca   : > { %5449 = vst [vmem:[#allocation43_spill] sm:$0xff] %v4392_v39  ;;  %v4394_v33 = vpop.f32.mrb[61].mxu0 }
 0x5cb   : > { %5450 = vst [vmem:[#allocation44_spill] sm:$0xff] %v4394_v33  ;;  %v1750_v38 = vmax.f32 %v4392_v39, %v4394_v33  ;;  %v4398_v36 = vpop.f32.mrb[62].mxu0 }
 0x5cc   : > { %5451 = vst [vmem:[#allocation45_spill] sm:$0xff] %v4398_v36  ;;  %v4400_v55 = vpop.f32.mrb[63].mxu0 }
 0x5cd   : > { %5452 = vst [vmem:[#allocation46_spill] sm:$0xff] %v4400_v55  ;;  %v1753_v44 = vmax.f32 %v4398_v36, %v4400_v55  ;;  %1751 = vmax.xlane.f32.xlu0 %v1750_v38 }
 0x5cf   : > { %1754 = vmax.xlane.f32.xlu1 %v1753_v44 }
 0x5d1   : > { %v4404_v58 = vpop.f32.mrb[64].mxu0 }
 0x5d2   : > { %v4406_v16 = vpop.f32.mrb[65].mxu0 }
 0x5d3   : > { %v4410_v9 = vpop.f32.mrb[66].mxu0 }
 0x5d4   : > { %v4412_v51 = vpop.f32.mrb[67].mxu0 }
 0x5d9   : > { %v4416_v12 = vpop.f32.mrb[68].mxu0 }
 0x5da   : > { %v4418_v0 = vpop.f32.mrb[69].mxu0 }
 0x5db   : > { %v4422_v38 = vpop.f32.mrb[70].mxu0 }
 0x5dc   : > { %v4424_v28 = vpop.f32.mrb[71].mxu0 }
 0x5e1   : > { %v4428_v25 = vpop.f32.mrb[72].mxu0 }
 0x5e2   : > { %v4430_v11 = vpop.f32.mrb[73].mxu0 }
 0x5e3   : > { %v4434_v22 = vpop.f32.mrb[74].mxu0 }
 0x5e4   : > { %v4436_v55 = vpop.f32.mrb[75].mxu0 }
 0x5e9   : > { %v4440_v36 = vpop.f32.mrb[76].mxu0 }
 0x5ea   : > { %v4442_v33 = vpop.f32.mrb[77].mxu0 }
 0x5eb   : > { %v4446_v39 = vpop.f32.mrb[78].mxu0 }
 0x5ec   : > { %v4448_v15 = vpop.f32.mrb[79].mxu0 }
 0x602   : > { %v1686_v17 = vpop.xlane.xlu1 %1685 }
 0x603   : > { %v1780_v18 = vsub.f32 %v4256_v63, %v1686_v17  ;;  %v1781_v37 = vsub.f32 %v4258_v3, %v1686_v17 }
 0x604   : > { %v1689_v44 = vpop.xlane.xlu0 %1688 }
 0x605   : > { %v1844_v45 = vmul.f32 1.442695, %v1780_v18  ;;  %v1846_v46 = vmul.f32 1.442695, %v1781_v37  ;;  %v1782_v20 = vsub.f32 %v4262_v34, %v1689_v44  ;;  %v1783_v49 = vsub.f32 %v4264_v24, %v1689_v44 }
 0x607   : > { %3212 = vpow2.f32 %v1844_v45  ;;  %v1848_v31 = vmul.f32 1.442695, %v1782_v20  ;;  %v1850_v1 = vmul.f32 1.442695, %v1783_v49 }
 0x608   : > { %3214 = vpow2.f32 %v1846_v46 }
 0x609   : > { %3216 = vpow2.f32 %v1848_v31 }
 0x60a   : > { %3218 = vpow2.f32 %v1850_v1  ;;  %v1692_v10 = vpop.xlane.xlu0 %1691 }
 0x60b   : > { %v1784_v7 = vsub.f32 %v4268_v53, %v1692_v10  ;;  %v1785_v63 = vsub.f32 %v4270_v41, %v1692_v10 }
 0x60c   : > { %v1695_v56 = vpop.xlane.xlu1 %1694 }
 0x60d   : > { %v1852_v17 = vmul.f32 1.442695, %v1784_v7  ;;  %v1854_v3 = vmul.f32 1.442695, %v1785_v63  ;;  %v1786_v18 = vsub.f32 %v4274_v13, %v1695_v56  ;;  %v1787_v37 = vsub.f32 %v4276_v57, %v1695_v56 }
 0x60f   : > { %3220 = vpow2.f32 %v1852_v17  ;;  %v1856_v34 = vmul.f32 1.442695, %v1786_v18  ;;  %v1858_v45 = vmul.f32 1.442695, %v1787_v37  ;;  %v5453_v17 = vmax.f32 %v4404_v58, %v4406_v16 }
 0x610   : > { %3222 = vpow2.f32 %v1854_v3 }
 0x611   : > { %v4460_v49 = vpop.eup %3212  ;;  %3224 = vpow2.f32 %v1856_v34 }
 0x612   : > { %v4462_v46 = vpop.eup %3214  ;;  %3226 = vpow2.f32 %v1858_v45  ;;  %v1698_v1 = vpop.xlane.xlu0 %1697 }
 0x613   : > { %v4464_v24 = vpop.eup %3216  ;;  %v1788_v10 = vsub.f32 %v4280_v2, %v1698_v1  ;;  %v1789_v7 = vsub.f32 %v4282_v54, %v1698_v1  ;;  %v1972_v53 = vadd.f32 %v4462_v46, %v4460_v49  ;;  %v5454_v1 = vmax.f32 %v4410_v9, %v4412_v51 }
 0x614   : > { %v4470_v41 = vpop.eup %3218  ;;  %v1701_v13 = vpop.xlane.xlu1 %1700 }
 0x615   : > { %v1860_v57 = vmul.f32 1.442695, %v1788_v10  ;;  %v1862_v56 = vmul.f32 1.442695, %v1789_v7  ;;  %v1790_v20 = vsub.f32 %v4286_v62, %v1701_v13  ;;  %v1791_v31 = vsub.f32 %v4288_v30, %v1701_v13  ;;  %1973 = vadd.xlane.f32.xlu0 %v1972_v53 }
 0x616   : > { %v1975_v44 = vadd.f32 %v4470_v41, %v4464_v24 }
 0x617   : > { %3228 = vpow2.f32 %v1860_v57  ;;  %v1864_v2 = vmul.f32 1.442695, %v1790_v20  ;;  %v1866_v63 = vmul.f32 1.442695, %v1791_v31  ;;  %v5455_v31 = vmax.f32 %v4416_v12, %v4418_v0 }
 0x618   : > { %3230 = vpow2.f32 %v1862_v56  ;;  %1976 = vadd.xlane.f32.xlu1 %v1975_v44 }
 0x619   : > { %v4476_v54 = vpop.eup %3220  ;;  %3232 = vpow2.f32 %v1864_v2  ;;  %1757 = vmax.xlane.f32.xlu0 %v5453_v17 }
 0x61a   : > { %v4481_v3 = vpop.eup %3222  ;;  %3234 = vpow2.f32 %v1866_v63  ;;  %v1704_v62 = vpop.xlane.xlu0 %1703 }
 0x61b   : > { %v4483_v30 = vpop.eup %3224  ;;  %v1792_v18 = vsub.f32 %v4292_v60, %v1704_v62  ;;  %v1793_v37 = vsub.f32 %v4294_v26, %v1704_v62  ;;  %v1978_v34 = vadd.f32 %v4481_v3, %v4476_v54 }
 0x61c   : > { %v4489_v45 = vpop.eup %3226  ;;  %1760 = vmax.xlane.f32.xlu1 %v5454_v1  ;;  %v1707_v10 = vpop.xlane.xlu1 %1706 }
 0x61d   : > { %v1868_v7 = vmul.f32 1.442695, %v1792_v18  ;;  %v1870_v53 = vmul.f32 1.442695, %v1793_v37  ;;  %v1794_v13 = vsub.f32 %v4298_v4, %v1707_v10  ;;  %v1795_v57 = vsub.f32 %v4300_v52, %v1707_v10  ;;  %1979 = vadd.xlane.f32.xlu0 %v1978_v34 }
 0x61e   : > { %v1981_v60 = vadd.f32 %v4489_v45, %v4483_v30  ;;  %v5456_v18 = vmax.f32 %v4422_v38, %v4424_v28 }
 0x61f   : > { %3236 = vpow2.f32 %v1868_v7  ;;  %v1872_v26 = vmul.f32 1.442695, %v1794_v13  ;;  %v1874_v56 = vmul.f32 1.442695, %v1795_v57  ;;  %v5457_v57 = vmax.f32 %v4428_v25, %v4430_v11 }
 0x620   : > { %3238 = vpow2.f32 %v1870_v53  ;;  %1982 = vadd.xlane.f32.xlu1 %v1981_v60 }
 0x621   : > { %v4498_v20 = vpop.eup %3228  ;;  %3240 = vpow2.f32 %v1872_v26  ;;  %1763 = vmax.xlane.f32.xlu0 %v5455_v31 }
 0x622   : > { %v4503_v44 = vpop.eup %3230  ;;  %3242 = vpow2.f32 %v1874_v56  ;;  %v1710_v4 = vpop.xlane.xlu0 %1709 }
 0x623   : > { %v4505_v52 = vpop.eup %3232  ;;  %v1796_v2 = vsub.f32 %v4304_v59, %v1710_v4  ;;  %v1797_v63 = vsub.f32 %v4306_v23, %v1710_v4  ;;  %v1984_v17 = vadd.f32 %v4503_v44, %v4498_v20 }
 0x624   : > { %v4511_v62 = vpop.eup %3234  ;;  %1766 = vmax.xlane.f32.xlu1 %v5456_v18  ;;  %v1713_v37 = vpop.xlane.xlu1 %1712 }
 0x625   : > { %v1876_v34 = vmul.f32 1.442695, %v1796_v2  ;;  %v1878_v1 = vmul.f32 1.442695, %v1797_v63  ;;  %v1798_v10 = vsub.f32 %v4310_v32, %v1713_v37  ;;  %v1799_v7 = vsub.f32 %v4312_v47, %v1713_v37  ;;  %1985 = vadd.xlane.f32.xlu0 %v1984_v17 }
 0x626   : > { %v1987_v59 = vadd.f32 %v4511_v62, %v4505_v52  ;;  %v5458_v2 = vmax.f32 %v4434_v22, %v4436_v55 }
 0x627   : > { %3244 = vpow2.f32 %v1876_v34  ;;  %v1880_v23 = vmul.f32 1.442695, %v1798_v10  ;;  %v1882_v53 = vmul.f32 1.442695, %v1799_v7  ;;  %v5459_v7 = vmax.f32 %v4440_v36, %v4442_v33 }
 0x628   : > { %3246 = vpow2.f32 %v1878_v1  ;;  %1988 = vadd.xlane.f32.xlu1 %v1987_v59 }
 0x629   : > { %v4520_v13 = vpop.eup %3236  ;;  %3248 = vpow2.f32 %v1880_v23  ;;  %1769 = vmax.xlane.f32.xlu0 %v5457_v57 }
 0x62a   : > { %v4525_v60 = vpop.eup %3238  ;;  %3250 = vpow2.f32 %v1882_v53  ;;  %v1716_v32 = vpop.xlane.xlu0 %1715 }
 0x62b   : > { %v4527_v47 = vpop.eup %3240  ;;  %v1800_v26 = vsub.f32 %v4316_v29, %v1716_v32  ;;  %v1801_v56 = vsub.f32 %v4318_v14, %v1716_v32  ;;  %v1990_v31 = vadd.f32 %v4525_v60, %v4520_v13 }
 0x62c   : > { %v4533_v4 = vpop.eup %3242  ;;  %1772 = vmax.xlane.f32.xlu1 %v5458_v2  ;;  %v1719_v63 = vpop.xlane.xlu1 %1718 }
 0x62d   : > { %v1884_v17 = vmul.f32 1.442695, %v1800_v26  ;;  %v1886_v18 = vmul.f32 1.442695, %v1801_v56  ;;  %v1802_v37 = vsub.f32 %v4322_v27, %v1719_v63  ;;  %v1803_v34 = vsub.f32 %v4324_v42, %v1719_v63  ;;  %1991 = vadd.xlane.f32.xlu0 %v1990_v31 }
 0x62e   : > { %v1993_v29 = vadd.f32 %v4533_v4, %v4527_v47  ;;  %v5460_v26 = vmax.f32 %v4446_v39, %v4448_v15 }
 0x62f   : > { %3252 = vpow2.f32 %v1884_v17  ;;  %v1888_v14 = vmul.f32 1.442695, %v1802_v37  ;;  %v1890_v1 = vmul.f32 1.442695, %v1803_v34 }
 0x630   : > { %3254 = vpow2.f32 %v1886_v18  ;;  %1994 = vadd.xlane.f32.xlu1 %v1993_v29 }
 0x631   : > { %v4542_v10 = vpop.eup %3244  ;;  %3256 = vpow2.f32 %v1888_v14  ;;  %1775 = vmax.xlane.f32.xlu0 %v5459_v7 }
 0x632   : > { %v4547_v59 = vpop.eup %3246  ;;  %3258 = vpow2.f32 %v1890_v1  ;;  %v1722_v27 = vpop.xlane.xlu0 %1721 }
 0x633   : > { %v4549_v42 = vpop.eup %3248  ;;  %v1804_v23 = vsub.f32 %v4328_v8, %v1722_v27  ;;  %v1805_v53 = vsub.f32 %v4330_v5, %v1722_v27  ;;  %v1996_v57 = vadd.f32 %v4547_v59, %v4542_v10 }
 0x634   : > { %v4555_v32 = vpop.eup %3250  ;;  %1778 = vmax.xlane.f32.xlu1 %v5460_v26  ;;  %v1725_v56 = vpop.xlane.xlu1 %1724 }
 0x635   : > { %v1892_v31 = vmul.f32 1.442695, %v1804_v23  ;;  %v1894_v2 = vmul.f32 1.442695, %v1805_v53  ;;  %v1806_v63 = vsub.f32 %v4334_v35, %v1725_v56  ;;  %v1807_v17 = vsub.f32 %v4336_v61, %v1725_v56  ;;  %1997 = vadd.xlane.f32.xlu0 %v1996_v57 }
 0x636   : > { %v1999_v8 = vadd.f32 %v4555_v32, %v4549_v42 }
 0x637   : > { %3260 = vpow2.f32 %v1892_v31  ;;  %v1896_v5 = vmul.f32 1.442695, %v1806_v63  ;;  %v1898_v18 = vmul.f32 1.442695, %v1807_v17  ;;  %v2358_v17 = vsel %vm531_vm0, %v4378_v50, inf }
 0x638   : > { %3262 = vpow2.f32 %v1894_v2  ;;  %2000 = vadd.xlane.f32.xlu1 %v1999_v8 }
 0x639   : > { %v4564_v37 = vpop.eup %3252  ;;  %3264 = vpow2.f32 %v1896_v5  ;;  %v5462_v5 = vld [vmem:[#allocation32_spill] sm:$0xff] }
 0x63a   : > { %v4566_v34 = vpop.eup %3254  ;;  %3266 = vpow2.f32 %v1898_v18  ;;  %v1728_v29 = vpop.xlane.xlu0 %1727 }
 0x63b   : > { %v4568_v14 = vpop.eup %3256  ;;  %v1808_v35 = vsub.f32 %v4340_v48, %v1728_v29  ;;  %v1809_v61 = vsub.f32 %v4342_v43, %v1728_v29  ;;  %v2002_v1 = vadd.f32 %v4566_v34, %v4564_v37  ;;  %v2355_v43 = vsel %vm531_vm0, %v4376_v40, inf }
 0x63c   : > { %v4574_v7 = vpop.eup %3258  ;;  %v1731_v27 = vpop.xlane.xlu1 %1730 }
 0x63d   : > { %v1900_v23 = vmul.f32 1.442695, %v1808_v35  ;;  %v1902_v53 = vmul.f32 1.442695, %v1809_v61  ;;  %v1810_v57 = vsub.f32 %v4346_v21, %v1731_v27  ;;  %v1811_v26 = vsub.f32 %v4348_v19, %v1731_v27  ;;  %2003 = vadd.xlane.f32.xlu0 %v2002_v1 }
 0x63e   : > { %v2005_v56 = vadd.f32 %v4574_v7, %v4568_v14 }
 0x63f   : > { %3268 = vpow2.f32 %v1900_v23  ;;  %v1904_v48 = vmul.f32 1.442695, %v1810_v57  ;;  %v1906_v31 = vmul.f32 1.442695, %v1811_v26  ;;  %v5463_v23 = vld [vmem:[#allocation33_spill] sm:$0xff]  ;;  %v5464_v57 = vld [vmem:[#allocation34_spill] sm:$0xff] }
 0x640   : > { %3270 = vpow2.f32 %v1902_v53  ;;  %2006 = vadd.xlane.f32.xlu1 %v2005_v56 }
 0x641   : > { %v4582_v2 = vpop.eup %3260  ;;  %3272 = vpow2.f32 %v1904_v48  ;;  %2356 = vmin.xlane.f32.xlu0 %v2355_v43 }
 0x642   : > { %v4584_v63 = vpop.eup %3262  ;;  %3274 = vpow2.f32 %v1906_v31  ;;  %v1734_v21 = vpop.xlane.xlu0 %1733 }
 0x643   : > { %v4586_v19 = vpop.eup %3264  ;;  %v1812_v8 = vsub.f32 %v4352_v6, %v1734_v21  ;;  %v1813_v18 = vsub.f32 %v5462_v5, %v1734_v21  ;;  %v2008_v29 = vadd.f32 %v4584_v63, %v4582_v2 }
 0x644   : > { %5461 = vst [vmem:[#allocation47_spill] sm:$0xff] %v4586_v19  ;;  %v4594_v35 = vpop.eup %3266  ;;  %2359 = vmin.xlane.f32.xlu1 %v2358_v17  ;;  %v1737_v61 = vpop.xlane.xlu1 %1736 }
 0x645   : > { %v1908_v1 = vmul.f32 1.442695, %v1812_v8  ;;  %v1910_v27 = vmul.f32 1.442695, %v1813_v18  ;;  %v1814_v53 = vsub.f32 %v5463_v23, %v1737_v61  ;;  %v1815_v26 = vsub.f32 %v5464_v57, %v1737_v61  ;;  %2009 = vadd.xlane.f32.xlu0 %v2008_v29  ;;  %v5468_v8 = vld [vmem:[#allocation35_spill] sm:$0xff]  ;;  %v5469_v18 = vld [vmem:[#allocation36_spill] sm:$0xff] }
 0x646   : > { %v2011_v56 = vadd.f32 %v4594_v35, %v4586_v19  ;;  %v5471_v57 = vld [vmem:[#allocation37_spill] sm:$0xff] }
 0x647   : > { %3276 = vpow2.f32 %v1908_v1  ;;  %v1912_v6 = vmul.f32 1.442695, %v1814_v53  ;;  %v1914_v48 = vmul.f32 1.442695, %v1815_v26 }
 0x648   : > { %3278 = vpow2.f32 %v1910_v27  ;;  %2012 = vadd.xlane.f32.xlu1 %v2011_v56  ;;  %v5472_v56 = vld [vmem:[#allocation38_spill] sm:$0xff] }
 0x649   : > { %v4600_v31 = vpop.eup %3268  ;;  %3280 = vpow2.f32 %v1912_v6 }
 0x64a   : > { %5465 = vst [vmem:[#allocation32_spill] sm:$0xff] %v4600_v31  ;;  %v4602_v43 = vpop.eup %3270  ;;  %3282 = vpow2.f32 %v1914_v48  ;;  %v1740_v21 = vpop.xlane.xlu0 %1739 }
 0x64b   : > { %5466 = vst [vmem:[#allocation33_spill] sm:$0xff] %v4602_v43  ;;  %v4604_v17 = vpop.eup %3272  ;;  %v1816_v5 = vsub.f32 %v5468_v8, %v1740_v21  ;;  %v1817_v29 = vsub.f32 %v5469_v18, %v1740_v21  ;;  %v2014_v61 = vadd.f32 %v4602_v43, %v4600_v31  ;;  %v5479_v31 = vld [vmem:[#allocation41_spill] sm:$0xff] }
 0x64c   : > { %5467 = vst [vmem:[#allocation34_spill] sm:$0xff] %v4604_v17  ;;  %v4610_v1 = vpop.eup %3274  ;;  %v1743_v27 = vpop.xlane.xlu1 %1742 }
 0x64d   : > { %5470 = vst [vmem:[#allocation35_spill] sm:$0xff] %v4610_v1  ;;  %v1916_v23 = vmul.f32 1.442695, %v1816_v5  ;;  %v1918_v53 = vmul.f32 1.442695, %v1817_v29  ;;  %v1818_v26 = vsub.f32 %v5471_v57, %v1743_v27  ;;  %v1819_v6 = vsub.f32 %v5472_v56, %v1743_v27  ;;  %2015 = vadd.xlane.f32.xlu0 %v2014_v61  ;;  %v5476_v57 = vld [vmem:[#allocation39_spill] sm:$0xff] }
 0x64e   : > { %v2017_v48 = vadd.f32 %v4610_v1, %v4604_v17  ;;  %v5477_v61 = vld [vmem:[#allocation40_spill] sm:$0xff]  ;;  %v5480_v17 = vld [vmem:[#allocation42_spill] sm:$0xff] }
 0x64f   : > { %3284 = vpow2.f32 %v1916_v23  ;;  %v1920_v8 = vmul.f32 1.442695, %v1818_v26  ;;  %v1922_v19 = vmul.f32 1.442695, %v1819_v6 }
 0x650   : > { %3286 = vpow2.f32 %v1918_v53  ;;  %2018 = vadd.xlane.f32.xlu1 %v2017_v48 }
 0x651   : > { %v4616_v21 = vpop.eup %3276  ;;  %3288 = vpow2.f32 %v1920_v8 }
 0x652   : > { %5473 = vst [vmem:[#allocation36_spill] sm:$0xff] %v4616_v21  ;;  %v4618_v18 = vpop.eup %3278  ;;  %3290 = vpow2.f32 %v1922_v19  ;;  %v1746_v5 = vpop.xlane.xlu0 %1745 }
 0x653   : > { %5474 = vst [vmem:[#allocation37_spill] sm:$0xff] %v4618_v18  ;;  %v4620_v29 = vpop.eup %3280  ;;  %v1820_v27 = vsub.f32 %v5476_v57, %v1746_v5  ;;  %v1821_v56 = vsub.f32 %v5477_v61, %v1746_v5  ;;  %v2020_v23 = vadd.f32 %v4618_v18, %v4616_v21  ;;  %v5483_v21 = vld [vmem:[#allocation45_spill] sm:$0xff] }
 0x654   : > { %5475 = vst [vmem:[#allocation38_spill] sm:$0xff] %v4620_v29  ;;  %v4626_v26 = vpop.eup %3282  ;;  %v1749_v53 = vpop.xlane.xlu1 %1748 }
 0x655   : > { %5478 = vst [vmem:[#allocation39_spill] sm:$0xff] %v4626_v26  ;;  %v1924_v6 = vmul.f32 1.442695, %v1820_v27  ;;  %v1926_v48 = vmul.f32 1.442695, %v1821_v56  ;;  %v1822_v8 = vsub.f32 %v5479_v31, %v1749_v53  ;;  %v1823_v1 = vsub.f32 %v5480_v17, %v1749_v53  ;;  %2021 = vadd.xlane.f32.xlu0 %v2020_v23  ;;  %v5481_v31 = vld [vmem:[#allocation43_spill] sm:$0xff] }
 0x656   : > { %v2023_v19 = vadd.f32 %v4626_v26, %v4620_v29  ;;  %v5482_v23 = vld [vmem:[#allocation44_spill] sm:$0xff]  ;;  %v5484_v29 = vld [vmem:[#allocation46_spill] sm:$0xff] }
 0x657   : > { %3292 = vpow2.f32 %v1924_v6  ;;  %v1928_v57 = vmul.f32 1.442695, %v1822_v8  ;;  %v1930_v43 = vmul.f32 1.442695, %v1823_v1 }
 0x658   : > { %3294 = vpow2.f32 %v1926_v48  ;;  %2024 = vadd.xlane.f32.xlu1 %v2023_v19 }
 0x659   : > { %v4632_v5 = vpop.eup %3284  ;;  %3296 = vpow2.f32 %v1928_v57 }
 0x65a   : > { %v4634_v61 = vpop.eup %3286  ;;  %3298 = vpow2.f32 %v1930_v43  ;;  %v1752_v27 = vpop.xlane.xlu0 %1751 }
 0x65b   : > { %v4636_v56 = vpop.eup %3288  ;;  %v1824_v17 = vsub.f32 %v5481_v31, %v1752_v27  ;;  %v1825_v53 = vsub.f32 %v5482_v23, %v1752_v27  ;;  %v2026_v6 = vadd.f32 %v4634_v61, %v4632_v5 }
 0x65c   : > { %v4642_v8 = vpop.eup %3290  ;;  %v1755_v1 = vpop.xlane.xlu1 %1754 }
 0x65d   : > { %v1932_v48 = vmul.f32 1.442695, %v1824_v17  ;;  %v1934_v19 = vmul.f32 1.442695, %v1825_v53  ;;  %v1826_v57 = vsub.f32 %v5483_v21, %v1755_v1  ;;  %v1827_v26 = vsub.f32 %v5484_v29, %v1755_v1  ;;  %2027 = vadd.xlane.f32.xlu0 %v2026_v6 }
 0x65e   : > { %v2029_v43 = vadd.f32 %v4642_v8, %v4636_v56 }
 0x65f   : > { %3300 = vpow2.f32 %v1932_v48  ;;  %v1936_v31 = vmul.f32 1.442695, %v1826_v57  ;;  %v1938_v18 = vmul.f32 1.442695, %v1827_v26 }
 0x660   : > { %3302 = vpow2.f32 %v1934_v19  ;;  %2030 = vadd.xlane.f32.xlu1 %v2029_v43 }
 0x661   : > { %v4648_v27 = vpop.eup %3292  ;;  %3304 = vpow2.f32 %v1936_v31 }
 0x662   : > { %5485 = vst [vmem:[#allocation40_spill] sm:$0xff] %v4648_v27  ;;  %v4650_v23 = vpop.eup %3294  ;;  %3306 = vpow2.f32 %v1938_v18 }
 0x663   : > { %v4652_v17 = vpop.eup %3296  ;;  %v2032_v21 = vadd.f32 %v4650_v23, %v4648_v27 }
 0x664   : > { %5486 = vst [vmem:[#allocation41_spill] sm:$0xff] %v4652_v17  ;;  %v4656_v29 = vpop.eup %3298 }
 0x665   : > { %5487 = vst [vmem:[#allocation42_spill] sm:$0xff] %v4656_v29  ;;  %2033 = vadd.xlane.f32.xlu0 %v2032_v21  ;;  %v2035_v53 = vadd.f32 %v4656_v29, %v4652_v17 }
 0x667   : > { %2036 = vadd.xlane.f32.xlu1 %v2035_v53 }
 0x669   : > { %v4660_v26 = vpop.eup %3300 }
 0x66a   : > { %5488 = vst [vmem:[#allocation43_spill] sm:$0xff] %v4660_v26  ;;  %v4662_v6 = vpop.eup %3302 }
 0x66b   : > { %5489 = vst [vmem:[#allocation44_spill] sm:$0xff] %v4662_v6  ;;  %v4664_v1 = vpop.eup %3304  ;;  %v2038_v18 = vadd.f32 %v4662_v6, %v4660_v26 }
 0x66c   : > { %5490 = vst [vmem:[#allocation45_spill] sm:$0xff] %v4664_v1  ;;  %v4668_v48 = vpop.eup %3306 }
 0x66d   : > { %5491 = vst [vmem:[#allocation46_spill] sm:$0xff] %v4668_v48  ;;  %2039 = vadd.xlane.f32.xlu0 %v2038_v18  ;;  %v2041_v19 = vadd.f32 %v4668_v48, %v4664_v1 }
 0x66f   : > { %2042 = vadd.xlane.f32.xlu1 %v2041_v19 }
 0x6a2   : > { %v1974_v57 = vpop.xlane.xlu0 %1973 }
 0x6a3   : > { %3308 = vrcp.f32 %v1974_v57 }
 0x6a5   : > { %v1977_v43 = vpop.xlane.xlu1 %1976 }
 0x6a6   : > { %3310 = vrcp.f32 %v1977_v43  ;;  %v1758_v31 = vpop.xlane.xlu0 %1757 }
 0x6a7   : > { %v1828_v21 = vsub.f32 %v4404_v58, %v1758_v31  ;;  %v1829_v53 = vsub.f32 %v4406_v16, %v1758_v31 }
 0x6a9   : > { %v1940_v27 = vmul.f32 1.442695, %v1828_v21  ;;  %v1942_v17 = vmul.f32 1.442695, %v1829_v53  ;;  %v1761_v29 = vpop.xlane.xlu1 %1760 }
 0x6aa   : > { %v1830_v26 = vsub.f32 %v4410_v9, %v1761_v29  ;;  %v1831_v18 = vsub.f32 %v4412_v51, %v1761_v29  ;;  %v1980_v6 = vpop.xlane.xlu0 %1979 }
 0x6ab   : > { %3312 = vpow2.f32 %v1940_v27 }
 0x6ac   : > { %3314 = vpow2.f32 %v1942_v17  ;;  %v1944_v19 = vmul.f32 1.442695, %v1830_v26  ;;  %v1946_v1 = vmul.f32 1.442695, %v1831_v18 }
 0x6ad   : > { %v3309_v57 = vpop.eup %3308  ;;  %3316 = vrcp.f32 %v1980_v6  ;;  %v1983_v43 = vpop.xlane.xlu1 %1982 }
 0x6ae   : > { %3318 = vpow2.f32 %v1944_v19  ;;  %v1764_v48 = vpop.xlane.xlu0 %1763  ;;  %v2101_v9 = vmul.f32 %v3309_v57, %v4462_v46  ;;  %v2100_v51 = vmul.f32 %v3309_v57, %v4460_v49 }
 0x6af   : > { %3320 = vpow2.f32 %v1946_v1  ;;  %v1832_v58 = vsub.f32 %v4416_v12, %v1764_v48  ;;  %v1833_v16 = vsub.f32 %v4418_v0, %v1764_v48 }
 0x6b0   : > { %v3311_v31 = vpop.eup %3310  ;;  %3322 = vrcp.f32 %v1983_v43 }
 0x6b1   : > { %v1948_v27 = vmul.f32 1.442695, %v1832_v58  ;;  %v1950_v17 = vmul.f32 1.442695, %v1833_v16  ;;  %v4680_v29 = vpop.xlane.xlu1 %1766  ;;  %v2103_v26 = vmul.f32 %v3311_v31, %v4470_v41  ;;  %v2102_v6 = vmul.f32 %v3311_v31, %v4464_v24 }
 0x6b2   : > { %v1986_v21 = vpop.xlane.xlu0 %1985 }
 0x6b3   : > { %3324 = vpow2.f32 %v1948_v27  ;;  %v2228_v1 = vpack.c.bf16 %v2103_v26, %v2101_v9  ;;  %v2227_v12 = vpack.c.bf16 %v2102_v6, %v2100_v51 }
 0x6b4   : > { %3326 = vpow2.f32 %v1950_v17 }
 0x6b5   : > { %v4684_v0 = vpop.eup %3312  ;;  %v1989_v48 = vpop.xlane.xlu1 %1988  ;;  %2259 = vmatprep.subr.bf16.mxu0 %v2228_v1  ;;  %3328 = vrcp.f32 %v1986_v21 }
 0x6b6   : > { %v4686_v46 = vpop.eup %3314  ;;  %2260 = vmatpush1.bf16.xpose.msra.mxu0 %v2227_v12  ;;  %v1770_v49 = vpop.xlane.xlu0 %1769  ;;  %3330 = vrcp.f32 %v1989_v48 }
 0x6b7   : > { %v3317_v53 = vpop.eup %3316  ;;  %v2044_v41 = vadd.f32 %v4686_v46, %v4684_v0 }
 0x6b8   : > { %v4690_v18 = vpop.eup %3318  ;;  %v2105_v16 = vmul.f32 %v3317_v53, %v4481_v3  ;;  %v2104_v9 = vmul.f32 %v3317_v53, %v4476_v54 }
 0x6b9   : > { %v4692_v24 = vpop.eup %3320  ;;  %v4694_v19 = vpop.xlane.xlu1 %1772  ;;  %2045 = vadd.xlane.f32.xlu0 %v2044_v41 }
 0x6ba   : > { %v3323_v57 = vpop.eup %3322  ;;  %v2047_v43 = vadd.f32 %v4692_v24, %v4690_v18  ;;  %v1992_v58 = vpop.xlane.xlu0 %1991 }
 0x6bb   : > { %v2107_v31 = vmul.f32 %v3323_v57, %v4489_v45  ;;  %v2106_v51 = vmul.f32 %v3323_v57, %v4483_v30  ;;  %3332 = vrcp.f32 %v1992_v58 }
 0x6bc   : > { %2048 = vadd.xlane.f32.xlu1 %v2047_v43 }
 0x6bd   : > { %v4702_v27 = vpop.eup %3324  ;;  %v1995_v17 = vpop.xlane.xlu1 %1994  ;;  %v2230_v26 = vpack.c.bf16 %v2107_v31, %v2105_v16  ;;  %v2229_v6 = vpack.c.bf16 %v2106_v51, %v2104_v9  ;;  %v1834_v31 = vsub.f32 %v4422_v38, %v4680_v29  ;;  %v1835_v51 = vsub.f32 %v4424_v28, %v4680_v29 }
 0x6be   : > { %v4704_v21 = vpop.eup %3326  ;;  %v4706_v1 = vpop.xlane.xlu0 %1775  ;;  %3334 = vrcp.f32 %v1995_v17 }
 0x6bf   : > { %2261 = vmatprep.subr.bf16.mxu0 %v2230_v26  ;;  %v2050_v3 = vadd.f32 %v4704_v21, %v4702_v27  ;;  %v3329_v45 = vpop.eup %3328  ;;  %v1840_v28 = vsub.f32 %v4440_v36, %v4706_v1  ;;  %v1838_v36 = vsub.f32 %v4434_v22, %v4694_v19 }
 0x6c0   : > { %2262 = vmatpush1.bf16.xpose.msra.mxu0 %v2229_v6  ;;  %v3331_v30 = vpop.eup %3330  ;;  %v2109_v48 = vmul.f32 %v3329_v45, %v4503_v44  ;;  %v2108_v41 = vmul.f32 %v3329_v45, %v4498_v20  ;;  %v1836_v44 = vsub.f32 %v4428_v25, %v1770_v49  ;;  %v1952_v20 = vmul.f32 1.442695, %v1834_v31 }
 0x6c1   : > { %v4710_v54 = vpop.xlane.xlu1 %1778  ;;  %2051 = vadd.xlane.f32.xlu0 %v2050_v3  ;;  %v2111_v53 = vmul.f32 %v3331_v30, %v4511_v62  ;;  %v2110_v57 = vmul.f32 %v3331_v30, %v4505_v52  ;;  %v1837_v52 = vsub.f32 %v4430_v11, %v1770_v49  ;;  %v1954_v45 = vmul.f32 1.442695, %v1835_v51 }
 0x6c2   : > { %v1998_v12 = vpop.xlane.xlu0 %1997  ;;  %v1956_v29 = vmul.f32 1.442695, %v1836_v44  ;;  %v1960_v44 = vmul.f32 1.442695, %v1838_v36 }
 0x6c3   : > { %3336 = vrcp.f32 %v1998_v12  ;;  %v2232_v58 = vpack.c.bf16 %v2111_v53, %v2109_v48  ;;  %v2231_v16 = vpack.c.bf16 %v2110_v57, %v2108_v41  ;;  %v1958_v48 = vmul.f32 1.442695, %v1837_v52 }
 0x6c4   : > { %v1839_v57 = vsub.f32 %v4436_v55, %v4694_v19 }
 0x6c5   : > { %v2001_v43 = vpop.xlane.xlu1 %2000  ;;  %2263 = vmatprep.subr.bf16.mxu0 %v2232_v58  ;;  %v3333_v9 = vpop.eup %3332 }
 0x6c6   : > { %3338 = vrcp.f32 %v2001_v43  ;;  %v2113_v26 = vmul.f32 %v3333_v9, %v4525_v60  ;;  %v2112_v38 = vmul.f32 %v3333_v9, %v4520_v13  ;;  %v1841_v13 = vsub.f32 %v4442_v33, %v4706_v1 }
 0x6c7   : > { %v1842_v9 = vsub.f32 %v4446_v39, %v4710_v54 }
 0x6c8   : > { %2264 = vmatpush1.bf16.xpose.msra.mxu0 %v2231_v16  ;;  %v3335_v62 = vpop.eup %3334  ;;  %v1966_v22 = vmul.f32 1.442695, %v1841_v13 }
 0x6c9   : > { %v2115_v6 = vmul.f32 %v3335_v62, %v4533_v4  ;;  %v2114_v3 = vmul.f32 %v3335_v62, %v4527_v47  ;;  %v1964_v47 = vmul.f32 1.442695, %v1840_v28  ;;  %v1968_v62 = vmul.f32 1.442695, %v1842_v9 }
 0x6ca   : > { %v2004_v17 = vpop.xlane.xlu0 %2003 }
 0x6cb   : > { %3340 = vrcp.f32 %v2004_v17  ;;  %v2234_v30 = vpack.c.bf16 %v2115_v6, %v2113_v26  ;;  %v2233_v12 = vpack.c.bf16 %v2114_v3, %v2112_v38 }
 0x6cd   : > { %v2007_v25 = vpop.xlane.xlu1 %2006  ;;  %v3337_v49 = vpop.eup %3336  ;;  %2265 = vmatprep.subr.bf16.mxu0 %v2234_v30 }
 0x6ce   : > { %3342 = vrcp.f32 %v2007_v25  ;;  %v2357_v11 = vpop.xlane.xlu0 %2356  ;;  %v2117_v58 = vmul.f32 %v3337_v49, %v4547_v59  ;;  %v2116_v1 = vmul.f32 %v3337_v49, %v4542_v10  ;;  %v1962_v59 = vmul.f32 1.442695, %v1839_v57 }
 0x6cf   : > { %3344 = vpow2.f32 %v1952_v20  ;;  %v2361_v60 = vsub.f32 %v2357_v11, %v4376_v40 }
 0x6d0   : > { %3346 = vpow2.f32 %v1954_v45  ;;  %2266 = vmatpush1.bf16.xpose.msra.mxu0 %v2233_v12  ;;  %v3339_v41 = vpop.eup %3338 }
 0x6d1   : > { %3348 = vpow2.f32 %v1956_v29  ;;  %v2363_v4 = vmul.f32 1.442695, %v2361_v60  ;;  %v2360_v53 = vpop.xlane.xlu1 %2359  ;;  %v2119_v33 = vmul.f32 %v3339_v41, %v4555_v32  ;;  %v2118_v16 = vmul.f32 %v3339_v41, %v4549_v42 }
 0x6d2   : > { %3350 = vpow2.f32 %v1958_v48  ;;  %v2362_v43 = vsub.f32 %v2360_v53, %v4378_v50  ;;  %v2010_v40 = vpop.xlane.xlu0 %2009  ;;  %v1843_v32 = vsub.f32 %v4448_v15, %v4710_v54 }
 0x6d3   : > { %3352 = vpow2.f32 %v2363_v4  ;;  %v2236_v19 = vpack.c.bf16 %v2119_v33, %v2117_v58  ;;  %v2235_v50 = vpack.c.bf16 %v2118_v16, %v2116_v1  ;;  %v5493_v16 = vld [vmem:[#allocation33_spill] sm:$0xff] }
 0x6d4   : > { %3354 = vpow2.f32 %v1964_v47  ;;  %v2365_v31 = vmul.f32 1.442695, %v2362_v43  ;;  %v1970_v6 = vmul.f32 1.442695, %v1843_v32  ;;  %v5492_v47 = vld [vmem:[#allocation47_spill] sm:$0xff] }
 0x6d5   : > { %3356 = vrcp.f32 %v2010_v40  ;;  %v2013_v55 = vpop.xlane.xlu1 %2012  ;;  %v3341_v51 = vpop.eup %3340  ;;  %2267 = vmatprep.subr.bf16.mxu0 %v2236_v19 }
 0x6d6   : > { %3358 = vpow2.f32 %v2365_v31  ;;  %v2121_v39 = vmul.f32 %v3341_v51, %v4566_v34  ;;  %v2120_v15 = vmul.f32 %v3341_v51, %v4564_v37  ;;  %v5494_v31 = vld [vmem:[#allocation35_spill] sm:$0xff]  ;;  %v5496_v51 = vld [vmem:[#allocation32_spill] sm:$0xff] }
 0x6d7   : > { %3360 = vrcp.f32 %v2013_v55  ;;  %v5495_v55 = vld [vmem:[#allocation34_spill] sm:$0xff] }
 0x6d8   : > { %v3343_v10 = vpop.eup %3342  ;;  %3362 = vpow2.f32 %v1966_v22  ;;  %2268 = vmatpush1.bf16.xpose.msra.mxu0 %v2235_v50 }
 0x6d9   : > { %v4744_v42 = vpop.eup %3344  ;;  %v2123_v20 = vmul.f32 %v3343_v10, %v4574_v7  ;;  %v2122_v52 = vmul.f32 %v3343_v10, %v4568_v14  ;;  %3364 = vpow2.f32 %v1960_v44 }
 0x6da   : > { %v4749_v17 = vpop.eup %3346  ;;  %v2016_v26 = vpop.xlane.xlu0 %2015  ;;  %3366 = vpow2.f32 %v1962_v59 }
 0x6db   : > { %v4752_v54 = vpop.eup %3348  ;;  %v2238_v38 = vpack.c.bf16 %v2123_v20, %v2121_v39  ;;  %3368 = vrcp.f32 %v2016_v26  ;;  %v2237_v45 = vpack.c.bf16 %v2122_v52, %v2120_v15  ;;  %v2053_v41 = vadd.f32 %v4749_v17, %v4744_v42  ;;  %v5497_v52 = vld [vmem:[#allocation37_spill] sm:$0xff]  ;;  %v5498_v15 = vld [vmem:[#allocation39_spill] sm:$0xff] }
 0x6dc   : > { %v4754_v3 = vpop.eup %3350  ;;  %3370 = vpow2.f32 %v1968_v62 }
 0x6dd   : > { %v4756_v34 = vpop.eup %3352  ;;  %v2019_v7 = vpop.xlane.xlu1 %2018  ;;  %2269 = vmatprep.subr.bf16.mxu0 %v2238_v38  ;;  %v2056_v12 = vadd.f32 %v4754_v3, %v4752_v54  ;;  %v5499_v38 = vld [vmem:[#allocation38_spill] sm:$0xff] }
 0x6de   : > { %v4758_v14 = vpop.eup %3354  ;;  %3372 = vrcp.f32 %v2019_v7  ;;  %v2367_v37 = vsel %vm531_vm0, %v4756_v34, 0.0 }
 0x6df   : > { %v3357_v28 = vpop.eup %3356  ;;  %3374 = vpow2.f32 %v1970_v6  ;;  %2368 = vadd.xlane.f32.xlu0 %v2367_v37  ;;  %v5500_v37 = vld [vmem:[#allocation36_spill] sm:$0xff] }
 0x6e0   : > { %v4762_v29 = vpop.eup %3358  ;;  %2270 = vmatpush1.bf16.xpose.msra.mxu0 %v2237_v45  ;;  %v2125_v49 = vmul.f32 %v3357_v28, %v4584_v63  ;;  %v2124_v13 = vmul.f32 %v3357_v28, %v4582_v2 }
 0x6e1   : > { %v3361_v25 = vpop.eup %3360  ;;  %v2370_v30 = vsel %vm531_vm0, %v4762_v29, 0.0 }
 0x6e2   : > { %v4768_v48 = vpop.eup %3362  ;;  %2371 = vadd.xlane.f32.xlu1 %v2370_v30  ;;  %v2022_v11 = vpop.xlane.xlu0 %2021  ;;  %v2127_v60 = vmul.f32 %v3361_v25, %v4594_v35  ;;  %v2126_v36 = vmul.f32 %v3361_v25, %v5492_v47 }
 0x6e3   : > { %2057 = vadd.xlane.f32.xlu0 %v2056_v12  ;;  %v4774_v4 = vpop.eup %3364  ;;  %3376 = vrcp.f32 %v2022_v11  ;;  %v2062_v63 = vadd.f32 %v4768_v48, %v4758_v14 }
 0x6e4   : > { %v2240_v53 = vpack.c.bf16 %v2127_v60, %v2125_v49  ;;  %v2239_v57 = vpack.c.bf16 %v2126_v36, %v2124_v13  ;;  %v4778_v43 = vpop.eup %3366 }
 0x6e5   : > { %v2025_v40 = vpop.xlane.xlu1 %2024  ;;  %v3369_v35 = vpop.eup %3368  ;;  %v2059_v33 = vadd.f32 %v4778_v43, %v4774_v4 }
 0x6e6   : > { %3378 = vrcp.f32 %v2025_v40  ;;  %2271 = vmatprep.subr.bf16.mxu0 %v2240_v53  ;;  %2054 = vadd.xlane.f32.xlu1 %v2053_v41  ;;  %v4782_v2 = vpop.eup %3370  ;;  %v2129_v22 = vmul.f32 %v3369_v35, %v5493_v16  ;;  %v2128_v44 = vmul.f32 %v3369_v35, %v5496_v51  ;;  %v2167_v53 = vld [vmem:[%s5303_s10] sm:$0xff]  ;;  %v2168_v35 = vld [vmem:[%s5303_s10 + $0x8] sm:$0xff] }
 0x6e7   : > { %2063 = vadd.xlane.f32.xlu0 %v2062_v63  ;;  %v5504_v51 = vld [vmem:[#allocation44_spill] sm:$0xff] }
 0x6e8   : > { %v3373_v58 = vpop.eup %3372  ;;  %2272 = vmatpush1.bf16.xpose.msra.mxu0 %v2239_v57 }
 0x6e9   : > { %v4786_v1 = vpop.eup %3374  ;;  %v2131_v9 = vmul.f32 %v3373_v58, %v5494_v31  ;;  %v2130_v19 = vmul.f32 %v3373_v58, %v5495_v55  ;;  %v5501_v58 = vld [vmem:[#allocation42_spill] sm:$0xff]  ;;  %v5503_v31 = vld [vmem:[#allocation40_spill] sm:$0xff] }
 0x6ea   : > { %2060 = vadd.xlane.f32.xlu1 %v2059_v33  ;;  %v2028_v50 = vpop.xlane.xlu0 %2027  ;;  %v2065_v32 = vadd.f32 %v4786_v1, %v4782_v2 }
 0x6eb   : > { %v2242_v59 = vpack.c.bf16 %v2131_v9, %v2129_v22  ;;  %3380 = vrcp.f32 %v2028_v50  ;;  %v2241_v10 = vpack.c.bf16 %v2130_v19, %v2128_v44 }
 0x6ed   : > { %v2031_v62 = vpop.xlane.xlu1 %2030  ;;  %2273 = vmatprep.subr.bf16.mxu0 %v2242_v59  ;;  %v3377_v39 = vpop.eup %3376  ;;  %v5505_v59 = vld [vmem:[#allocation46_spill] sm:$0xff] }
 0x6ee   : > { %3382 = vrcp.f32 %v2031_v62  ;;  %2066 = vadd.xlane.f32.xlu1 %v2065_v32  ;;  %v2133_v26 = vmul.f32 %v3377_v39, %v5497_v52  ;;  %v2132_v28 = vmul.f32 %v3377_v39, %v5500_v37 }
 0x6f0   : > { %v3379_v20 = vpop.eup %3378  ;;  %2274 = vmatpush1.bf16.xpose.msra.mxu0 %v2241_v10  ;;  %v5506_v10 = vld [vmem:[#allocation45_spill] sm:$0xff] }
 0x6f1   : > { %v2135_v6 = vmul.f32 %v3379_v20, %v5498_v15  ;;  %v2134_v45 = vmul.f32 %v3379_v20, %v5499_v38 }
 0x6f2   : > { %v2034_v7 = vpop.xlane.xlu0 %2033 }
 0x6f3   : > { %3384 = vrcp.f32 %v2034_v7  ;;  %v2244_v25 = vpack.c.bf16 %v2135_v6, %v2133_v26  ;;  %v2243_v12 = vpack.c.bf16 %v2134_v45, %v2132_v28 }
 0x6f4   : > { %v2037_v30 = vpop.xlane.xlu1 %2036 }
 0x6f5   : > { %3386 = vrcp.f32 %v2037_v30  ;;  %2275 = vmatprep.subr.bf16.mxu0 %v2244_v25  ;;  %v3381_v11 = vpop.eup %3380 }
 0x6f6   : > { %v2137_v60 = vmul.f32 %v3381_v11, %v4634_v61  ;;  %v2136_v41 = vmul.f32 %v3381_v11, %v4632_v5  ;;  %v5502_v5 = vld [vmem:[#allocation41_spill] sm:$0xff] }
 0x6f8   : > { %v3383_v49 = vpop.eup %3382  ;;  %2276 = vmatpush1.bf16.xpose.msra.mxu0 %v2243_v12 }
 0x6f9   : > { %v2139_v13 = vmul.f32 %v3383_v49, %v4642_v8  ;;  %v2138_v47 = vmul.f32 %v3383_v49, %v4636_v56 }
 0x6fa   : > { %v2040_v36 = vpop.xlane.xlu0 %2039 }
 0x6fb   : > { %3388 = vrcp.f32 %v2040_v36  ;;  %v2246_v57 = vpack.c.bf16 %v2139_v13, %v2137_v60  ;;  %v2245_v63 = vpack.c.bf16 %v2138_v47, %v2136_v41 }
 0x6fc   : > { %v2043_v40 = vpop.xlane.xlu1 %2042 }
 0x6fd   : > { %v3385_v61 = vpop.eup %3384  ;;  %3390 = vrcp.f32 %v2043_v40  ;;  %2277 = vmatprep.subr.bf16.mxu0 %v2246_v57  ;;  %2171 = vperm.xlu0 %3210, %v2167_v53  }
 0x6fe   : > { %v2141_v8 = vmul.f32 %v3385_v61, %v4650_v23  ;;  %v2140_v9 = vmul.f32 %v3385_v61, %v5503_v31  ;;  %v5507_v23 = vld [vmem:[#allocation43_spill] sm:$0xff] }
 0x6ff   : > { %v3387_v56 = vpop.eup %3386  ;;  %2176 = vperm.xlu1 %3211, %v2168_v35  }
 0x700   : > { %2278 = vmatpush1.bf16.xpose.msra.mxu0 %v2245_v63  ;;  %v2143_v33 = vmul.f32 %v3387_v56, %v5501_v58  ;;  %v2142_v16 = vmul.f32 %v3387_v56, %v5502_v5  ;;  %v5509_v5 = vld [vmem:[#allocation29_spill] sm:$0xff] }
 0x702   : > { %v2248_v22 = vpack.c.bf16 %v2143_v33, %v2141_v8  ;;  %v2247_v55 = vpack.c.bf16 %v2142_v16, %v2140_v9  ;;  %v5511_v9 = vld [vmem:[#allocation31_spill] sm:$0xff] }
 0x704   : > { %2279 = vmatprep.subr.bf16.mxu0 %v2248_v22  ;;  %v5510_v22 = vld [vmem:[#allocation30_spill] sm:$0xff] }
 0x705   : > { %v3389_v19 = vpop.eup %3388 }
 0x706   : > { %v2145_v44 = vmul.f32 %v3389_v19, %v5504_v51  ;;  %v2144_v20 = vmul.f32 %v3389_v19, %v5507_v23 }
 0x707   : > { %v3391_v50 = vpop.eup %3390 }
 0x708   : > { %2280 = vmatpush1.bf16.xpose.msra.mxu0 %v2247_v55  ;;  %v2147_v32 = vmul.f32 %v3391_v50, %v5505_v59  ;;  %v2146_v62 = vmul.f32 %v3391_v50, %v5506_v10 }
 0x70a   : > { %v2250_v39 = vpack.c.bf16 %v2147_v32, %v2145_v44  ;;  %v2249_v52 = vpack.c.bf16 %v2146_v62, %v2144_v20 }
 0x70c   : > { %2281 = vmatprep.subr.bf16.mxu0 %v2250_v39 }
 0x710   : > { %2282 = vmatpush1.bf16.xpose.msra.mxu0 %v2249_v52 }
 0x746   : > { %v2046_v26 = vpop.xlane.xlu0 %2045 }
 0x747   : > { %3392 = vrcp.f32 %v2046_v26 }
 0x749   : > { %v2049_v15 = vpop.xlane.xlu1 %2048 }
 0x74a   : > { %3394 = vrcp.f32 %v2049_v15  ;;  %v5512_v15 = vmov 0  }
 0x74e   : > { %v2052_v12 = vpop.xlane.xlu0 %2051 }
 0x751   : > { %v3393_v6 = vpop.eup %3392 }
 0x752   : > { %v2149_v45 = vmul.f32 %v3393_v6, %v4686_v46  ;;  %v2148_v37 = vmul.f32 %v3393_v6, %v4684_v0 }
 0x754   : > { %v3395_v38 = vpop.eup %3394 }
 0x755   : > { %v2151_v7 = vmul.f32 %v3395_v38, %v4692_v24  ;;  %v2150_v28 = vmul.f32 %v3395_v38, %v4690_v18 }
 0x757   : > { %v2252_v25 = vpack.c.bf16 %v2151_v7, %v2149_v45  ;;  %v2251_v30 = vpack.c.bf16 %v2150_v28, %v2148_v37  ;;  %v5513_v7 = vld [vmem:[#allocation27_spill] sm:$0xff] }
 0x758   : > { %v5514_v37 = vmax.f32 %v5513_v7, 0.0 }
 0x759   : > { %2283 = vmatprep.subr.bf16.mxu0 %v2252_v25 }
 0x75a   : > { %2284 = vmatpush1.bf16.xpose.msra.mxu0 %v2251_v30 }
 0x76c   : > { %v2369_v11 = vpop.xlane.xlu0 %2368 }
 0x76d   : > { %3396 = vrcp.f32 %v2369_v11  ;;  %v5517_v11 = vld [vmem:[#allocation26_spill] sm:$0xff] }
 0x76f   : > { %v2372_v49 = vpop.xlane.xlu1 %2371 }
 0x770   : > { %3398 = vrcp.f32 %v2372_v49  ;;  %v2058_v60 = vpop.xlane.xlu0 %2057  ;;  %v5518_v49 = vmax.f32 %v5517_v11, 0.0 }
 0x771   : > { %3400 = vrcp.f32 %v2052_v12 }
 0x773   : > { %v2055_v13 = vpop.xlane.xlu1 %2054 }
 0x774   : > { %3402 = vrcp.f32 %v2055_v13  ;;  %v2064_v47 = vpop.xlane.xlu0 %2063  ;;  %v5519_v13 = vld [vmem:[#allocation24_spill] sm:$0xff] }
 0x775   : > { %3404 = vrcp.f32 %v2058_v60 }
 0x777   : > { %v2061_v46 = vpop.xlane.xlu1 %2060  ;;  %v3397_v24 = vpop.eup %3396 }
 0x778   : > { %3406 = vrcp.f32 %v2061_v46  ;;  %v2375_v18 = vmul.f32 %v3397_v24, %v4756_v34  ;;  %v5520_v46 = vmax.f32 %v5519_v13, 0.0 }
 0x779   : > { %3408 = vrcp.f32 %v2064_v47 }
 0x77a   : > { %v3399_v0 = vpop.eup %3398 }
 0x77b   : > { %v2376_v36 = vmul.f32 %v3399_v0, %v4762_v29  ;;  %v2067_v53 = vpop.xlane.xlu1 %2066  ;;  %v3401_v41 = vpop.eup %3400  ;;  %v5508_v29 = vld [vmem:[#allocation28_spill] sm:$0xff]  ;;  %v2303_v0 = vstv %s2302_s25  ;;  %s496_s25 = scalar_lea.vmem %s5308_s15, %s5546_s17 }
 0x77c   : > { %3410 = vrcp.f32 %v2067_v53  ;;  %v2172_v57 = vpop.permute.xlu0 %2171  ;;  %v2153_v61 = vmul.f32 %v3401_v41, %v4704_v21  ;;  %v2152_v8 = vmul.f32 %v3401_v41, %v4702_v27 }
 0x77d   : > { %v2377_v40 = vpack.c.bf16 %v2376_v36, %v2375_v18  ;;  %v2217_v33 = vadd.f32 %v5508_v29, %v2172_v57  ;;  %v2219_v16 = vadd.f32 %v5509_v5, %v2172_v57  ;;  %v5525_v29 = vld [vmem:[#allocation20_spill] sm:$0xff] }
 0x77e   : > { %v3403_v63 = vpop.eup %3402 }
 0x77f   : > { %v2177_v35 = vpop.permute.xlu1 %2176  ;;  %3149 = vmatmul.mubr.msk.bf16.vlgmr.msra.gmra.mrb[16].mxu1 %vm531_vm0, %v2377_v40  ;;  %v2155_v56 = vmul.f32 %v3403_v63, %v4749_v17  ;;  %v2154_v34 = vmul.f32 %v3403_v63, %v4744_v42  ;;  %v3405_v58 = vpop.eup %3404  ;;  %v5521_v40 = vld [vmem:[#allocation21_spill] sm:$0xff] }
 0x780   : > { %v2221_v31 = vadd.f32 %v5510_v22, %v2177_v35  ;;  %v2223_v55 = vadd.f32 %v5511_v9, %v2177_v35  ;;  %v2157_v17 = vmul.f32 %v3405_v58, %v4754_v3  ;;  %v2156_v39 = vmul.f32 %v3405_v58, %v4752_v54  ;;  %v2839_v9 = vld [vmem:[%s5304_s11 + $0x8] sm:$0xff] }
 0x781   : > { %v2254_v19 = vpack.c.bf16 %v2155_v56, %v2153_v61  ;;  %v2253_v50 = vpack.c.bf16 %v2154_v34, %v2152_v8  ;;  %v5522_v63 = vmax.f32 %v5521_v40, 0.0  ;;  %v5523_v61 = vld [vmem:[#allocation22_spill] sm:$0xff] }
 0x782   : > { %v3407_v51 = vpop.eup %3406  ;;  %v2225_v44 = vpack.c.bf16 %v2221_v31, %v2217_v33  ;;  %v2226_v21 = vpack.c.bf16 %v2223_v55, %v2219_v16  ;;  %v5524_v56 = vmax.f32 %v5523_v61, 0.0  ;;  %v5526_v33 = vmax.f32 %v5525_v29, 0.0  ;;  %v5527_v16 = vld [vmem:[#allocation23_spill] sm:$0xff]  ;;  %v2842_v55 = vld [vmem:[%s5304_s11 + $0x20] sm:$0xff] }
 0x783   : > { %2285 = vmatprep.subr.bf16.mxu0 %v2254_v19  ;;  %v2159_v27 = vmul.f32 %v3407_v51, %v4778_v43  ;;  %v3409_v42 = vpop.eup %3408  ;;  %v2158_v10 = vmul.f32 %v3407_v51, %v4774_v4  ;;  %v2425_v4 = vstv %s2424_s18  ;;  %v5528_v22 = vmax.f32 %v5527_v16, 0.0 }
 0x784   : > { %2286 = vmatpush1.bf16.xpose.msra.mxu0 %v2253_v50  ;;  %2291 = vmatprep.mubr.bf16.mxu0 %v2226_v21  ;;  %v2161_v23 = vmul.f32 %v3409_v42, %v4768_v48  ;;  %v2160_v43 = vmul.f32 %v3409_v42, %v4758_v14  ;;  %v5515_v14 = vld [vmem:[#allocation25_spill] sm:$0xff]  ;;  %v2851_v19 = vpack.c.bf16 %v2842_v55, %v2839_v9  ;;  %v2856_v42 = vld [vmem:[%s5305_s12] sm:$0xff] }
 0x785   : > { %v2256_v59 = vpack.c.bf16 %v2159_v27, %v2157_v17  ;;  %v2255_v20 = vpack.c.bf16 %v2158_v10, %v2156_v39  ;;  %v5516_v30 = vmax.f32 %v5515_v14, 0.0 }
 0x786   : > { %v3411_v32 = vpop.eup %3410  ;;  %2918 = vmatprep.mubr.bf16.mxu1 %v2851_v19 }
 0x787   : > { %2287 = vmatprep.subr.bf16.mxu0 %v2256_v59  ;;  %v2163_v62 = vmul.f32 %v3411_v32, %v4786_v1  ;;  %v2162_v3 = vmul.f32 %v3411_v32, %v4782_v2  ;;  %v2857_v32 = vld [vmem:[%s5305_s12 + $0x8] sm:$0xff] }
 0x789   : > { %v2258_v52 = vpack.c.bf16 %v2163_v62, %v2161_v23  ;;  %v2257_v26 = vpack.c.bf16 %v2162_v3, %v2160_v43  ;;  %v2858_v62 = vld [vmem:[%s5305_s12 + $0x10] sm:$0xff]  ;;  %v2859_v23 = vld [vmem:[%s5305_s12 + $0x18] sm:$0xff] }
 0x78c   : > { %2288 = vmatpush1.bf16.xpose.msra.mxu0 %v2255_v20 }
 0x78d   : > { %2289 = vmatprep.subr.bf16.mxu0 %v2258_v52  ;;  %v3008_v52 = vld [vmem:[%s5307_s14] sm:$0xff] }
 0x794   : > { %2290 = vmatpush1.bf16.xpose.msra.mxu0 %v2257_v26 }
 0x79b   : > { %2292 = vmatmul.mubr.bf16.vlgmr.msra.gmra.mrb[80].mxu0 %v2225_v44 }
 0x79c   : > { %3049 = vmatprep.mubr.bf16.mxu0 %v5512_v15 }
 0x852   : > { %v2415_v1 = vpop.f32.mrb[16].mxu1 }
 0x853   : > { %v2417_v6 = vpop.f32.mrb[17].mxu1  ;;  %v2426_v45 = vmul.f32 %v2425_v4, %v2415_v1 }
 0x854   : > { %v2427_v54 = vmul.f32 %v2425_v4, %v2417_v6  ;;  %v2419_v38 = vpop.f32.mrb[18].mxu1 }
 0x855   : > { %v2421_v48 = vpop.f32.mrb[19].mxu1  ;;  %v2428_v25 = vmul.f32 %v2425_v4, %v2419_v38  ;;  %v4852_v60 = vadd.f32 %v2426_v45, %v5518_v49 }
 0x856   : > { %v4842_v28 = vadd.f32 %v2427_v54, %v5514_v37  ;;  %v2429_v2 = vmul.f32 %v2425_v4, %v2421_v48 }
 0x857   : > { %v4858_v24 = vadd.f32 %v2428_v25, %v5520_v46 }
 0x858   : > { %v4846_v12 = vadd.f32 %v2429_v2, %v5516_v30  ;;  %2442 = vrot.lane.b32.xlu1 %v4842_v28, %s3423_s27 }
 0x85a   : > { %2444 = vrot.lane.b32.xlu0 %v4846_v12, %s3423_s27 }
 0x85c   : > { %2458 = vrot.lane.b32.xlu1 %v4852_v60, %s3423_s27 }
 0x85e   : > { %2460 = vrot.lane.b32.xlu0 %v4858_v24, %s3423_s27 }
 0x860   : > { %2490 = vrot.lane.b32.xlu1 %v4842_v28, %s3422_s26 }
 0x862   : > { %2492 = vrot.lane.b32.xlu0 %v4846_v12, %s3422_s26 }
 0x864   : > { %2502 = vrot.lane.b32.xlu1 %v4852_v60, %s3422_s26 }
 0x866   : > { %2504 = vrot.lane.b32.xlu0 %v4858_v24, %s3422_s26 }
 0x868   : > { %2534 = vrot.lane.b32.xlu1 %v4842_v28, %s3424_s28 }
 0x86a   : > { %2536 = vrot.lane.b32.xlu0 %v4846_v12, %s3424_s28 }
 0x86c   : > { %2546 = vrot.lane.b32.xlu1 %v4852_v60, %s3424_s28 }
 0x86e   : > { %2548 = vrot.lane.b32.xlu0 %v4858_v24, %s3424_s28  ;;  %v2293_v47 = vpop.f32.mrb[80].mxu0 }
 0x86f   : > { %v2295_v18 = vpop.f32.mrb[81].mxu0  ;;  %v2304_v41 = vmul.f32 %v2303_v0, %v2293_v47 }
 0x870   : > { %2578 = vrot.lane.b32.xlu1 %v4842_v28, %s3425_s29  ;;  %v2297_v36 = vpop.f32.mrb[82].mxu0  ;;  %v2305_v34 = vmul.f32 %v2303_v0, %v2295_v18 }
 0x871   : > { %v2299_v53 = vpop.f32.mrb[83].mxu0  ;;  %v2306_v57 = vmul.f32 %v2303_v0, %v2297_v36  ;;  %v4888_v35 = vadd.f32 %v2304_v41, %v5522_v63  ;;  %v5531_v41 = vld [vmem:[#allocation6_spill] sm:$0xff] }
 0x872   : > { %2580 = vrot.lane.b32.xlu0 %v4846_v12, %s3425_s29  ;;  %v2307_v58 = vmul.f32 %v2303_v0, %v2299_v53  ;;  %v4912_v5 = vadd.f32 %v2305_v34, %v5526_v33  ;;  %v5530_v0 = vld [vmem:[#allocation4_spill] sm:$0xff] }
 0x873   : > { %v4894_v8 = vadd.f32 %v2306_v57, %v5524_v56 }
 0x874   : > { %2590 = vrot.lane.b32.xlu1 %v4852_v60, %s3425_s29  ;;  %v4918_v31 = vadd.f32 %v2307_v58, %v5528_v22 }
 0x876   : > { %2592 = vrot.lane.b32.xlu0 %v4858_v24, %s3425_s29 }
 0x878   : > { %2454 = vrot.lane.b32.xlu1 %v4888_v35, %s3423_s27 }
 0x87a   : > { %2456 = vrot.lane.b32.xlu0 %v4894_v8, %s3423_s27 }
 0x87c   : > { %2498 = vrot.lane.b32.xlu1 %v4888_v35, %s3422_s26 }
 0x87e   : > { %2500 = vrot.lane.b32.xlu0 %v4894_v8, %s3422_s26 }
 0x880   : > { %2542 = vrot.lane.b32.xlu1 %v4888_v35, %s3424_s28 }
 0x882   : > { %2544 = vrot.lane.b32.xlu0 %v4894_v8, %s3424_s28 }
 0x884   : > { %2586 = vrot.lane.b32.xlu1 %v4888_v35, %s3425_s29 }
 0x886   : > { %2588 = vrot.lane.b32.xlu0 %v4894_v8, %s3425_s29 }
 0x888   : > { %2438 = vrot.lane.b32.xlu1 %v4912_v5, %s3423_s27 }
 0x88a   : > { %2440 = vrot.lane.b32.xlu0 %v4918_v31, %s3423_s27 }
 0x88c   : > { %2626 = vrot.lane.b32.xlu1 %v4888_v35, %s3426_s30 }
 0x88e   : > { %2628 = vrot.lane.b32.xlu0 %v4912_v5, %s3426_s30 }
 0x890   : > { %2486 = vrot.lane.b32.xlu1 %v4912_v5, %s3422_s26 }
 0x892   : > { %2488 = vrot.lane.b32.xlu0 %v4918_v31, %s3422_s26 }
 0x894   : > { %2530 = vrot.lane.b32.xlu1 %v4912_v5, %s3424_s28 }
 0x896   : > { %2636 = vrot.lane.b32.xlu0 %v4842_v28, %s3426_s30 }
 0x898   : > { %2574 = vrot.lane.b32.xlu1 %v4912_v5, %s3425_s29 }
 0x89a   : > { %2532 = vrot.lane.b32.xlu0 %v4918_v31, %s3424_s28 }
 0x89c   : > { %2630 = vrot.lane.b32.xlu1 %v4894_v8, %s3426_s30 }
 0x89e   : > { %2640 = vrot.lane.b32.xlu0 %v4846_v12, %s3426_s30 }
 0x8a0   : > { %2634 = vrot.lane.b32.xlu1 %v4852_v60, %s3426_s30 }
 0x8a2   : > { %2576 = vrot.lane.b32.xlu0 %v4918_v31, %s3425_s29 }
 0x8a4   : > { %2638 = vrot.lane.b32.xlu1 %v4858_v24, %s3426_s30 }
 0x8a6   : > { %2672 = vrot.lane.b32.xlu0 %v4912_v5, %s3427_s16 }
 0x8a8   : > { %2670 = vrot.lane.b32.xlu1 %v4888_v35, %s3427_s16 }
 0x8aa   : > { %2680 = vrot.lane.b32.xlu0 %v4842_v28, %s3427_s16 }
 0x8ac   : > { %2674 = vrot.lane.b32.xlu1 %v4894_v8, %s3427_s16 }
 0x8ae   : > { %2684 = vrot.lane.b32.xlu0 %v4846_v12, %s3427_s16 }
 0x8b0   : > { %2678 = vrot.lane.b32.xlu1 %v4852_v60, %s3427_s16 }
 0x8b2   : > { %2632 = vrot.lane.b32.xlu0 %v4918_v31, %s3426_s30  ;;  %s5529_s30 = smov 111  }
 0x8b4   : > { %2682 = vrot.lane.b32.xlu1 %v4858_v24, %s3427_s16 }
 0x8b6   : > { %2716 = vrot.lane.b32.xlu0 %v4912_v5, %s5420_s19 }
 0x8b8   : > { %2714 = vrot.lane.b32.xlu1 %v4888_v35, %s5420_s19 }
 0x8ba   : > { %2676 = vrot.lane.b32.xlu0 %v4918_v31, %s3427_s16 }
 0x8bc   : > { %2718 = vrot.lane.b32.xlu1 %v4894_v8, %s5420_s19 }
 0x8be   : > { %2724 = vrot.lane.b32.xlu0 %v4842_v28, %s5420_s19 }
 0x8c0   : > { %2722 = vrot.lane.b32.xlu1 %v4852_v60, %s5420_s19 }
 0x8c2   : > { %2720 = vrot.lane.b32.xlu0 %v4918_v31, %s5420_s19 }
 0x8c4   : > { %2726 = vrot.lane.b32.xlu1 %v4858_v24, %s5420_s19 }
 0x8c6   : > { %2728 = vrot.lane.b32.xlu0 %v4846_v12, %s5420_s19 }
 0x8c8   : > { %2758 = vrot.lane.b32.xlu1 %v4888_v35, %s5529_s30 }
 0x8ca   : > { %v2443_v50 = vpop.permute.xlu1 %2442  ;;  %2760 = vrot.lane.b32.xlu0 %v4912_v5, %s5529_s30 }
 0x8cc   : > { %2762 = vrot.lane.b32.xlu1 %v4894_v8, %s5529_s30  ;;  %v2445_v51 = vpop.permute.xlu0 %2444 }
 0x8ce   : > { %v2459_v44 = vpop.permute.xlu1 %2458  ;;  %2768 = vrot.lane.b32.xlu0 %v4842_v28, %s5529_s30 }
 0x8cf   : > { %v2464_v13 = vsel %vm511_vm1, %v2459_v44, %v2443_v50  ;;  %v2476_v34 = vsel %vm511_vm1, %v2443_v50, %v2459_v44 }
 0x8d0   : > { %2766 = vrot.lane.b32.xlu1 %v4852_v60, %s5529_s30  ;;  %v2461_v21 = vpop.permute.xlu0 %2460  ;;  %v2483_v58 = vmul.f32 %v2464_v13, %v5530_v0  ;;  %v2482_v9 = vmul.f32 %v2476_v34, %v5531_v41  ;;  %v5534_v34 = vld [vmem:[#allocation9_spill] sm:$0xff] }
 0x8d1   : > { %v2465_v14 = vsel %vm511_vm1, %v2461_v21, %v2445_v51  ;;  %v2477_v47 = vsel %vm511_vm1, %v2445_v51, %v2461_v21 }
 0x8d2   : > { %v5000_v17 = vpop.permute.xlu1 %2490  ;;  %2764 = vrot.lane.b32.xlu0 %v4918_v31, %s5529_s30  ;;  %v2485_v18 = vmul.f32 %v2465_v14, %v5530_v0  ;;  %v2484_v29 = vmul.f32 %v2477_v47, %v5531_v41  ;;  %v5533_v14 = vld [vmem:[#allocation7_spill] sm:$0xff] }
 0x8d4   : > { %2770 = vrot.lane.b32.xlu1 %v4858_v24, %s5529_s30  ;;  %v5006_v27 = vpop.permute.xlu0 %2492  ;;  %v2805_v51 = vpack.c.bf16 %v2485_v18, %v2483_v58  ;;  %v2804_v44 = vpack.c.bf16 %v2484_v29, %v2482_v9 }
 0x8d6   : > { %v5011_v59 = vpop.permute.xlu1 %2502  ;;  %2772 = vrot.lane.b32.xlu0 %v4846_v12, %s5529_s30 }
 0x8d8   : > { %2862 = vperm.xlu1 %3211, %v2856_v42   ;;  %v2505_v10 = vpop.permute.xlu0 %2504  ;;  %v2508_v42 = vsel %vm531_vm0, %v5011_v59, %v5000_v17 }
 0x8d9   : > { %v2509_v55 = vsel %vm531_vm0, %v2505_v10, %v5006_v27 }
 0x8da   : > { %v5021_v39 = vpop.permute.xlu1 %2534  ;;  %2867 = vperm.xlu0 %3210, %v2857_v32  }
 0x8dc   : > { %2872 = vperm.xlu1 %3211, %v2858_v62   ;;  %v5026_v20 = vpop.permute.xlu0 %2536  ;;  %v2521_v62 = vsel %vm531_vm0, %v5006_v27, %v2505_v10 }
 0x8dd   : > { %v2528_v10 = vmul.f32 %v2521_v62, %v5533_v14 }
 0x8de   : > { %v5031_v3 = vpop.permute.xlu1 %2546  ;;  %2877 = vperm.xlu0 %3210, %v2859_v23   ;;  %v5532_v23 = vld [vmem:[#allocation5_spill] sm:$0xff] }
 0x8df   : > { %v2527_v27 = vmul.f32 %v2508_v42, %v5532_v23 }
 0x8e0   : > { %3011 = vperm.xlu1 %3211, %v3008_v52   ;;  %v5033_v43 = vpop.permute.xlu0 %2548  ;;  %v2529_v52 = vmul.f32 %v2509_v55, %v5532_v23 }
 0x8e2   : > { %v5035_v26 = vpop.permute.xlu1 %2578 }
 0x8e4   : > { %v5037_v4 = vpop.permute.xlu0 %2580 }
 0x8e6   : > { %v5039_v1 = vpop.permute.xlu1 %2590 }
 0x8e8   : > { %v5041_v6 = vpop.permute.xlu0 %2592 }
 0x8ea   : > { %v2455_v54 = vpop.permute.xlu1 %2454 }
 0x8ec   : > { %v2457_v38 = vpop.permute.xlu0 %2456 }
 0x8ee   : > { %v2499_v48 = vpop.permute.xlu1 %2498 }
 0x8f0   : > { %v2501_v45 = vpop.permute.xlu0 %2500 }
 0x8f2   : > { %v2543_v7 = vpop.permute.xlu1 %2542 }
 0x8f4   : > { %v5043_v37 = vpop.permute.xlu0 %2544 }
 0x8f6   : > { %v5045_v2 = vpop.permute.xlu1 %2586 }
 0x8f8   : > { %v5047_v25 = vpop.permute.xlu0 %2588 }
 0x8fa   : > { %v2439_v30 = vpop.permute.xlu1 %2438 }
 0x8fb   : > { %v2462_v11 = vsel %vm511_vm1, %v2455_v54, %v2439_v30  ;;  %v2474_v49 = vsel %vm511_vm1, %v2439_v30, %v2455_v54 }
 0x8fc   : > { %v2441_v46 = vpop.permute.xlu0 %2440  ;;  %v2478_v57 = vmul.f32 %v2474_v49, %v5531_v41  ;;  %v2479_v40 = vmul.f32 %v2462_v11, %v5530_v0 }
 0x8fd   : > { %v2463_v36 = vsel %vm511_vm1, %v2457_v38, %v2441_v46  ;;  %v2475_v53 = vsel %vm511_vm1, %v2441_v46, %v2457_v38  ;;  %v2520_v46 = vsel %vm531_vm0, %v5000_v17, %v5011_v59 }
 0x8fe   : > { %v2480_v63 = vmul.f32 %v2475_v53, %v5531_v41  ;;  %v2481_v61 = vmul.f32 %v2463_v36, %v5530_v0  ;;  %v5061_v56 = vpop.permute.xlu1 %2626  ;;  %v2526_v18 = vmul.f32 %v2520_v46, %v5533_v14  ;;  %v2553_v36 = vsel %vm551_vm2, %v5033_v43, %v5026_v20 }
 0x8ff   : > { %v2809_v41 = vpack.c.bf16 %v2529_v52, %v2527_v27  ;;  %v2573_v58 = vmul.f32 %v2553_v36, %v5534_v34 }
 0x900   : > { %v2802_v33 = vpack.c.bf16 %v2480_v63, %v2478_v57  ;;  %v5066_v16 = vpop.permute.xlu0 %2628  ;;  %v2803_v22 = vpack.c.bf16 %v2481_v61, %v2479_v40  ;;  %v2808_v57 = vpack.c.bf16 %v2528_v10, %v2526_v18  ;;  %v2552_v40 = vsel %vm551_vm2, %v5031_v3, %v5021_v39 }
 0x901   : > { %v2565_v61 = vsel %vm551_vm2, %v5026_v20, %v5033_v43  ;;  %v2564_v20 = vsel %vm551_vm2, %v5021_v39, %v5031_v3  ;;  %v2571_v43 = vmul.f32 %v2552_v40, %v5534_v34 }
 0x902   : > { %v2487_v19 = vpop.permute.xlu1 %2486  ;;  %2886 = vmatprep.subr.bf16.mxu1 %v2803_v22 }
 0x903   : > { %v2506_v21 = vsel %vm531_vm0, %v2499_v48, %v2487_v19  ;;  %v2518_v50 = vsel %vm531_vm0, %v2487_v19, %v2499_v48  ;;  %2887 = vmatpush1.bf16.msra.mxu1 %v2802_v33  ;;  %v5535_v33 = vld [vmem:[#allocation8_spill] sm:$0xff] }
 0x904   : > { %2888 = vmatprep.subr.bf16.mxu1 %v2805_v51  ;;  %v2489_v32 = vpop.permute.xlu0 %2488  ;;  %v2522_v30 = vmul.f32 %v2518_v50, %v5533_v14  ;;  %v2523_v48 = vmul.f32 %v2506_v21, %v5532_v23  ;;  %v2572_v21 = vmul.f32 %v2565_v61, %v5535_v33  ;;  %v2570_v42 = vmul.f32 %v2564_v20, %v5535_v33 }
 0x905   : > { %v2507_v54 = vsel %vm531_vm0, %v2501_v45, %v2489_v32  ;;  %v2519_v38 = vsel %vm531_vm0, %v2489_v32, %v2501_v45  ;;  %v2597_v32 = vsel %vm571_vm3, %v5041_v6, %v5037_v4 }
 0x906   : > { %v2524_v11 = vmul.f32 %v2519_v38, %v5533_v14  ;;  %v2525_v49 = vmul.f32 %v2507_v54, %v5532_v23  ;;  %v2531_v13 = vpop.permute.xlu1 %2530  ;;  %v2813_v23 = vpack.c.bf16 %v2573_v58, %v2571_v43  ;;  %v2812_v52 = vpack.c.bf16 %v2572_v21, %v2570_v42 }
 0x907   : > { %2889 = vmatpush1.bf16.msra.mxu1 %v2804_v44  ;;  %v2550_v17 = vsel %vm551_vm2, %v2543_v7, %v2531_v13  ;;  %v2562_v59 = vsel %vm551_vm2, %v2531_v13, %v2543_v7  ;;  %v2596_v54 = vsel %vm571_vm3, %v5039_v1, %v5035_v26  ;;  %v2609_v14 = vsel %vm571_vm3, %v5037_v4, %v5041_v6 }
 0x908   : > { %v2806_v47 = vpack.c.bf16 %v2524_v11, %v2522_v30  ;;  %v5090_v45 = vpop.permute.xlu0 %2636  ;;  %v2807_v0 = vpack.c.bf16 %v2525_v49, %v2523_v48  ;;  %v2566_v22 = vmul.f32 %v2562_v59, %v5535_v33  ;;  %v2567_v9 = vmul.f32 %v2550_v17, %v5534_v34  ;;  %v5536_v30 = vld [vmem:[#allocation11_spill] sm:$0xff]  ;;  %v5537_v49 = vld [vmem:[#allocation10_spill] sm:$0xff]  ;;  %v5538_v17 = vld [vmem:[#allocation12_spill] sm:$0xff] }
 0x909   : > { %v2617_v48 = vmul.f32 %v2597_v32, %v5536_v30  ;;  %v2608_v4 = vsel %vm571_vm3, %v5035_v26, %v5039_v1  ;;  %v2615_v6 = vmul.f32 %v2596_v54, %v5536_v30  ;;  %v2621_v59 = vmul.f32 %v4918_v31, %v5538_v17 }
 0x90a   : > { %v2575_v53 = vpop.permute.xlu1 %2574  ;;  %2890 = vmatprep.subr.bf16.mxu1 %v2807_v0  ;;  %v2619_v26 = vmul.f32 %v4912_v5, %v5538_v17 }
 0x90b   : > { %2891 = vmatpush1.bf16.msra.mxu1 %v2806_v47  ;;  %v2594_v39 = vsel %vm571_vm3, %v5045_v2, %v2575_v53  ;;  %v2606_v3 = vsel %vm571_vm3, %v2575_v53, %v5045_v2 }
 0x90c   : > { %2892 = vmatprep.subr.bf16.mxu1 %v2809_v41  ;;  %v2533_v63 = vpop.permute.xlu0 %2532  ;;  %v2610_v13 = vmul.f32 %v2606_v3, %v5537_v49  ;;  %v2611_v46 = vmul.f32 %v2594_v39, %v5536_v30  ;;  %v2817_v41 = vpack.c.bf16 %v2617_v48, %v2615_v6  ;;  %v2819_v58 = vpack.c.bf16 %v2621_v59, %v2619_v26 }
 0x90d   : > { %v2551_v29 = vsel %vm551_vm2, %v5043_v37, %v2533_v63  ;;  %v2563_v7 = vsel %vm551_vm2, %v2533_v63, %v5043_v37  ;;  %v5539_v63 = vld [vmem:[#allocation13_spill] sm:$0xff] }
 0x90e   : > { %v2568_v55 = vmul.f32 %v2563_v7, %v5535_v33  ;;  %v2569_v19 = vmul.f32 %v2551_v29, %v5534_v34  ;;  %v5113_v51 = vpop.permute.xlu1 %2630  ;;  %v2620_v61 = vmul.f32 %v4894_v8, %v5539_v63  ;;  %v2625_v29 = vmul.f32 %v4846_v12, %v5538_v17 }
 0x90f   : > { %2893 = vmatpush1.bf16.msra.mxu1 %v2808_v57  ;;  %v2614_v57 = vmul.f32 %v2608_v4, %v5537_v49  ;;  %v2618_v31 = vmul.f32 %v4888_v35, %v5539_v63  ;;  %v2623_v33 = vmul.f32 %v4842_v28, %v5538_v17  ;;  %v2624_v5 = vmul.f32 %v4858_v24, %v5539_v63 }
 0x910   : > { %v2810_v37 = vpack.c.bf16 %v2568_v55, %v2566_v22  ;;  %v5120_v50 = vpop.permute.xlu0 %2640  ;;  %v2811_v44 = vpack.c.bf16 %v2569_v19, %v2567_v9  ;;  %v2642_v8 = vsel %vm600_vm4, %v5061_v56, %v5066_v16  ;;  %v2622_v12 = vmul.f32 %v4852_v60, %v5539_v63  ;;  %v5540_v19 = vld [vmem:[#allocation14_spill] sm:$0xff] }
 0x911   : > { %v2818_v22 = vpack.c.bf16 %v2620_v61, %v2618_v31  ;;  %v2821_v55 = vpack.c.bf16 %v2625_v29, %v2623_v33  ;;  %v2658_v35 = vsel %vm600_vm4, %v5066_v16, %v5061_v56  ;;  %v2662_v24 = vmul.f32 %v2642_v8, %v5540_v19  ;;  %v5541_v16 = vld [vmem:[#allocation15_spill] sm:$0xff] }
 0x912   : > { %v5126_v62 = vpop.permute.xlu1 %2634  ;;  %2894 = vmatprep.subr.bf16.mxu1 %v2811_v44  ;;  %v2820_v43 = vpack.c.bf16 %v2624_v5, %v2622_v12  ;;  %v2663_v44 = vmul.f32 %v2658_v35, %v5541_v16  ;;  %v5544_v5 = vld [vmem:[#allocation18_spill] sm:$0xff] }
 0x913   : > { %2895 = vmatpush1.bf16.msra.mxu1 %v2810_v37  ;;  %v2660_v21 = vsel %vm600_vm4, %v5090_v45, %v5126_v62  ;;  %v2644_v3 = vsel %vm600_vm4, %v5126_v62, %v5090_v45  ;;  %v5542_v62 = vld [vmem:[#allocation16_spill] sm:$0xff] }
 0x914   : > { %2896 = vmatprep.subr.bf16.mxu1 %v2813_v23  ;;  %v2577_v38 = vpop.permute.xlu0 %2576 }
 0x915   : > { %v2595_v11 = vsel %vm571_vm3, %v5047_v25, %v2577_v38  ;;  %v2607_v2 = vsel %vm571_vm3, %v2577_v38, %v5047_v25  ;;  %v2616_v25 = vmul.f32 %v2609_v14, %v5537_v49 }
 0x916   : > { %v2612_v27 = vmul.f32 %v2607_v2, %v5537_v49  ;;  %v2613_v10 = vmul.f32 %v2595_v11, %v5536_v30  ;;  %v2639_v47 = vpop.permute.xlu1 %2638  ;;  %v2666_v30 = vmul.f32 %v2644_v3, %v5540_v19 }
 0x917   : > { %2897 = vmatpush1.bf16.msra.mxu1 %v2812_v52  ;;  %v2816_v1 = vpack.c.bf16 %v2616_v25, %v2614_v57  ;;  %v2661_v28 = vsel %vm600_vm4, %v5120_v50, %v2639_v47  ;;  %v2645_v60 = vsel %vm600_vm4, %v2639_v47, %v5120_v50  ;;  %v2667_v50 = vmul.f32 %v2660_v21, %v5541_v16 }
 0x918   : > { %v2814_v0 = vpack.c.bf16 %v2612_v27, %v2610_v13  ;;  %v2673_v18 = vpop.permute.xlu0 %2672  ;;  %v2815_v36 = vpack.c.bf16 %v2613_v10, %v2611_v46  ;;  %v2669_v42 = vmul.f32 %v2661_v28, %v5541_v16  ;;  %v2668_v52 = vmul.f32 %v2645_v60, %v5540_v19  ;;  %v5543_v27 = vld [vmem:[#allocation17_spill] sm:$0xff] }
 0x91a   : > { %v2671_v53 = vpop.permute.xlu1 %2670  ;;  %2898 = vmatprep.subr.bf16.mxu1 %v2815_v36  ;;  %v2825_v2 = vpack.c.bf16 %v2669_v42, %v2667_v50  ;;  %v2824_v45 = vpack.c.bf16 %v2668_v52, %v2666_v30  ;;  %v2845_v52 = vld [vmem:[%s5304_s11 + $0x38] sm:$0xff] }
 0x91b   : > { %2899 = vmatpush1.bf16.msra.mxu1 %v2814_v0  ;;  %v2686_v14 = vsel %vm620_vm5, %v2671_v53, %v2673_v18  ;;  %v2702_v48 = vsel %vm620_vm5, %v2673_v18, %v2671_v53 }
 0x91c   : > { %2900 = vmatprep.subr.bf16.mxu1 %v2817_v41  ;;  %v5155_v40 = vpop.permute.xlu0 %2680  ;;  %v2706_v13 = vmul.f32 %v2686_v14, %v5542_v62  ;;  %v2707_v10 = vmul.f32 %v2702_v48, %v5543_v27 }
 0x91e   : > { %v2675_v34 = vpop.permute.xlu1 %2674 }
 0x91f   : > { %2901 = vmatpush1.bf16.msra.mxu1 %v2816_v1 }
 0x920   : > { %2902 = vmatprep.subr.bf16.mxu1 %v2819_v58  ;;  %v2685_v7 = vpop.permute.xlu0 %2684 }
 0x922   : > { %v2679_v9 = vpop.permute.xlu1 %2678 }
 0x923   : > { %2903 = vmatpush1.bf16.msra.mxu1 %v2818_v22  ;;  %v2704_v47 = vsel %vm620_vm5, %v5155_v40, %v2679_v9  ;;  %v2688_v41 = vsel %vm620_vm5, %v2679_v9, %v5155_v40  ;;  %v5545_v22 = vld [vmem:[#allocation19_spill] sm:$0xff] }
 0x924   : > { %2904 = vmatprep.subr.bf16.mxu1 %v2821_v55  ;;  %v2633_v20 = vpop.permute.xlu0 %2632  ;;  %v2711_v17 = vmul.f32 %v2704_v47, %v5543_v27 }
 0x925   : > { %v2643_v37 = vsel %vm600_vm4, %v5113_v51, %v2633_v20  ;;  %v2659_v56 = vsel %vm600_vm4, %v2633_v20, %v5113_v51 }
 0x926   : > { %v2664_v32 = vmul.f32 %v2643_v37, %v5540_v19  ;;  %v2665_v23 = vmul.f32 %v2659_v56, %v5541_v16  ;;  %v2683_v39 = vpop.permute.xlu1 %2682 }
 0x927   : > { %2905 = vmatpush1.bf16.msra.mxu1 %v2820_v43  ;;  %v2705_v49 = vsel %vm620_vm5, %v2685_v7, %v2683_v39  ;;  %v2689_v0 = vsel %vm620_vm5, %v2683_v39, %v2685_v7 }
 0x928   : > { %v2822_v54 = vpack.c.bf16 %v2664_v32, %v2662_v24  ;;  %v2717_v51 = vpop.permute.xlu0 %2716  ;;  %v2823_v38 = vpack.c.bf16 %v2665_v23, %v2663_v44  ;;  %v2713_v18 = vmul.f32 %v2705_v49, %v5543_v27  ;;  %v2712_v1 = vmul.f32 %v2689_v0, %v5542_v62  ;;  %v2838_v32 = vld [vmem:[%s5304_s11] sm:$0xff]  ;;  %v2841_v23 = vld [vmem:[%s5304_s11 + $0x18] sm:$0xff]  ;;  %v2847_v49 = vld [vmem:[%s5304_s11 + $0x48] sm:$0xff] }
 0x92a   : > { %v2715_v11 = vpop.permute.xlu1 %2714  ;;  %2906 = vmatprep.subr.bf16.mxu1 %v2823_v38  ;;  %v2829_v61 = vpack.c.bf16 %v2713_v18, %v2711_v17  ;;  %v2850_v38 = vpack.c.bf16 %v2841_v23, %v2838_v32 }
 0x92b   : > { %2907 = vmatpush1.bf16.msra.mxu1 %v2822_v54  ;;  %v2730_v58 = vsel %vm640_vm6, %v2715_v11, %v2717_v51  ;;  %v2746_v29 = vsel %vm640_vm6, %v2717_v51, %v2715_v11  ;;  %v2848_v54 = vld [vmem:[%s5304_s11 + $0x50] sm:$0xff] }
 0x92c   : > { %2908 = vmatprep.subr.bf16.mxu1 %v2825_v2  ;;  %v2677_v46 = vpop.permute.xlu0 %2676  ;;  %v2750_v8 = vmul.f32 %v2730_v58, %v5544_v5  ;;  %v2751_v9 = vmul.f32 %v2746_v29, %v5545_v22  ;;  %v2854_v14 = vpack.c.bf16 %v2848_v54, %v2845_v52  ;;  %v2844_v2 = vld [vmem:[%s5304_s11 + $0x30] sm:$0xff]  ;;  %v2843_v29 = vld [vmem:[%s5304_s11 + $0x28] sm:$0xff] }
 0x92d   : > { %v2687_v4 = vsel %vm620_vm5, %v2675_v34, %v2677_v46  ;;  %v2703_v6 = vsel %vm620_vm5, %v2677_v46, %v2675_v34  ;;  %v2710_v34 = vmul.f32 %v2688_v41, %v5542_v62  ;;  %v2853_v47 = vpack.c.bf16 %v2847_v49, %v2844_v2  ;;  %v2840_v58 = vld [vmem:[%s5304_s11 + $0x10] sm:$0xff] }
 0x92e   : > { %v2708_v36 = vmul.f32 %v2687_v4, %v5542_v62  ;;  %v2709_v25 = vmul.f32 %v2703_v6, %v5543_v27  ;;  %v2719_v53 = vpop.permute.xlu1 %2718  ;;  %v3413_v4 = vld [vmem:[%s5296_s3 + $0x18] ss:$0 sm:$0xff] }
 0x92f   : > { %2909 = vmatpush1.bf16.msra.mxu1 %v2824_v45  ;;  %v2828_v40 = vpack.c.bf16 %v2712_v1, %v2710_v34 }
 0x930   : > { %v2826_v59 = vpack.c.bf16 %v2708_v36, %v2706_v13  ;;  %v2725_v57 = vpop.permute.xlu0 %2724  ;;  %v2827_v26 = vpack.c.bf16 %v2709_v25, %v2707_v10  ;;  %v3412_v13 = vld [vmem:[%s5296_s3 + $0x10] ss:$0 sm:$0xff] }
 0x932   : > { %v2723_v63 = vpop.permute.xlu1 %2722  ;;  %2910 = vmatprep.subr.bf16.mxu1 %v2827_v26 }
 0x933   : > { %2911 = vmatpush1.bf16.msra.mxu1 %v2826_v59  ;;  %v2732_v28 = vsel %vm640_vm6, %v2723_v63, %v2725_v57  ;;  %v2748_v19 = vsel %vm640_vm6, %v2725_v57, %v2723_v63 }
 0x934   : > { %2912 = vmatprep.subr.bf16.mxu1 %v2829_v61  ;;  %v2721_v31 = vpop.permute.xlu0 %2720  ;;  %v2754_v37 = vmul.f32 %v2732_v28, %v5544_v5  ;;  %v2755_v56 = vmul.f32 %v2748_v19, %v5545_v22 }
 0x935   : > { %v2731_v7 = vsel %vm640_vm6, %v2719_v53, %v2721_v31  ;;  %v2747_v33 = vsel %vm640_vm6, %v2721_v31, %v2719_v53 }
 0x936   : > { %v2752_v55 = vmul.f32 %v2731_v7, %v5544_v5  ;;  %v2753_v12 = vmul.f32 %v2747_v33, %v5545_v22  ;;  %v2727_v35 = vpop.permute.xlu1 %2726  ;;  %v2852_v7 = vpack.c.bf16 %v2843_v29, %v2840_v58  ;;  %v2846_v33 = vld [vmem:[%s5304_s11 + $0x40] sm:$0xff] }
 0x937   : > { %2913 = vmatpush1.bf16.msra.mxu1 %v2828_v40 }
 0x938   : > { %v2830_v24 = vpack.c.bf16 %v2752_v55, %v2750_v8  ;;  %v2729_v20 = vpop.permute.xlu0 %2728  ;;  %v2831_v43 = vpack.c.bf16 %v2753_v12, %v2751_v9 }
 0x939   : > { %v2733_v21 = vsel %vm640_vm6, %v2727_v35, %v2729_v20  ;;  %v2749_v60 = vsel %vm640_vm6, %v2729_v20, %v2727_v35 }
 0x93a   : > { %v2756_v16 = vmul.f32 %v2733_v21, %v5544_v5  ;;  %v2757_v44 = vmul.f32 %v2749_v60, %v5545_v22  ;;  %v2759_v42 = vpop.permute.xlu1 %2758  ;;  %2914 = vmatprep.subr.bf16.mxu1 %v2831_v43  ;;  %v2849_v5 = vld [vmem:[%s5304_s11 + $0x58] sm:$0xff] }
 0x93b   : > { %2915 = vmatpush1.bf16.msra.mxu1 %v2830_v24  ;;  %v2855_v8 = vpack.c.bf16 %v2849_v5, %v2846_v33 }
 0x93c   : > { %v2832_v39 = vpack.c.bf16 %v2756_v16, %v2754_v37  ;;  %v2761_v3 = vpop.permute.xlu0 %2760  ;;  %v2833_v50 = vpack.c.bf16 %v2757_v44, %v2755_v56 }
 0x93d   : > { %v2774_v48 = vsel %vm660_vm7, %v2759_v42, %v2761_v3  ;;  %v2790_v45 = vsel %vm660_vm7, %v2761_v3, %v2759_v42 }
 0x93e   : > { %v2763_v51 = vpop.permute.xlu1 %2762  ;;  %2916 = vmatprep.subr.bf16.mxu1 %v2833_v50  ;;  %v2794_v46 = vmul.f32 %v3412_v13, %v2774_v48  ;;  %v2795_v6 = vmul.f32 %v3413_v4, %v2790_v45  ;;  %v3004_v45 = vld [vmem:[%s5306_s13] sm:$0xff] }
 0x93f   : > { %2917 = vmatpush1.bf16.msra.mxu1 %v2832_v39 }
 0x940   : > { %v2769_v30 = vpop.permute.xlu0 %2768 }
 0x942   : > { %v2767_v11 = vpop.permute.xlu1 %2766  ;;  %2919 = vmatmul.mubr.bf16.vlgmr.msra.gmra.mrb[20].mxu1 %v2850_v38 }
 0x943   : > { %2928 = vmatprep.mubr.bf16.mxu1 %v2854_v14  ;;  %v2776_v0 = vsel %vm660_vm7, %v2767_v11, %v2769_v30  ;;  %v2792_v25 = vsel %vm660_vm7, %v2769_v30, %v2767_v11 }
 0x944   : > { %v2765_v62 = vpop.permute.xlu0 %2764  ;;  %v2798_v57 = vmul.f32 %v3412_v13, %v2776_v0  ;;  %v2799_v63 = vmul.f32 %v3413_v4, %v2792_v25 }
 0x945   : > { %v2775_v27 = vsel %vm660_vm7, %v2763_v51, %v2765_v62  ;;  %v2791_v10 = vsel %vm660_vm7, %v2765_v62, %v2763_v51 }
 0x946   : > { %v2796_v18 = vmul.f32 %v3412_v13, %v2775_v27  ;;  %v2797_v36 = vmul.f32 %v3413_v4, %v2791_v10  ;;  %v2771_v41 = vpop.permute.xlu1 %2770 }
 0x948   : > { %v2834_v53 = vpack.c.bf16 %v2796_v18, %v2794_v46  ;;  %v2773_v17 = vpop.permute.xlu0 %2772  ;;  %v2835_v59 = vpack.c.bf16 %v2797_v36, %v2795_v6 }
 0x949   : > { %v2777_v26 = vsel %vm660_vm7, %v2771_v41, %v2773_v17  ;;  %v2793_v1 = vsel %vm660_vm7, %v2773_v17, %v2771_v41 }
 0x94a   : > { %v2800_v61 = vmul.f32 %v3412_v13, %v2777_v26  ;;  %v2801_v34 = vmul.f32 %v3413_v4, %v2793_v1  ;;  %2929 = vmatmul.mubr.bf16.gmra.mrb[24].mxu1 %v2853_v47  ;;  %2939 = vmatprep.subr.bf16.mxu1 %v2835_v59  ;;  %v3005_v13 = vpack.c.bf16 %v3004_v45, %v3004_v45 }
 0x94b   : > { %2940 = vmatpush1.bf16.msra.mxu1 %v2834_v53  ;;  %2971 = vmatprep.mubr.bf16.mxu1 %v5512_v15 }
 0x94c   : > { %v2836_v31 = vpack.c.bf16 %v2800_v61, %v2798_v57  ;;  %v2837_v40 = vpack.c.bf16 %v2801_v34, %v2799_v63 }
 0x94e   : > { %2941 = vmatprep.subr.bf16.mxu1 %v2837_v40 }
 0x94f   : > { %2942 = vmatpush1.bf16.msra.mxu1 %v2836_v31 }
 0x952   : > { %3150 = vmatmul.mubr.msk.bf16.vlgmr.msra.gmra.mrb[20].mxu1 %vm1237_vm10, %v2852_v7 }
 0x953   : > { %2981 = vmatprep.mubr.bf16.mxu1 %v5512_v15 }
 0x957   : > { %v2863_v55 = vpop.permute.xlu1 %2862 }
 0x959   : > { %v2868_v28 = vpop.permute.xlu0 %2867 }
 0x95a   : > { %3151 = vmatmul.mubr.msk.bf16.gmra.mrb[24].mxu1 %vm1237_vm10, %v2855_v8 }
 0x95b   : > { %v2873_v24 = vpop.permute.xlu1 %2872 }
 0x95d   : > { %v2878_v37 = vpop.permute.xlu0 %2877 }
 0x95f   : > { %v3012_v46 = vpop.permute.xlu1 %3011 }
 0xa25   : > { %v2973_v22 = vpop.f32.mrb[20].mxu1 }
 0xa26   : > { %v2975_v9 = vpop.f32.mrb[21].mxu1  ;;  %v3173_v19 = vadd.f32 %v2973_v22, %v2863_v55 }
 0xa27   : > { %v2977_v12 = vpop.f32.mrb[22].mxu1  ;;  %v3174_v15 = vadd.f32 %v2975_v9, %v2863_v55 }
 0xa28   : > { %v2979_v35 = vpop.f32.mrb[23].mxu1  ;;  %v3175_v43 = vadd.f32 %v2977_v12, %v2868_v28  ;;  %v2992_v42 = vmax.f32 %v3173_v19, 0.0 }
 0xa29   : > { %v3176_v56 = vadd.f32 %v2979_v35, %v2868_v28  ;;  %v2993_v3 = vmax.f32 %v3174_v15, 0.0 }
 0xa2a   : > { %v2994_v54 = vmax.f32 %v3175_v43, 0.0 }
 0xa2b   : > { %v2995_v14 = vmax.f32 %v3176_v56, 0.0 }
 0xa2d   : > { %v2983_v20 = vpop.f32.mrb[24].mxu1 }
 0xa2e   : > { %v3177_v21 = vadd.f32 %v2983_v20, %v2873_v24  ;;  %v2985_v60 = vpop.f32.mrb[25].mxu1 }
 0xa2f   : > { %v3178_v16 = vadd.f32 %v2985_v60, %v2873_v24  ;;  %v2987_v44 = vpop.f32.mrb[26].mxu1 }
 0xa30   : > { %v2996_v32 = vmax.f32 %v3177_v21, 0.0  ;;  %v3179_v23 = vadd.f32 %v2987_v44, %v2878_v37  ;;  %v2989_v39 = vpop.f32.mrb[27].mxu1 }
 0xa31   : > { %v2997_v50 = vmax.f32 %v3178_v16, 0.0  ;;  %v3180_v52 = vadd.f32 %v2989_v39, %v2878_v37 }
 0xa32   : > { %v3000_v51 = vadd.f32 %v2996_v32, %v2992_v42  ;;  %v2998_v38 = vmax.f32 %v3179_v23, 0.0 }
 0xa33   : > { %v3001_v30 = vadd.f32 %v2997_v50, %v2993_v3  ;;  %v2999_v48 = vmax.f32 %v3180_v52, 0.0 }
 0xa34   : > { %v3002_v11 = vadd.f32 %v2998_v38, %v2994_v54 }
 0xa35   : > { %v3003_v2 = vadd.f32 %v2999_v48, %v2995_v14 }
 0xa36   : > { %v3006_v49 = vpack.c.bf16 %v3002_v11, %v3000_v51 }
 0xa37   : > { %v3007_v62 = vpack.c.bf16 %v3003_v2, %v3001_v30 }
 0xa39   : > { %3017 = vmatprep.subr.bf16.mxu0 %v3007_v62 }
 0xa3a   : > { %3018 = vmatpush1.bf16.msra.mxu0 %v3006_v49 }
 0xa3d   : > { %3152 = vmatmul.mubr.msk.bf16.vlgmr.msra.gmra.mrb[84].mxu0 %vm531_vm0, %v3005_v13 }
 0xb10   : > { %v3051_v27 = vpop.f32.mrb[84].mxu0 }
 0xb11   : > { %v3052_v10 = vadd.f32 %v3051_v27, %v3012_v46  ;;  %v3053_v47 = vpop.f32.mrb[85].mxu0 }
 0xb12   : > { %v3054_v4 = vadd.f32 %v3053_v47, %v3012_v46  ;;  %v3055_v6 = vpop.f32.mrb[86].mxu0 }
 0xb13   : > { %3058 = vst [vmem:[%s496_s25] sm:$0xff] %v3052_v10  ;;  %v3056_v0 = vpop.f32.mrb[87].mxu0 }
 0xb14   : > { %3059 = vst [vmem:[%s496_s25 + $0x8] sm:$0xff] %v3054_v4 }
 0xb15 PF: > { %s27_s22 = sadd.s32 1, %s3420_s22  }
 0xb16   : > { %p24_p4 = scmp.ge.s32.totalorder %s27_s22, 4  }
 0xb18   :  { %26 = sbr.rel (!%p24_p4) target bundleno = 3 (0x3), region = 110 }

</bundles_post_ra>
